<compile_context>
chip_gen: v5e
topology: v5e:2x2
jax: 0.10.0
libtpu: 0.0.40
codegen_flags: <defaults>
</compile_context>

<pallas_src>
import functools
import numpy as np
import jax
import jax.numpy as jnp
from jax import lax
from jax.experimental import pallas as pl
from jax.experimental.pallas import tpu as pltpu


# ----------------------------------------------------------------------------
# numpy helpers (parameter / constant construction — glue)
# ----------------------------------------------------------------------------
def get_1d_sincos_pos_embed_from_grid(embed_dim, pos):
    assert embed_dim % 2 == 0
    omega = np.arange(embed_dim // 2, dtype=np.float32)
    omega /= embed_dim / 2.0
    omega = 1.0 / 10000 ** omega
    pos = pos.reshape(-1)
    out = np.einsum('m,d->md', pos, omega)
    return np.concatenate([np.sin(out), np.cos(out)], axis=1)


def init_grid_np(N, row, col, axis):
    if axis == 0:
        e = float(row) / col
        e1 = (1 - e) / 2
        e2 = e1 + e
        grid = np.linspace(e1, e2, row).reshape(row, 1)
        grid = np.repeat(grid, col, axis=1)
    else:
        grid = np.linspace(0, 1, col).reshape(1, col)
        grid = np.repeat(grid, row, axis=0)
    return np.repeat(grid.reshape(1, row, col), N, axis=0).astype('float32')


def bilinear_matrix(in_size, out_size):
    """PyTorch F.interpolate(mode='bilinear', align_corners=False) as a matrix."""
    scale = in_size / out_size
    W = np.zeros((out_size, in_size), np.float32)
    for i in range(out_size):
        src = (i + 0.5) * scale - 0.5
        if src < 0.0:
            src = 0.0
        i0 = min(int(np.floor(src)), in_size - 1)
        i1 = min(i0 + 1, in_size - 1)
        l1 = src - i0
        W[i, i0] += 1.0 - l1
        W[i, i1] += l1
    return W


# ----------------------------------------------------------------------------
# Fused language branch:
#   pos-embed add -> depth x (LN -> MHA -> +res -> LN -> MLP -> +res)
#   -> linear attention logits -> length mask -> softmax
#   -> attention-weighted sum of patch / base mappings
# One grid step per batch element; all weights resident in VMEM (bf16 for the
# big projection matrices, f32 everywhere else).
# ----------------------------------------------------------------------------
def _language_kernel(num_head, depth, valid_ref, x_ref, pos_ref,
                     ln1w, ln1b, qkvw, qkvb, projw, projb,
                     ln2w, ln2b, fc1w, fc1b, fc2w, fc2b,
                     attw, attb, pm_ref, bm_ref, patch_o, base_o):
    b = pl.program_id(0)
    x = x_ref[0] + pos_ref[0]                       # (S, D) f32
    S, D = x.shape
    hd = D // num_head
    scale = float(hd) ** -0.5

    def layernorm(v, w, bias):
        mu = jnp.mean(v, axis=-1, keepdims=True)
        var = jnp.mean((v - mu) ** 2, axis=-1, keepdims=True)
        return (v - mu) * lax.rsqrt(var + 1e-5) * w + bias

    for d in range(depth):
        h1 = layernorm(x, ln1w[d], ln1b[d])
        # fused QKV projection: one (S, D) x (D, 3D) bf16 MXU matmul, f32 acc
        qkv = jnp.dot(h1.astype(jnp.bfloat16), qkvw[d],
                      preferred_element_type=jnp.float32) + qkvb[d]
        heads = []
        for h in range(num_head):
            q = qkv[:, h * hd:(h + 1) * hd]
            k = qkv[:, D + h * hd:D + (h + 1) * hd]
            v = qkv[:, 2 * D + h * hd:2 * D + (h + 1) * hd]
            att = lax.dot_general(q, k, (((1,), (1,)), ((), ())),
                                  preferred_element_type=jnp.float32) * scale
            att = jnp.exp(att - jnp.max(att, axis=-1, keepdims=True))
            att = att * pl.reciprocal(jnp.sum(att, axis=-1, keepdims=True),
                                      approx=True)
            heads.append(jnp.dot(att, v, preferred_element_type=jnp.float32))
        attn_out = jnp.concatenate(heads, axis=-1)               # (S, D)
        x = x + jnp.dot(attn_out.astype(jnp.bfloat16), projw[d],
                        preferred_element_type=jnp.float32) + projb[d]

        h2 = layernorm(x, ln2w[d], ln2b[d])
        h2 = jnp.dot(h2.astype(jnp.bfloat16), fc1w[d],
                     preferred_element_type=jnp.float32) + fc1b[d]
        # TODO(synk): timm Block uses exact (erf) GELU; tanh approximation used here.
        h2 = jax.nn.gelu(h2, approximate=True)
        x = x + jnp.dot(h2.astype(jnp.bfloat16), fc2w[d],
                        preferred_element_type=jnp.float32) + fc2b[d]
        # TODO(synk): F.dropout(x, 0.3) (stochastic) treated as identity (eval mode).

    logits = jnp.dot(x, attw[...], preferred_element_type=jnp.float32) + attb[...]
    idx = lax.broadcasted_iota(jnp.int32, logits.shape, 0)
    logits = jnp.where(idx < valid_ref[b], logits, -10000.0)
    e = jnp.exp(logits - jnp.max(logits, axis=0, keepdims=True))
    att_l = e * pl.reciprocal(jnp.sum(e, axis=0, keepdims=True), approx=True)
    patch_o[0] = jnp.sum(att_l * pm_ref[0], axis=0, keepdims=True)   # (1, Mp)
    base_o[0] = jnp.sum(att_l * bm_ref[0], axis=0, keepdims=True)    # (1, Mb)


def language_branch(language, pm, bm, valid_len, p):
    B, S, D = language.shape
    Mp, Mb = pm.shape[-1], bm.shape[-1]
    num_head, depth = p['num_head'], p['depth']

    def full(a):
        nd = a.ndim
        return pl.BlockSpec(a.shape, lambda b, v, _n=nd: (0,) * _n)

    bf16 = jnp.bfloat16
    args = [p['pos_embed'],
            p['ln1_w'], p['ln1_b'],
            p['qkv_w'].astype(bf16), p['qkv_b'],
            p['proj_w'].astype(bf16), p['proj_b'],
            p['ln2_w'], p['ln2_b'],
            p['fc1_w'].astype(bf16), p['fc1_b'],
            p['fc2_w'].astype(bf16), p['fc2_b'],
            p['attn_w'], p['attn_b']]
    patch_sum, base_sum = pl.pallas_call(
        functools.partial(_language_kernel, num_head, depth),
        out_shape=(jax.ShapeDtypeStruct((B, 1, Mp), jnp.float32),
                   jax.ShapeDtypeStruct((B, 1, Mb), jnp.float32)),
        grid_spec=pltpu.PrefetchScalarGridSpec(
            num_scalar_prefetch=1,
            grid=(B,),
            in_specs=[pl.BlockSpec((1, S, D), lambda b, v: (b, 0, 0))]
                     + [full(a) for a in args]
                     + [pl.BlockSpec((1, S, Mp), lambda b, v: (b, 0, 0)),
                        pl.BlockSpec((1, S, Mb), lambda b, v: (b, 0, 0))],
            out_specs=(pl.BlockSpec((1, 1, Mp), lambda b, v: (b, 0, 0)),
                       pl.BlockSpec((1, 1, Mb), lambda b, v: (b, 0, 0)))),
        compiler_params=pltpu.CompilerParams(dimension_semantics=("parallel",)),
    )(valid_len, language, *args, pm, bm)
    return patch_sum[:, 0], base_sum[:, 0]


# ----------------------------------------------------------------------------
# Learned Gaussian prior
# ----------------------------------------------------------------------------
def _prior_kernel(mu_ref, sig_ref, xg_ref, yg_ref, o_ref):
    mu_x = jnp.clip(mu_ref[:, 0:1], 0.35, 0.65)
    mu_y = jnp.clip(mu_ref[:, 1:2], 0.25, 0.75)
    sig_x = jnp.clip(sig_ref[:, 0:1], 0.2, 0.8)
    sig_y = jnp.clip(sig_ref[:, 1:2], 0.1, 0.9)
    xg = (xg_ref[...] - mu_x) ** 2 / (2.0 * sig_x * sig_x)
    yg = (yg_ref[...] - mu_y) ** 2 / (2.0 * sig_y * sig_y)
    g = jnp.exp(-(xg + yg)) / (2.0 * np.pi * sig_x * sig_y)
    g = g / jnp.max(g, axis=1, keepdims=True)
    o_ref[...] = g


def learned_prior_nhwc(pp, batch_size):
    mu_t, sig_t, xg, yg = pp['mu_t'], pp['sigma_t'], pp['x_grid'], pp['y_grid']
    row, col = pp['row'], pp['col']
    N = mu_t.shape[0]
    g = pl.pallas_call(
        _prior_kernel,
        out_shape=jax.ShapeDtypeStruct((N, row * col), jnp.float32),
        grid=(1,),
        in_specs=[pl.BlockSpec(mu_t.shape, lambda i: (0, 0)),
                  pl.BlockSpec(sig_t.shape, lambda i: (0, 0)),
                  pl.BlockSpec(xg.shape, lambda i: (0, 0)),
                  pl.BlockSpec(yg.shape, lambda i: (0, 0))],
        out_specs=pl.BlockSpec((N, row * col), lambda i: (0, 0)),
    )(mu_t, sig_t, xg, yg)
    g = jnp.transpose(g.reshape(N, row, col), (1, 2, 0))          # (row, col, N) — tiny
    return jnp.broadcast_to(g[None], (batch_size, row, col, N))


# ----------------------------------------------------------------------------
# Conv2d (stride 1, "same" padding), NHWC, im2col formulation.
#   * whole (unpadded) image of one batch element is a BlockSpec block:
#     Pallas auto double-buffers it across the batch axis (DMA overlapped with
#     the previous batch element's compute); no per-tile blocking DMA.
#   * zero-padded bf16 copy built ONCE per batch element in VMEM scratch
#     (replaces the XLA-side jnp.pad HBM round trip).
#   * bf16 im2col slab + bf16 weights, one MXU matmul per row tile, f32 acc.
# ----------------------------------------------------------------------------
def _conv_kernel(kh, kw, H, W, Cin, row_tile, relu,
                 x_ref, w_ref, b_ref, o_ref, xp_ref, slab_ref):
    rr = pl.program_id(1)
    ph, pw = kh // 2, kw // 2
    K = kh * kw * Cin

    # Build the zero-padded bf16 image in VMEM once per batch element.
    @pl.when(rr == 0)
    def _():
        xp_ref[...] = jnp.zeros_like(xp_ref)
        xp_ref[ph:ph + H, pw:pw + W, :] = x_ref[0].astype(jnp.bfloat16)

    r0 = rr * row_tile
    if row_tile % 8 == 0:
        r0 = pl.multiple_of(r0, 8)

    # im2col slab (bf16): concatenate the kh*kw shifted patches along lanes.
    for dy in range(kh):
        for dx in range(kw):
            off = (dy * kw + dx) * Cin
            slab_ref[:, :, off:off + Cin] = xp_ref[pl.ds(r0 + dy, row_tile),
                                                   dx:dx + W, :]

    acc = jnp.dot(slab_ref[...].reshape(row_tile * W, K), w_ref[...],
                  preferred_element_type=jnp.float32)             # (rt*W, Cout) f32
    acc = acc + b_ref[...]
    if relu:
        acc = jnp.maximum(acc, 0.0)
    o_ref[0] = acc.astype(o_ref.dtype)


def _pick_row_tile(H, W, K, max_pixels=8192, slab_budget=6 * 1024 * 1024):
    budget = min(max_pixels, slab_budget // (K * 2))
    for cand in range(H, 0, -1):
        if H % cand == 0 and cand * W <= budget:
            return cand
    return 1


def conv2d_same(x, w, b, *, relu, out_dtype=jnp.bfloat16):
    # x: (B, H, W, Cin) NHWC (f32 or bf16) ; w: (kh, kw, Cin, Cout) ; b: (1, Cout)
    B, H, W, Cin = x.shape
    kh, kw, _, Cout = w.shape
    ph, pw = kh // 2, kw // 2
    Hp, Wp = H + 2 * ph, W + 2 * pw
    K = kh * kw * Cin
    row_tile = _pick_row_tile(H, W, K)
    n_rt = H // row_tile
    wf = w.reshape(K, Cout).astype(jnp.bfloat16)
    bf = b.astype(jnp.float32)

    out = pl.pallas_call(
        functools.partial(_conv_kernel, kh, kw, H, W, Cin, row_tile, relu),
        out_shape=jax.ShapeDtypeStruct((B, H * W, Cout), out_dtype),
        grid_spec=pltpu.PrefetchScalarGridSpec(
            num_scalar_prefetch=0,
            grid=(B, n_rt),
            in_specs=[pl.BlockSpec((1, H, W, Cin), lambda bb, rr: (bb, 0, 0, 0)),
                      pl.BlockSpec((K, Cout), lambda bb, rr: (0, 0)),
                      pl.BlockSpec((1, Cout), lambda bb, rr: (0, 0))],
            out_specs=pl.BlockSpec((1, row_tile * W, Cout),
                                   lambda bb, rr: (bb, rr, 0)),
            scratch_shapes=[pltpu.VMEM((Hp, Wp, Cin), jnp.bfloat16),
                            pltpu.VMEM((row_tile, W, K), jnp.bfloat16)]),
        compiler_params=pltpu.CompilerParams(
            # rr must stay "arbitrary": the padded-image scratch is built at
            # rr == 0 and reused by the later row tiles of the same batch elem.
            dimension_semantics=("parallel", "arbitrary"),
            vmem_limit_bytes=48 * 1024 * 1024),                   # v7x-safe
    )(x, wf, bf)
    return out.reshape(B, H, W, Cout)


def upsample2x_nearest(x):  # NHWC, nn.Upsample(scale_factor=2) default mode='nearest'
    # TODO(synk): could be folded into the next conv's padded-window build to
    # save the HBM round trip of the 4x-expanded activation.
    return jnp.repeat(jnp.repeat(x, 2, axis=1), 2, axis=2)


# ----------------------------------------------------------------------------
# Fused bilinear resize of BOTH branches to (240, 320) with the channel concat
# done inside the kernel: output is (B, 32, 240, 320) planar, channels
# [0:16] = base, [16:32] = patch (matches torch.cat([base, patch], dim=1)).
# Width resize = one channel-batched matmul, height resize per channel.
# All matmul operands bf16, f32 accumulation, 320 lanes (dense) everywhere.
# ----------------------------------------------------------------------------
def _dual_resize_kernel(Cb, Hb, Cp, Hp_, x_b_ref, x_p_ref,
                        wxt_b, wy_b, wxt_p, wy_p, o_ref, mid_b, mid_p):
    mid_b[...] = jnp.dot(x_b_ref[0].astype(jnp.bfloat16), wxt_b[...],
                         preferred_element_type=jnp.float32).astype(jnp.bfloat16)
    mid_p[...] = jnp.dot(x_p_ref[0].astype(jnp.bfloat16), wxt_p[...],
                         preferred_element_type=jnp.float32).astype(jnp.bfloat16)
    for c in range(Cb):
        o_ref[0, c] = jnp.dot(wy_b[...], mid_b[c * Hb:(c + 1) * Hb, :],
                              preferred_element_type=jnp.float32
                              ).astype(o_ref.dtype)
    for c in range(Cp):
        o_ref[0, Cb + c] = jnp.dot(wy_p[...], mid_p[c * Hp_:(c + 1) * Hp_, :],
                                   preferred_element_type=jnp.float32
                                   ).astype(o_ref.dtype)


def resize_concat_bilinear(base_nchw, patch_nchw, out_h, out_w):
    # base/patch: (B, C, H, W) -> (B, 2C, out_h, out_w) bf16, [base ; patch]
    B, Cb, Hb, Wb = base_nchw.shape
    _, Cp, Hp_, Wp_ = patch_nchw.shape
    wy_b = jnp.asarray(bilinear_matrix(Hb, out_h), jnp.bfloat16)      # (Oh, Hb)
    wxt_b = jnp.asarray(bilinear_matrix(Wb, out_w).T, jnp.bfloat16)   # (Wb, Ow)
    wy_p = jnp.asarray(bilinear_matrix(Hp_, out_h), jnp.bfloat16)
    wxt_p = jnp.asarray(bilinear_matrix(Wp_, out_w).T, jnp.bfloat16)
    xb = base_nchw.reshape(B, Cb * Hb, Wb)
    xp = patch_nchw.reshape(B, Cp * Hp_, Wp_)
    return pl.pallas_call(
        functools.partial(_dual_resize_kernel, Cb, Hb, Cp, Hp_),
        out_shape=jax.ShapeDtypeStruct((B, Cb + Cp, out_h, out_w), jnp.bfloat16),
        grid_spec=pltpu.PrefetchScalarGridSpec(
            num_scalar_prefetch=0,
            grid=(B,),
            in_specs=[pl.BlockSpec((1, Cb * Hb, Wb), lambda b: (b, 0, 0)),
                      pl.BlockSpec((1, Cp * Hp_, Wp_), lambda b: (b, 0, 0)),
                      pl.BlockSpec((Wb, out_w), lambda b: (0, 0)),
                      pl.BlockSpec((out_h, Hb), lambda b: (0, 0)),
                      pl.BlockSpec((Wp_, out_w), lambda b: (0, 0)),
                      pl.BlockSpec((out_h, Hp_), lambda b: (0, 0))],
            out_specs=pl.BlockSpec((1, Cb + Cp, out_h, out_w),
                                   lambda b: (b, 0, 0, 0)),
            scratch_shapes=[pltpu.VMEM((Cb * Hb, out_w), jnp.bfloat16),
                            pltpu.VMEM((Cp * Hp_, out_w), jnp.bfloat16)]),
        compiler_params=pltpu.CompilerParams(
            dimension_semantics=("parallel",),
            vmem_limit_bytes=48 * 1024 * 1024),
    )(xb, xp, wxt_b, wy_b, wxt_p, wy_p)


# ----------------------------------------------------------------------------
# Final spatial softmax over H*W (lane-dense: W = 320 on lanes)
# ----------------------------------------------------------------------------
def _softmax_hw_kernel(x_ref, o_ref):
    v = x_ref[0]
    m = jnp.max(jnp.max(v, axis=1, keepdims=True), axis=0, keepdims=True)
    e = jnp.exp(v - m)
    s = jnp.sum(jnp.sum(e, axis=1, keepdims=True), axis=0, keepdims=True)
    o_ref[0] = e / s


def softmax_hw(x):
    B, H, W = x.shape
    return pl.pallas_call(
        _softmax_hw_kernel,
        out_shape=jax.ShapeDtypeStruct((B, H, W), jnp.float32),
        grid=(B,),
        in_specs=[pl.BlockSpec((1, H, W), lambda b: (b, 0, 0))],
        out_specs=pl.BlockSpec((1, H, W), lambda b: (b, 0, 0)),
        compiler_params=pltpu.CompilerParams(dimension_semantics=("parallel",)),
    )(x)


# ----------------------------------------------------------------------------
# Saliency decoder / header (conv stacks), NHWC end-to-end, bf16 activations
# ----------------------------------------------------------------------------
def sal_decoder(x, p):
    x = conv2d_same(x, p['w1'], p['b1'], relu=True)
    x = upsample2x_nearest(x)
    x = conv2d_same(x, p['w2'], p['b2'], relu=True)
    x = upsample2x_nearest(x)
    x = conv2d_same(x, p['w3'], p['b3'], relu=True)
    x = upsample2x_nearest(x)
    return x


def sal_header(x, p):
    x = conv2d_same(x, p['w1'], p['b1'], relu=True)
    x = conv2d_same(x, p['w2'], p['b2'], relu=True)
    # TODO(synk): conv2+conv3 could be fused so the 8-channel intermediate never
    # hits HBM and the 1-channel output is emitted lane-dense (W on lanes).
    x = conv2d_same(x, p['w3'], p['b3'], relu=False, out_dtype=jnp.float32)
    return x


# ----------------------------------------------------------------------------
# Full forward pass (temporal_step == 1 path, get_lang_att=False)
# ----------------------------------------------------------------------------
def blind_transformer_ms_forward(params, language, patch_mapping, base_mapping, valid_len):
    B, S, D = language.shape
    Ch = patch_mapping.shape[2]
    hp, wp = patch_mapping.shape[3], patch_mapping.shape[4]
    hb, wb = base_mapping.shape[3], base_mapping.shape[4]

    # pre-permute the (small) mapping tensors so the weighted sum lands in NHWC order
    pm = jnp.transpose(patch_mapping, (0, 1, 3, 4, 2)).reshape(B, S, hp * wp * Ch)
    bm = jnp.transpose(base_mapping, (0, 1, 3, 4, 2)).reshape(B, S, hb * wb * Ch)

    patch_att, base_att = language_branch(language, pm, bm, valid_len, params)
    patch_att = patch_att.reshape(B, hp, wp, Ch)     # NHWC, f32
    base_att = base_att.reshape(B, hb, wb, Ch)

    prior_patch = learned_prior_nhwc(params['prior_patch'], B)
    prior_base = learned_prior_nhwc(params['prior_base'], B)

    patch_att = jnp.concatenate([patch_att, prior_patch], axis=-1)
    base_att = jnp.concatenate([base_att, prior_base], axis=-1)

    patch_att = sal_decoder(patch_att, params['sal_decoder'])    # NHWC bf16 (B, 8hp, 8wp, 16)
    base_att = sal_decoder(base_att, params['sal_decoder'])      # NHWC bf16 (B, 8hb, 8wb, 16)

    # one fused bilinear-resize + channel-concat kernel -> (B, 32, 240, 320)
    vis = resize_concat_bilinear(jnp.transpose(base_att, (0, 3, 1, 2)),
                                 jnp.transpose(patch_att, (0, 3, 1, 2)),
                                 240, 320)
    # TODO(synk): this NCHW->NHWC transpose is still an XLA-side HBM round trip;
    # folding it into the header conv1 padded-window build would remove it.
    vis = jnp.transpose(vis, (0, 2, 3, 1))                       # NHWC (B, 240, 320, 32) bf16
    sal = sal_header(vis, params['sal_header'])                  # (B, 240, 320, 1) f32
    sal = sal[..., 0]                                            # (B, 240, 320)
    return softmax_hw(sal)


# ----------------------------------------------------------------------------
# Deterministic parameter construction
# ----------------------------------------------------------------------------
def init_params(key, *, D, num_head, depth, input_head, img_h, img_w, max_len):
    keys = iter(jax.random.split(key, 64))

    def nrm(shape, scale=0.02):
        return (scale * jax.random.normal(next(keys), shape)).astype(jnp.float32)

    def prior(N, row, col):
        return dict(
            mu_t=jax.random.normal(next(keys), (N, 2)).astype(jnp.float32),
            sigma_t=jax.random.normal(next(keys), (N, 2)).astype(jnp.float32),
            x_grid=jnp.asarray(init_grid_np(N, row, col, 0).reshape(N, row * col)),
            y_grid=jnp.asarray(init_grid_np(N, row, col, 1).reshape(N, row * col)),
            row=row, col=col)

    pos = get_1d_sincos_pos_embed_from_grid(D, np.arange(max_len))
    return dict(
        num_head=num_head, depth=depth,
        pos_embed=jnp.asarray(pos, jnp.float32)[None],       # (1, max_len, D)
        ln1_w=jnp.ones((depth, 1, D), jnp.float32),
        ln1_b=jnp.zeros((depth, 1, D), jnp.float32),
        qkv_w=nrm((depth, D, 3 * D)), qkv_b=nrm((depth, 1, 3 * D)),
        proj_w=nrm((depth, D, D)), proj_b=nrm((depth, 1, D)),
        ln2_w=jnp.ones((depth, 1, D), jnp.float32),
        ln2_b=jnp.zeros((depth, 1, D), jnp.float32),
        fc1_w=nrm((depth, D, 4 * D)), fc1_b=nrm((depth, 1, 4 * D)),
        fc2_w=nrm((depth, 4 * D, D)), fc2_b=nrm((depth, 1, D)),
        attn_w=nrm((D, 1)), attn_b=nrm((1, 1)),
        prior_patch=prior(16, img_h, img_w),
        prior_base=prior(16, 24, 24),
        sal_decoder=dict(
            w1=nrm((5, 5, input_head + 16, 32), 0.05), b1=nrm((1, 32), 0.05),
            w2=nrm((5, 5, 32, 16), 0.05), b2=nrm((1, 16), 0.05),
            w3=nrm((3, 3, 16, 16), 0.05), b3=nrm((1, 16), 0.05)),
        sal_header=dict(
            w1=nrm((3, 3, 32, 16), 0.05), b1=nrm((1, 16), 0.05),
            w2=nrm((3, 3, 16, 8), 0.05), b2=nrm((1, 8), 0.05),
            w3=nrm((3, 3, 8, 1), 0.05), b3=nrm((1, 1), 0.05)),
    )


if __name__ == "__main__":
    B, S, D = 2, 8, 128          # batch, max_len, input_dim (small, consistent shapes)
    num_head, depth = 4, 2
    input_head = 8
    img_h, img_w = 6, 8          # patch-mapping spatial size; base mapping is fixed 24x24

    key = jax.random.PRNGKey(0)
    kp, k1, k2, k3 = jax.random.split(key, 4)
    params = init_params(kp, D=D, num_head=num_head, depth=depth,
                         input_head=input_head, img_h=img_h, img_w=img_w, max_len=S)

    language = jax.random.normal(k1, (B, S, D), dtype=jnp.float32)
    patch_mapping = jax.random.uniform(k2, (B, S, input_head, img_h, img_w), dtype=jnp.float32)
    base_mapping = jax.random.uniform(k3, (B, S, input_head, 24, 24), dtype=jnp.float32)
    valid_len = jnp.array([5, 8], dtype=jnp.int32)

    sal = blind_transformer_ms_forward(params, language, patch_mapping, base_mapping, valid_len)
    sal = jax.block_until_ready(sal)

    assert sal.shape == (B, 240, 320), sal.shape
    assert bool(jnp.all(jnp.isfinite(sal)))
    sums = jnp.sum(sal.reshape(B, -1), axis=-1)
    assert bool(jnp.all(jnp.abs(sums - 1.0) < 1e-3)), sums
    print("KERNEL_OK")
</pallas_src>

<mosaic_0001>
module attributes {stable_mosaic.version = 11 : i64} {
  func.func @_language_kernel(%arg0: i32, %arg1: memref<2xi32, #tpu.memory_space<smem>>, %arg2: memref<1x8x128xf32, #tpu.memory_space<vmem>>, %arg3: memref<1x8x128xf32, #tpu.memory_space<vmem>>, %arg4: memref<2x1x128xf32, #tpu.memory_space<vmem>>, %arg5: memref<2x1x128xf32, #tpu.memory_space<vmem>>, %arg6: memref<2x128x384xbf16, #tpu.memory_space<vmem>>, %arg7: memref<2x1x384xf32, #tpu.memory_space<vmem>>, %arg8: memref<2x128x128xbf16, #tpu.memory_space<vmem>>, %arg9: memref<2x1x128xf32, #tpu.memory_space<vmem>>, %arg10: memref<2x1x128xf32, #tpu.memory_space<vmem>>, %arg11: memref<2x1x128xf32, #tpu.memory_space<vmem>>, %arg12: memref<2x128x512xbf16, #tpu.memory_space<vmem>>, %arg13: memref<2x1x512xf32, #tpu.memory_space<vmem>>, %arg14: memref<2x512x128xbf16, #tpu.memory_space<vmem>>, %arg15: memref<2x1x128xf32, #tpu.memory_space<vmem>>, %arg16: memref<128x1xf32, #tpu.memory_space<vmem>>, %arg17: memref<1x1xf32, #tpu.memory_space<vmem>>, %arg18: memref<1x8x384xf32, #tpu.memory_space<vmem>>, %arg19: memref<1x8x4608xf32, #tpu.memory_space<vmem>>, %arg20: memref<1x1x384xf32, #tpu.memory_space<vmem>>, %arg21: memref<1x1x4608xf32, #tpu.memory_space<vmem>>) attributes {dimension_semantics = [#tpu.dimension_semantics<parallel>], iteration_bounds = array<i64: 2>, scalar_prefetch = 1 : i64, scratch_operands = 0 : i64, tpu.core_type = #tpu.core_type<tc>, window_params = [{transform_indices = @transform_0, window_bounds = array<i64: 1, 8, 128>}, {pipeline_mode = #tpu.pipeline_mode<synchronous>, transform_indices = @transform_1, window_bounds = array<i64: 1, 8, 128>}, {pipeline_mode = #tpu.pipeline_mode<synchronous>, transform_indices = @transform_2, window_bounds = array<i64: 2, 1, 128>}, {pipeline_mode = #tpu.pipeline_mode<synchronous>, transform_indices = @transform_3, window_bounds = array<i64: 2, 1, 128>}, {pipeline_mode = #tpu.pipeline_mode<synchronous>, transform_indices = @transform_4, window_bounds = array<i64: 2, 128, 384>}, {pipeline_mode = #tpu.pipeline_mode<synchronous>, transform_indices = @transform_5, window_bounds = array<i64: 2, 1, 384>}, {pipeline_mode = #tpu.pipeline_mode<synchronous>, transform_indices = @transform_6, window_bounds = array<i64: 2, 128, 128>}, {pipeline_mode = #tpu.pipeline_mode<synchronous>, transform_indices = @transform_7, window_bounds = array<i64: 2, 1, 128>}, {pipeline_mode = #tpu.pipeline_mode<synchronous>, transform_indices = @transform_8, window_bounds = array<i64: 2, 1, 128>}, {pipeline_mode = #tpu.pipeline_mode<synchronous>, transform_indices = @transform_9, window_bounds = array<i64: 2, 1, 128>}, {pipeline_mode = #tpu.pipeline_mode<synchronous>, transform_indices = @transform_10, window_bounds = array<i64: 2, 128, 512>}, {pipeline_mode = #tpu.pipeline_mode<synchronous>, transform_indices = @transform_11, window_bounds = array<i64: 2, 1, 512>}, {pipeline_mode = #tpu.pipeline_mode<synchronous>, transform_indices = @transform_12, window_bounds = array<i64: 2, 512, 128>}, {pipeline_mode = #tpu.pipeline_mode<synchronous>, transform_indices = @transform_13, window_bounds = array<i64: 2, 1, 128>}, {pipeline_mode = #tpu.pipeline_mode<synchronous>, transform_indices = @transform_14, window_bounds = array<i64: 128, 1>}, {pipeline_mode = #tpu.pipeline_mode<synchronous>, transform_indices = @transform_15, window_bounds = array<i64: 1, 1>}, {transform_indices = @transform_16, window_bounds = array<i64: 1, 8, 384>}, {transform_indices = @transform_17, window_bounds = array<i64: 1, 8, 4608>}, {transform_indices = @transform_18, window_bounds = array<i64: 1, 1, 384>}, {transform_indices = @transform_19, window_bounds = array<i64: 1, 1, 4608>}]} {
    %c0 = arith.constant 0 : index
    %c0_0 = arith.constant 0 : index
    %c0_1 = arith.constant 0 : index
    %0 = vector.load %arg2[%c0, %c0_0, %c0_1] : memref<1x8x128xf32, #tpu.memory_space<vmem>>, vector<1x8x128xf32>
    %1 = vector.shape_cast %0 : vector<1x8x128xf32> to vector<8x128xf32>
    %c0_2 = arith.constant 0 : index
    %c0_3 = arith.constant 0 : index
    %c0_4 = arith.constant 0 : index
    %2 = vector.load %arg3[%c0_2, %c0_3, %c0_4] : memref<1x8x128xf32, #tpu.memory_space<vmem>>, vector<1x8x128xf32>
    %3 = vector.shape_cast %2 : vector<1x8x128xf32> to vector<8x128xf32>
    %4 = arith.addf %1, %3 : vector<8x128xf32>
    %c0_5 = arith.constant 0 : index
    %c0_6 = arith.constant 0 : index
    %c0_7 = arith.constant 0 : index
    %5 = vector.load %arg4[%c0_5, %c0_6, %c0_7] : memref<2x1x128xf32, #tpu.memory_space<vmem>>, vector<1x1x128xf32>
    %6 = vector.shape_cast %5 : vector<1x1x128xf32> to vector<1x128xf32>
    %c0_8 = arith.constant 0 : index
    %c0_9 = arith.constant 0 : index
    %c0_10 = arith.constant 0 : index
    %7 = vector.load %arg5[%c0_8, %c0_9, %c0_10] : memref<2x1x128xf32, #tpu.memory_space<vmem>>, vector<1x1x128xf32>
    %8 = vector.shape_cast %7 : vector<1x1x128xf32> to vector<1x128xf32>
    %cst = arith.constant dense<0.000000e+00> : vector<8xf32>
    %9 = vector.multi_reduction <add>, %4, %cst [1] : vector<8x128xf32> to vector<8xf32>
    %10 = vector.shape_cast %9 : vector<8xf32> to vector<8x1xf32>
    %cst_11 = arith.constant 1.280000e+02 : f32
    %11 = vector.broadcast %cst_11 : f32 to vector<8x1xf32>
    %12 = arith.divf %10, %11 : vector<8x1xf32>
    %13 = vector.broadcast %12 : vector<8x1xf32> to vector<8x128xf32>
    %14 = arith.subf %4, %13 : vector<8x128xf32>
    %15 = arith.mulf %14, %14 : vector<8x128xf32>
    %cst_12 = arith.constant dense<0.000000e+00> : vector<8xf32>
    %16 = vector.multi_reduction <add>, %15, %cst_12 [1] : vector<8x128xf32> to vector<8xf32>
    %17 = vector.shape_cast %16 : vector<8xf32> to vector<8x1xf32>
    %cst_13 = arith.constant 1.280000e+02 : f32
    %18 = vector.broadcast %cst_13 : f32 to vector<8x1xf32>
    %19 = arith.divf %17, %18 : vector<8x1xf32>
    %20 = vector.broadcast %12 : vector<8x1xf32> to vector<8x128xf32>
    %21 = arith.subf %4, %20 : vector<8x128xf32>
    %cst_14 = arith.constant 9.99999974E-6 : f32
    %22 = vector.broadcast %cst_14 : f32 to vector<8x1xf32>
    %23 = arith.addf %19, %22 : vector<8x1xf32>
    %24 = math.rsqrt %23 : vector<8x1xf32>
    %25 = vector.broadcast %24 : vector<8x1xf32> to vector<8x128xf32>
    %26 = arith.mulf %21, %25 : vector<8x128xf32>
    %27 = vector.broadcast %6 : vector<1x128xf32> to vector<8x128xf32>
    %28 = arith.mulf %26, %27 : vector<8x128xf32>
    %29 = vector.broadcast %8 : vector<1x128xf32> to vector<8x128xf32>
    %30 = arith.addf %28, %29 : vector<8x128xf32>
    %31 = arith.truncf %30 : vector<8x128xf32> to vector<8x128xbf16>
    %c0_15 = arith.constant 0 : index
    %c0_16 = arith.constant 0 : index
    %c0_17 = arith.constant 0 : index
    %32 = vector.load %arg6[%c0_15, %c0_16, %c0_17] : memref<2x128x384xbf16, #tpu.memory_space<vmem>>, vector<1x128x384xbf16>
    %33 = vector.shape_cast %32 : vector<1x128x384xbf16> to vector<128x384xbf16>
    %cst_18 = arith.constant dense<0.000000e+00> : vector<8x384xf32>
    %34 = tpu.matmul %31, %33, %cst_18 {dimension_numbers = #tpu.dot_dimension_numbers<[1], [0], [0], [1], [0, 0, 1, 1], [], []>} : vector<8x128xbf16>, vector<128x384xbf16>, vector<8x384xf32> -> vector<8x384xf32>
    %c0_19 = arith.constant 0 : index
    %c0_20 = arith.constant 0 : index
    %c0_21 = arith.constant 0 : index
    %35 = vector.load %arg7[%c0_19, %c0_20, %c0_21] : memref<2x1x384xf32, #tpu.memory_space<vmem>>, vector<1x1x384xf32>
    %36 = vector.shape_cast %35 : vector<1x1x384xf32> to vector<1x384xf32>
    %37 = vector.broadcast %36 : vector<1x384xf32> to vector<8x384xf32>
    %38 = arith.addf %34, %37 : vector<8x384xf32>
    %39 = vector.extract_strided_slice %38 {offsets = [0, 0], sizes = [8, 32], strides = [1, 1]} : vector<8x384xf32> to vector<8x32xf32>
    %40 = vector.extract_strided_slice %38 {offsets = [0, 128], sizes = [8, 32], strides = [1, 1]} : vector<8x384xf32> to vector<8x32xf32>
    %41 = vector.extract_strided_slice %38 {offsets = [0, 256], sizes = [8, 32], strides = [1, 1]} : vector<8x384xf32> to vector<8x32xf32>
    %cst_22 = arith.constant dense<0.000000e+00> : vector<8x8xf32>
    %42 = tpu.matmul %39, %40, %cst_22 {dimension_numbers = #tpu.dot_dimension_numbers<[1], [1], [0], [0], [0, 0, 1, 0], [], []>} : vector<8x32xf32>, vector<8x32xf32>, vector<8x8xf32> -> vector<8x8xf32>
    %cst_23 = arith.constant 0.176776692 : f32
    %43 = vector.broadcast %cst_23 : f32 to vector<8x8xf32>
    %44 = arith.mulf %42, %43 : vector<8x8xf32>
    %cst_24 = arith.constant dense<0xFF800000> : vector<8xf32>
    %45 = vector.multi_reduction <maximumf>, %44, %cst_24 [1] : vector<8x8xf32> to vector<8xf32>
    %46 = vector.shape_cast %45 : vector<8xf32> to vector<8x1xf32>
    %47 = vector.broadcast %46 : vector<8x1xf32> to vector<8x8xf32>
    %48 = arith.subf %44, %47 : vector<8x8xf32>
    %49 = math.exp %48 : vector<8x8xf32>
    %cst_25 = arith.constant dense<0.000000e+00> : vector<8xf32>
    %50 = vector.multi_reduction <add>, %49, %cst_25 [1] : vector<8x8xf32> to vector<8xf32>
    %51 = vector.shape_cast %50 : vector<8xf32> to vector<8x1xf32>
    %52 = tpu.reciprocal %51 {approx = true} : vector<8x1xf32> -> vector<8x1xf32>
    %53 = vector.broadcast %52 : vector<8x1xf32> to vector<8x8xf32>
    %54 = arith.mulf %49, %53 : vector<8x8xf32>
    %cst_26 = arith.constant dense<0.000000e+00> : vector<8x32xf32>
    %55 = tpu.matmul %54, %41, %cst_26 {dimension_numbers = #tpu.dot_dimension_numbers<[1], [0], [0], [1], [0, 0, 1, 1], [], []>} : vector<8x8xf32>, vector<8x32xf32>, vector<8x32xf32> -> vector<8x32xf32>
    %56 = vector.extract_strided_slice %38 {offsets = [0, 32], sizes = [8, 32], strides = [1, 1]} : vector<8x384xf32> to vector<8x32xf32>
    %57 = vector.extract_strided_slice %38 {offsets = [0, 160], sizes = [8, 32], strides = [1, 1]} : vector<8x384xf32> to vector<8x32xf32>
    %58 = vector.extract_strided_slice %38 {offsets = [0, 288], sizes = [8, 32], strides = [1, 1]} : vector<8x384xf32> to vector<8x32xf32>
    %cst_27 = arith.constant dense<0.000000e+00> : vector<8x8xf32>
    %59 = tpu.matmul %56, %57, %cst_27 {dimension_numbers = #tpu.dot_dimension_numbers<[1], [1], [0], [0], [0, 0, 1, 0], [], []>} : vector<8x32xf32>, vector<8x32xf32>, vector<8x8xf32> -> vector<8x8xf32>
    %cst_28 = arith.constant 0.176776692 : f32
    %60 = vector.broadcast %cst_28 : f32 to vector<8x8xf32>
    %61 = arith.mulf %59, %60 : vector<8x8xf32>
    %cst_29 = arith.constant dense<0xFF800000> : vector<8xf32>
    %62 = vector.multi_reduction <maximumf>, %61, %cst_29 [1] : vector<8x8xf32> to vector<8xf32>
    %63 = vector.shape_cast %62 : vector<8xf32> to vector<8x1xf32>
    %64 = vector.broadcast %63 : vector<8x1xf32> to vector<8x8xf32>
    %65 = arith.subf %61, %64 : vector<8x8xf32>
    %66 = math.exp %65 : vector<8x8xf32>
    %cst_30 = arith.constant dense<0.000000e+00> : vector<8xf32>
    %67 = vector.multi_reduction <add>, %66, %cst_30 [1] : vector<8x8xf32> to vector<8xf32>
    %68 = vector.shape_cast %67 : vector<8xf32> to vector<8x1xf32>
    %69 = tpu.reciprocal %68 {approx = true} : vector<8x1xf32> -> vector<8x1xf32>
    %70 = vector.broadcast %69 : vector<8x1xf32> to vector<8x8xf32>
    %71 = arith.mulf %66, %70 : vector<8x8xf32>
    %cst_31 = arith.constant dense<0.000000e+00> : vector<8x32xf32>
    %72 = tpu.matmul %71, %58, %cst_31 {dimension_numbers = #tpu.dot_dimension_numbers<[1], [0], [0], [1], [0, 0, 1, 1], [], []>} : vector<8x8xf32>, vector<8x32xf32>, vector<8x32xf32> -> vector<8x32xf32>
    %73 = vector.extract_strided_slice %38 {offsets = [0, 64], sizes = [8, 32], strides = [1, 1]} : vector<8x384xf32> to vector<8x32xf32>
    %74 = vector.extract_strided_slice %38 {offsets = [0, 192], sizes = [8, 32], strides = [1, 1]} : vector<8x384xf32> to vector<8x32xf32>
    %75 = vector.extract_strided_slice %38 {offsets = [0, 320], sizes = [8, 32], strides = [1, 1]} : vector<8x384xf32> to vector<8x32xf32>
    %cst_32 = arith.constant dense<0.000000e+00> : vector<8x8xf32>
    %76 = tpu.matmul %73, %74, %cst_32 {dimension_numbers = #tpu.dot_dimension_numbers<[1], [1], [0], [0], [0, 0, 1, 0], [], []>} : vector<8x32xf32>, vector<8x32xf32>, vector<8x8xf32> -> vector<8x8xf32>
    %cst_33 = arith.constant 0.176776692 : f32
    %77 = vector.broadcast %cst_33 : f32 to vector<8x8xf32>
    %78 = arith.mulf %76, %77 : vector<8x8xf32>
    %cst_34 = arith.constant dense<0xFF800000> : vector<8xf32>
    %79 = vector.multi_reduction <maximumf>, %78, %cst_34 [1] : vector<8x8xf32> to vector<8xf32>
    %80 = vector.shape_cast %79 : vector<8xf32> to vector<8x1xf32>
    %81 = vector.broadcast %80 : vector<8x1xf32> to vector<8x8xf32>
    %82 = arith.subf %78, %81 : vector<8x8xf32>
    %83 = math.exp %82 : vector<8x8xf32>
    %cst_35 = arith.constant dense<0.000000e+00> : vector<8xf32>
    %84 = vector.multi_reduction <add>, %83, %cst_35 [1] : vector<8x8xf32> to vector<8xf32>
    %85 = vector.shape_cast %84 : vector<8xf32> to vector<8x1xf32>
    %86 = tpu.reciprocal %85 {approx = true} : vector<8x1xf32> -> vector<8x1xf32>
    %87 = vector.broadcast %86 : vector<8x1xf32> to vector<8x8xf32>
    %88 = arith.mulf %83, %87 : vector<8x8xf32>
    %cst_36 = arith.constant dense<0.000000e+00> : vector<8x32xf32>
    %89 = tpu.matmul %88, %75, %cst_36 {dimension_numbers = #tpu.dot_dimension_numbers<[1], [0], [0], [1], [0, 0, 1, 1], [], []>} : vector<8x8xf32>, vector<8x32xf32>, vector<8x32xf32> -> vector<8x32xf32>
    %90 = vector.extract_strided_slice %38 {offsets = [0, 96], sizes = [8, 32], strides = [1, 1]} : vector<8x384xf32> to vector<8x32xf32>
    %91 = vector.extract_strided_slice %38 {offsets = [0, 224], sizes = [8, 32], strides = [1, 1]} : vector<8x384xf32> to vector<8x32xf32>
    %92 = vector.extract_strided_slice %38 {offsets = [0, 352], sizes = [8, 32], strides = [1, 1]} : vector<8x384xf32> to vector<8x32xf32>
    %cst_37 = arith.constant dense<0.000000e+00> : vector<8x8xf32>
    %93 = tpu.matmul %90, %91, %cst_37 {dimension_numbers = #tpu.dot_dimension_numbers<[1], [1], [0], [0], [0, 0, 1, 0], [], []>} : vector<8x32xf32>, vector<8x32xf32>, vector<8x8xf32> -> vector<8x8xf32>
    %cst_38 = arith.constant 0.176776692 : f32
    %94 = vector.broadcast %cst_38 : f32 to vector<8x8xf32>
    %95 = arith.mulf %93, %94 : vector<8x8xf32>
    %cst_39 = arith.constant dense<0xFF800000> : vector<8xf32>
    %96 = vector.multi_reduction <maximumf>, %95, %cst_39 [1] : vector<8x8xf32> to vector<8xf32>
    %97 = vector.shape_cast %96 : vector<8xf32> to vector<8x1xf32>
    %98 = vector.broadcast %97 : vector<8x1xf32> to vector<8x8xf32>
    %99 = arith.subf %95, %98 : vector<8x8xf32>
    %100 = math.exp %99 : vector<8x8xf32>
    %cst_40 = arith.constant dense<0.000000e+00> : vector<8xf32>
    %101 = vector.multi_reduction <add>, %100, %cst_40 [1] : vector<8x8xf32> to vector<8xf32>
    %102 = vector.shape_cast %101 : vector<8xf32> to vector<8x1xf32>
    %103 = tpu.reciprocal %102 {approx = true} : vector<8x1xf32> -> vector<8x1xf32>
    %104 = vector.broadcast %103 : vector<8x1xf32> to vector<8x8xf32>
    %105 = arith.mulf %100, %104 : vector<8x8xf32>
    %cst_41 = arith.constant dense<0.000000e+00> : vector<8x32xf32>
    %106 = tpu.matmul %105, %92, %cst_41 {dimension_numbers = #tpu.dot_dimension_numbers<[1], [0], [0], [1], [0, 0, 1, 1], [], []>} : vector<8x8xf32>, vector<8x32xf32>, vector<8x32xf32> -> vector<8x32xf32>
    %107 = tpu.concatenate %55, %72, %89, %106 in 1 : vector<8x32xf32>, vector<8x32xf32>, vector<8x32xf32>, vector<8x32xf32> -> vector<8x128xf32>
    %108 = arith.truncf %107 : vector<8x128xf32> to vector<8x128xbf16>
    %c0_42 = arith.constant 0 : index
    %c0_43 = arith.constant 0 : index
    %c0_44 = arith.constant 0 : index
    %109 = vector.load %arg8[%c0_42, %c0_43, %c0_44] : memref<2x128x128xbf16, #tpu.memory_space<vmem>>, vector<1x128x128xbf16>
    %110 = vector.shape_cast %109 : vector<1x128x128xbf16> to vector<128x128xbf16>
    %cst_45 = arith.constant dense<0.000000e+00> : vector<8x128xf32>
    %111 = tpu.matmul %108, %110, %cst_45 {dimension_numbers = #tpu.dot_dimension_numbers<[1], [0], [0], [1], [0, 0, 1, 1], [], []>} : vector<8x128xbf16>, vector<128x128xbf16>, vector<8x128xf32> -> vector<8x128xf32>
    %112 = arith.addf %4, %111 : vector<8x128xf32>
    %c0_46 = arith.constant 0 : index
    %c0_47 = arith.constant 0 : index
    %c0_48 = arith.constant 0 : index
    %113 = vector.load %arg9[%c0_46, %c0_47, %c0_48] : memref<2x1x128xf32, #tpu.memory_space<vmem>>, vector<1x1x128xf32>
    %114 = vector.shape_cast %113 : vector<1x1x128xf32> to vector<1x128xf32>
    %115 = vector.broadcast %114 : vector<1x128xf32> to vector<8x128xf32>
    %116 = arith.addf %112, %115 : vector<8x128xf32>
    %c0_49 = arith.constant 0 : index
    %c0_50 = arith.constant 0 : index
    %c0_51 = arith.constant 0 : index
    %117 = vector.load %arg10[%c0_49, %c0_50, %c0_51] : memref<2x1x128xf32, #tpu.memory_space<vmem>>, vector<1x1x128xf32>
    %118 = vector.shape_cast %117 : vector<1x1x128xf32> to vector<1x128xf32>
    %c0_52 = arith.constant 0 : index
    %c0_53 = arith.constant 0 : index
    %c0_54 = arith.constant 0 : index
    %119 = vector.load %arg11[%c0_52, %c0_53, %c0_54] : memref<2x1x128xf32, #tpu.memory_space<vmem>>, vector<1x1x128xf32>
    %120 = vector.shape_cast %119 : vector<1x1x128xf32> to vector<1x128xf32>
    %cst_55 = arith.constant dense<0.000000e+00> : vector<8xf32>
    %121 = vector.multi_reduction <add>, %116, %cst_55 [1] : vector<8x128xf32> to vector<8xf32>
    %122 = vector.shape_cast %121 : vector<8xf32> to vector<8x1xf32>
    %cst_56 = arith.constant 1.280000e+02 : f32
    %123 = vector.broadcast %cst_56 : f32 to vector<8x1xf32>
    %124 = arith.divf %122, %123 : vector<8x1xf32>
    %125 = vector.broadcast %124 : vector<8x1xf32> to vector<8x128xf32>
    %126 = arith.subf %116, %125 : vector<8x128xf32>
    %127 = arith.mulf %126, %126 : vector<8x128xf32>
    %cst_57 = arith.constant dense<0.000000e+00> : vector<8xf32>
    %128 = vector.multi_reduction <add>, %127, %cst_57 [1] : vector<8x128xf32> to vector<8xf32>
    %129 = vector.shape_cast %128 : vector<8xf32> to vector<8x1xf32>
    %cst_58 = arith.constant 1.280000e+02 : f32
    %130 = vector.broadcast %cst_58 : f32 to vector<8x1xf32>
    %131 = arith.divf %129, %130 : vector<8x1xf32>
    %132 = vector.broadcast %124 : vector<8x1xf32> to vector<8x128xf32>
    %133 = arith.subf %116, %132 : vector<8x128xf32>
    %cst_59 = arith.constant 9.99999974E-6 : f32
    %134 = vector.broadcast %cst_59 : f32 to vector<8x1xf32>
    %135 = arith.addf %131, %134 : vector<8x1xf32>
    %136 = math.rsqrt %135 : vector<8x1xf32>
    %137 = vector.broadcast %136 : vector<8x1xf32> to vector<8x128xf32>
    %138 = arith.mulf %133, %137 : vector<8x128xf32>
    %139 = vector.broadcast %118 : vector<1x128xf32> to vector<8x128xf32>
    %140 = arith.mulf %138, %139 : vector<8x128xf32>
    %141 = vector.broadcast %120 : vector<1x128xf32> to vector<8x128xf32>
    %142 = arith.addf %140, %141 : vector<8x128xf32>
    %143 = arith.truncf %142 : vector<8x128xf32> to vector<8x128xbf16>
    %c0_60 = arith.constant 0 : index
    %c0_61 = arith.constant 0 : index
    %c0_62 = arith.constant 0 : index
    %144 = vector.load %arg12[%c0_60, %c0_61, %c0_62] : memref<2x128x512xbf16, #tpu.memory_space<vmem>>, vector<1x128x512xbf16>
    %145 = vector.shape_cast %144 : vector<1x128x512xbf16> to vector<128x512xbf16>
    %cst_63 = arith.constant dense<0.000000e+00> : vector<8x512xf32>
    %146 = tpu.matmul %143, %145, %cst_63 {dimension_numbers = #tpu.dot_dimension_numbers<[1], [0], [0], [1], [0, 0, 1, 1], [], []>} : vector<8x128xbf16>, vector<128x512xbf16>, vector<8x512xf32> -> vector<8x512xf32>
    %c0_64 = arith.constant 0 : index
    %c0_65 = arith.constant 0 : index
    %c0_66 = arith.constant 0 : index
    %147 = vector.load %arg13[%c0_64, %c0_65, %c0_66] : memref<2x1x512xf32, #tpu.memory_space<vmem>>, vector<1x1x512xf32>
    %148 = vector.shape_cast %147 : vector<1x1x512xf32> to vector<1x512xf32>
    %149 = vector.broadcast %148 : vector<1x512xf32> to vector<8x512xf32>
    %150 = arith.addf %146, %149 : vector<8x512xf32>
    %151 = arith.mulf %150, %150 : vector<8x512xf32>
    %152 = arith.mulf %150, %151 : vector<8x512xf32>
    %cst_67 = arith.constant 4.471500e-02 : f32
    %153 = vector.broadcast %cst_67 : f32 to vector<8x512xf32>
    %154 = arith.mulf %153, %152 : vector<8x512xf32>
    %155 = arith.addf %150, %154 : vector<8x512xf32>
    %cst_68 = arith.constant 0.797884583 : f32
    %156 = vector.broadcast %cst_68 : f32 to vector<8x512xf32>
    %157 = arith.mulf %156, %155 : vector<8x512xf32>
    %158 = math.tanh %157 : vector<8x512xf32>
    %cst_69 = arith.constant 1.000000e+00 : f32
    %159 = vector.broadcast %cst_69 : f32 to vector<8x512xf32>
    %160 = arith.addf %159, %158 : vector<8x512xf32>
    %cst_70 = arith.constant 5.000000e-01 : f32
    %161 = vector.broadcast %cst_70 : f32 to vector<8x512xf32>
    %162 = arith.mulf %161, %160 : vector<8x512xf32>
    %163 = arith.mulf %150, %162 : vector<8x512xf32>
    %164 = arith.truncf %163 : vector<8x512xf32> to vector<8x512xbf16>
    %c0_71 = arith.constant 0 : index
    %c0_72 = arith.constant 0 : index
    %c0_73 = arith.constant 0 : index
    %165 = vector.load %arg14[%c0_71, %c0_72, %c0_73] : memref<2x512x128xbf16, #tpu.memory_space<vmem>>, vector<1x512x128xbf16>
    %166 = vector.shape_cast %165 : vector<1x512x128xbf16> to vector<512x128xbf16>
    %cst_74 = arith.constant dense<0.000000e+00> : vector<8x128xf32>
    %167 = tpu.matmul %164, %166, %cst_74 {dimension_numbers = #tpu.dot_dimension_numbers<[1], [0], [0], [1], [0, 0, 1, 1], [], []>} : vector<8x512xbf16>, vector<512x128xbf16>, vector<8x128xf32> -> vector<8x128xf32>
    %168 = arith.addf %116, %167 : vector<8x128xf32>
    %c0_75 = arith.constant 0 : index
    %c0_76 = arith.constant 0 : index
    %c0_77 = arith.constant 0 : index
    %169 = vector.load %arg15[%c0_75, %c0_76, %c0_77] : memref<2x1x128xf32, #tpu.memory_space<vmem>>, vector<1x1x128xf32>
    %170 = vector.shape_cast %169 : vector<1x1x128xf32> to vector<1x128xf32>
    %171 = vector.broadcast %170 : vector<1x128xf32> to vector<8x128xf32>
    %172 = arith.addf %168, %171 : vector<8x128xf32>
    %c1 = arith.constant 1 : index
    %c0_78 = arith.constant 0 : index
    %c0_79 = arith.constant 0 : index
    %173 = vector.load %arg4[%c1, %c0_78, %c0_79] : memref<2x1x128xf32, #tpu.memory_space<vmem>>, vector<1x1x128xf32>
    %174 = vector.shape_cast %173 : vector<1x1x128xf32> to vector<1x128xf32>
    %c1_80 = arith.constant 1 : index
    %c0_81 = arith.constant 0 : index
    %c0_82 = arith.constant 0 : index
    %175 = vector.load %arg5[%c1_80, %c0_81, %c0_82] : memref<2x1x128xf32, #tpu.memory_space<vmem>>, vector<1x1x128xf32>
    %176 = vector.shape_cast %175 : vector<1x1x128xf32> to vector<1x128xf32>
    %cst_83 = arith.constant dense<0.000000e+00> : vector<8xf32>
    %177 = vector.multi_reduction <add>, %172, %cst_83 [1] : vector<8x128xf32> to vector<8xf32>
    %178 = vector.shape_cast %177 : vector<8xf32> to vector<8x1xf32>
    %cst_84 = arith.constant 1.280000e+02 : f32
    %179 = vector.broadcast %cst_84 : f32 to vector<8x1xf32>
    %180 = arith.divf %178, %179 : vector<8x1xf32>
    %181 = vector.broadcast %180 : vector<8x1xf32> to vector<8x128xf32>
    %182 = arith.subf %172, %181 : vector<8x128xf32>
    %183 = arith.mulf %182, %182 : vector<8x128xf32>
    %cst_85 = arith.constant dense<0.000000e+00> : vector<8xf32>
    %184 = vector.multi_reduction <add>, %183, %cst_85 [1] : vector<8x128xf32> to vector<8xf32>
    %185 = vector.shape_cast %184 : vector<8xf32> to vector<8x1xf32>
    %cst_86 = arith.constant 1.280000e+02 : f32
    %186 = vector.broadcast %cst_86 : f32 to vector<8x1xf32>
    %187 = arith.divf %185, %186 : vector<8x1xf32>
    %188 = vector.broadcast %180 : vector<8x1xf32> to vector<8x128xf32>
    %189 = arith.subf %172, %188 : vector<8x128xf32>
    %cst_87 = arith.constant 9.99999974E-6 : f32
    %190 = vector.broadcast %cst_87 : f32 to vector<8x1xf32>
    %191 = arith.addf %187, %190 : vector<8x1xf32>
    %192 = math.rsqrt %191 : vector<8x1xf32>
    %193 = vector.broadcast %192 : vector<8x1xf32> to vector<8x128xf32>
    %194 = arith.mulf %189, %193 : vector<8x128xf32>
    %195 = vector.broadcast %174 : vector<1x128xf32> to vector<8x128xf32>
    %196 = arith.mulf %194, %195 : vector<8x128xf32>
    %197 = vector.broadcast %176 : vector<1x128xf32> to vector<8x128xf32>
    %198 = arith.addf %196, %197 : vector<8x128xf32>
    %199 = arith.truncf %198 : vector<8x128xf32> to vector<8x128xbf16>
    %c1_88 = arith.constant 1 : index
    %c0_89 = arith.constant 0 : index
    %c0_90 = arith.constant 0 : index
    %200 = vector.load %arg6[%c1_88, %c0_89, %c0_90] : memref<2x128x384xbf16, #tpu.memory_space<vmem>>, vector<1x128x384xbf16>
    %201 = vector.shape_cast %200 : vector<1x128x384xbf16> to vector<128x384xbf16>
    %cst_91 = arith.constant dense<0.000000e+00> : vector<8x384xf32>
    %202 = tpu.matmul %199, %201, %cst_91 {dimension_numbers = #tpu.dot_dimension_numbers<[1], [0], [0], [1], [0, 0, 1, 1], [], []>} : vector<8x128xbf16>, vector<128x384xbf16>, vector<8x384xf32> -> vector<8x384xf32>
    %c1_92 = arith.constant 1 : index
    %c0_93 = arith.constant 0 : index
    %c0_94 = arith.constant 0 : index
    %203 = vector.load %arg7[%c1_92, %c0_93, %c0_94] : memref<2x1x384xf32, #tpu.memory_space<vmem>>, vector<1x1x384xf32>
    %204 = vector.shape_cast %203 : vector<1x1x384xf32> to vector<1x384xf32>
    %205 = vector.broadcast %204 : vector<1x384xf32> to vector<8x384xf32>
    %206 = arith.addf %202, %205 : vector<8x384xf32>
    %207 = vector.extract_strided_slice %206 {offsets = [0, 0], sizes = [8, 32], strides = [1, 1]} : vector<8x384xf32> to vector<8x32xf32>
    %208 = vector.extract_strided_slice %206 {offsets = [0, 128], sizes = [8, 32], strides = [1, 1]} : vector<8x384xf32> to vector<8x32xf32>
    %209 = vector.extract_strided_slice %206 {offsets = [0, 256], sizes = [8, 32], strides = [1, 1]} : vector<8x384xf32> to vector<8x32xf32>
    %cst_95 = arith.constant dense<0.000000e+00> : vector<8x8xf32>
    %210 = tpu.matmul %207, %208, %cst_95 {dimension_numbers = #tpu.dot_dimension_numbers<[1], [1], [0], [0], [0, 0, 1, 0], [], []>} : vector<8x32xf32>, vector<8x32xf32>, vector<8x8xf32> -> vector<8x8xf32>
    %cst_96 = arith.constant 0.176776692 : f32
    %211 = vector.broadcast %cst_96 : f32 to vector<8x8xf32>
    %212 = arith.mulf %210, %211 : vector<8x8xf32>
    %cst_97 = arith.constant dense<0xFF800000> : vector<8xf32>
    %213 = vector.multi_reduction <maximumf>, %212, %cst_97 [1] : vector<8x8xf32> to vector<8xf32>
    %214 = vector.shape_cast %213 : vector<8xf32> to vector<8x1xf32>
    %215 = vector.broadcast %214 : vector<8x1xf32> to vector<8x8xf32>
    %216 = arith.subf %212, %215 : vector<8x8xf32>
    %217 = math.exp %216 : vector<8x8xf32>
    %cst_98 = arith.constant dense<0.000000e+00> : vector<8xf32>
    %218 = vector.multi_reduction <add>, %217, %cst_98 [1] : vector<8x8xf32> to vector<8xf32>
    %219 = vector.shape_cast %218 : vector<8xf32> to vector<8x1xf32>
    %220 = tpu.reciprocal %219 {approx = true} : vector<8x1xf32> -> vector<8x1xf32>
    %221 = vector.broadcast %220 : vector<8x1xf32> to vector<8x8xf32>
    %222 = arith.mulf %217, %221 : vector<8x8xf32>
    %cst_99 = arith.constant dense<0.000000e+00> : vector<8x32xf32>
    %223 = tpu.matmul %222, %209, %cst_99 {dimension_numbers = #tpu.dot_dimension_numbers<[1], [0], [0], [1], [0, 0, 1, 1], [], []>} : vector<8x8xf32>, vector<8x32xf32>, vector<8x32xf32> -> vector<8x32xf32>
    %224 = vector.extract_strided_slice %206 {offsets = [0, 32], sizes = [8, 32], strides = [1, 1]} : vector<8x384xf32> to vector<8x32xf32>
    %225 = vector.extract_strided_slice %206 {offsets = [0, 160], sizes = [8, 32], strides = [1, 1]} : vector<8x384xf32> to vector<8x32xf32>
    %226 = vector.extract_strided_slice %206 {offsets = [0, 288], sizes = [8, 32], strides = [1, 1]} : vector<8x384xf32> to vector<8x32xf32>
    %cst_100 = arith.constant dense<0.000000e+00> : vector<8x8xf32>
    %227 = tpu.matmul %224, %225, %cst_100 {dimension_numbers = #tpu.dot_dimension_numbers<[1], [1], [0], [0], [0, 0, 1, 0], [], []>} : vector<8x32xf32>, vector<8x32xf32>, vector<8x8xf32> -> vector<8x8xf32>
    %cst_101 = arith.constant 0.176776692 : f32
    %228 = vector.broadcast %cst_101 : f32 to vector<8x8xf32>
    %229 = arith.mulf %227, %228 : vector<8x8xf32>
    %cst_102 = arith.constant dense<0xFF800000> : vector<8xf32>
    %230 = vector.multi_reduction <maximumf>, %229, %cst_102 [1] : vector<8x8xf32> to vector<8xf32>
    %231 = vector.shape_cast %230 : vector<8xf32> to vector<8x1xf32>
    %232 = vector.broadcast %231 : vector<8x1xf32> to vector<8x8xf32>
    %233 = arith.subf %229, %232 : vector<8x8xf32>
    %234 = math.exp %233 : vector<8x8xf32>
    %cst_103 = arith.constant dense<0.000000e+00> : vector<8xf32>
    %235 = vector.multi_reduction <add>, %234, %cst_103 [1] : vector<8x8xf32> to vector<8xf32>
    %236 = vector.shape_cast %235 : vector<8xf32> to vector<8x1xf32>
    %237 = tpu.reciprocal %236 {approx = true} : vector<8x1xf32> -> vector<8x1xf32>
    %238 = vector.broadcast %237 : vector<8x1xf32> to vector<8x8xf32>
    %239 = arith.mulf %234, %238 : vector<8x8xf32>
    %cst_104 = arith.constant dense<0.000000e+00> : vector<8x32xf32>
    %240 = tpu.matmul %239, %226, %cst_104 {dimension_numbers = #tpu.dot_dimension_numbers<[1], [0], [0], [1], [0, 0, 1, 1], [], []>} : vector<8x8xf32>, vector<8x32xf32>, vector<8x32xf32> -> vector<8x32xf32>
    %241 = vector.extract_strided_slice %206 {offsets = [0, 64], sizes = [8, 32], strides = [1, 1]} : vector<8x384xf32> to vector<8x32xf32>
    %242 = vector.extract_strided_slice %206 {offsets = [0, 192], sizes = [8, 32], strides = [1, 1]} : vector<8x384xf32> to vector<8x32xf32>
    %243 = vector.extract_strided_slice %206 {offsets = [0, 320], sizes = [8, 32], strides = [1, 1]} : vector<8x384xf32> to vector<8x32xf32>
    %cst_105 = arith.constant dense<0.000000e+00> : vector<8x8xf32>
    %244 = tpu.matmul %241, %242, %cst_105 {dimension_numbers = #tpu.dot_dimension_numbers<[1], [1], [0], [0], [0, 0, 1, 0], [], []>} : vector<8x32xf32>, vector<8x32xf32>, vector<8x8xf32> -> vector<8x8xf32>
    %cst_106 = arith.constant 0.176776692 : f32
    %245 = vector.broadcast %cst_106 : f32 to vector<8x8xf32>
    %246 = arith.mulf %244, %245 : vector<8x8xf32>
    %cst_107 = arith.constant dense<0xFF800000> : vector<8xf32>
    %247 = vector.multi_reduction <maximumf>, %246, %cst_107 [1] : vector<8x8xf32> to vector<8xf32>
    %248 = vector.shape_cast %247 : vector<8xf32> to vector<8x1xf32>
    %249 = vector.broadcast %248 : vector<8x1xf32> to vector<8x8xf32>
    %250 = arith.subf %246, %249 : vector<8x8xf32>
    %251 = math.exp %250 : vector<8x8xf32>
    %cst_108 = arith.constant dense<0.000000e+00> : vector<8xf32>
    %252 = vector.multi_reduction <add>, %251, %cst_108 [1] : vector<8x8xf32> to vector<8xf32>
    %253 = vector.shape_cast %252 : vector<8xf32> to vector<8x1xf32>
    %254 = tpu.reciprocal %253 {approx = true} : vector<8x1xf32> -> vector<8x1xf32>
    %255 = vector.broadcast %254 : vector<8x1xf32> to vector<8x8xf32>
    %256 = arith.mulf %251, %255 : vector<8x8xf32>
    %cst_109 = arith.constant dense<0.000000e+00> : vector<8x32xf32>
    %257 = tpu.matmul %256, %243, %cst_109 {dimension_numbers = #tpu.dot_dimension_numbers<[1], [0], [0], [1], [0, 0, 1, 1], [], []>} : vector<8x8xf32>, vector<8x32xf32>, vector<8x32xf32> -> vector<8x32xf32>
    %258 = vector.extract_strided_slice %206 {offsets = [0, 96], sizes = [8, 32], strides = [1, 1]} : vector<8x384xf32> to vector<8x32xf32>
    %259 = vector.extract_strided_slice %206 {offsets = [0, 224], sizes = [8, 32], strides = [1, 1]} : vector<8x384xf32> to vector<8x32xf32>
    %260 = vector.extract_strided_slice %206 {offsets = [0, 352], sizes = [8, 32], strides = [1, 1]} : vector<8x384xf32> to vector<8x32xf32>
    %cst_110 = arith.constant dense<0.000000e+00> : vector<8x8xf32>
    %261 = tpu.matmul %258, %259, %cst_110 {dimension_numbers = #tpu.dot_dimension_numbers<[1], [1], [0], [0], [0, 0, 1, 0], [], []>} : vector<8x32xf32>, vector<8x32xf32>, vector<8x8xf32> -> vector<8x8xf32>
    %cst_111 = arith.constant 0.176776692 : f32
    %262 = vector.broadcast %cst_111 : f32 to vector<8x8xf32>
    %263 = arith.mulf %261, %262 : vector<8x8xf32>
    %cst_112 = arith.constant dense<0xFF800000> : vector<8xf32>
    %264 = vector.multi_reduction <maximumf>, %263, %cst_112 [1] : vector<8x8xf32> to vector<8xf32>
    %265 = vector.shape_cast %264 : vector<8xf32> to vector<8x1xf32>
    %266 = vector.broadcast %265 : vector<8x1xf32> to vector<8x8xf32>
    %267 = arith.subf %263, %266 : vector<8x8xf32>
    %268 = math.exp %267 : vector<8x8xf32>
    %cst_113 = arith.constant dense<0.000000e+00> : vector<8xf32>
    %269 = vector.multi_reduction <add>, %268, %cst_113 [1] : vector<8x8xf32> to vector<8xf32>
    %270 = vector.shape_cast %269 : vector<8xf32> to vector<8x1xf32>
    %271 = tpu.reciprocal %270 {approx = true} : vector<8x1xf32> -> vector<8x1xf32>
    %272 = vector.broadcast %271 : vector<8x1xf32> to vector<8x8xf32>
    %273 = arith.mulf %268, %272 : vector<8x8xf32>
    %cst_114 = arith.constant dense<0.000000e+00> : vector<8x32xf32>
    %274 = tpu.matmul %273, %260, %cst_114 {dimension_numbers = #tpu.dot_dimension_numbers<[1], [0], [0], [1], [0, 0, 1, 1], [], []>} : vector<8x8xf32>, vector<8x32xf32>, vector<8x32xf32> -> vector<8x32xf32>
    %275 = tpu.concatenate %223, %240, %257, %274 in 1 : vector<8x32xf32>, vector<8x32xf32>, vector<8x32xf32>, vector<8x32xf32> -> vector<8x128xf32>
    %276 = arith.truncf %275 : vector<8x128xf32> to vector<8x128xbf16>
    %c1_115 = arith.constant 1 : index
    %c0_116 = arith.constant 0 : index
    %c0_117 = arith.constant 0 : index
    %277 = vector.load %arg8[%c1_115, %c0_116, %c0_117] : memref<2x128x128xbf16, #tpu.memory_space<vmem>>, vector<1x128x128xbf16>
    %278 = vector.shape_cast %277 : vector<1x128x128xbf16> to vector<128x128xbf16>
    %cst_118 = arith.constant dense<0.000000e+00> : vector<8x128xf32>
    %279 = tpu.matmul %276, %278, %cst_118 {dimension_numbers = #tpu.dot_dimension_numbers<[1], [0], [0], [1], [0, 0, 1, 1], [], []>} : vector<8x128xbf16>, vector<128x128xbf16>, vector<8x128xf32> -> vector<8x128xf32>
    %280 = arith.addf %172, %279 : vector<8x128xf32>
    %c1_119 = arith.constant 1 : index
    %c0_120 = arith.constant 0 : index
    %c0_121 = arith.constant 0 : index
    %281 = vector.load %arg9[%c1_119, %c0_120, %c0_121] : memref<2x1x128xf32, #tpu.memory_space<vmem>>, vector<1x1x128xf32>
    %282 = vector.shape_cast %281 : vector<1x1x128xf32> to vector<1x128xf32>
    %283 = vector.broadcast %282 : vector<1x128xf32> to vector<8x128xf32>
    %284 = arith.addf %280, %283 : vector<8x128xf32>
    %c1_122 = arith.constant 1 : index
    %c0_123 = arith.constant 0 : index
    %c0_124 = arith.constant 0 : index
    %285 = vector.load %arg10[%c1_122, %c0_123, %c0_124] : memref<2x1x128xf32, #tpu.memory_space<vmem>>, vector<1x1x128xf32>
    %286 = vector.shape_cast %285 : vector<1x1x128xf32> to vector<1x128xf32>
    %c1_125 = arith.constant 1 : index
    %c0_126 = arith.constant 0 : index
    %c0_127 = arith.constant 0 : index
    %287 = vector.load %arg11[%c1_125, %c0_126, %c0_127] : memref<2x1x128xf32, #tpu.memory_space<vmem>>, vector<1x1x128xf32>
    %288 = vector.shape_cast %287 : vector<1x1x128xf32> to vector<1x128xf32>
    %cst_128 = arith.constant dense<0.000000e+00> : vector<8xf32>
    %289 = vector.multi_reduction <add>, %284, %cst_128 [1] : vector<8x128xf32> to vector<8xf32>
    %290 = vector.shape_cast %289 : vector<8xf32> to vector<8x1xf32>
    %cst_129 = arith.constant 1.280000e+02 : f32
    %291 = vector.broadcast %cst_129 : f32 to vector<8x1xf32>
    %292 = arith.divf %290, %291 : vector<8x1xf32>
    %293 = vector.broadcast %292 : vector<8x1xf32> to vector<8x128xf32>
    %294 = arith.subf %284, %293 : vector<8x128xf32>
    %295 = arith.mulf %294, %294 : vector<8x128xf32>
    %cst_130 = arith.constant dense<0.000000e+00> : vector<8xf32>
    %296 = vector.multi_reduction <add>, %295, %cst_130 [1] : vector<8x128xf32> to vector<8xf32>
    %297 = vector.shape_cast %296 : vector<8xf32> to vector<8x1xf32>
    %cst_131 = arith.constant 1.280000e+02 : f32
    %298 = vector.broadcast %cst_131 : f32 to vector<8x1xf32>
    %299 = arith.divf %297, %298 : vector<8x1xf32>
    %300 = vector.broadcast %292 : vector<8x1xf32> to vector<8x128xf32>
    %301 = arith.subf %284, %300 : vector<8x128xf32>
    %cst_132 = arith.constant 9.99999974E-6 : f32
    %302 = vector.broadcast %cst_132 : f32 to vector<8x1xf32>
    %303 = arith.addf %299, %302 : vector<8x1xf32>
    %304 = math.rsqrt %303 : vector<8x1xf32>
    %305 = vector.broadcast %304 : vector<8x1xf32> to vector<8x128xf32>
    %306 = arith.mulf %301, %305 : vector<8x128xf32>
    %307 = vector.broadcast %286 : vector<1x128xf32> to vector<8x128xf32>
    %308 = arith.mulf %306, %307 : vector<8x128xf32>
    %309 = vector.broadcast %288 : vector<1x128xf32> to vector<8x128xf32>
    %310 = arith.addf %308, %309 : vector<8x128xf32>
    %311 = arith.truncf %310 : vector<8x128xf32> to vector<8x128xbf16>
    %c1_133 = arith.constant 1 : index
    %c0_134 = arith.constant 0 : index
    %c0_135 = arith.constant 0 : index
    %312 = vector.load %arg12[%c1_133, %c0_134, %c0_135] : memref<2x128x512xbf16, #tpu.memory_space<vmem>>, vector<1x128x512xbf16>
    %313 = vector.shape_cast %312 : vector<1x128x512xbf16> to vector<128x512xbf16>
    %cst_136 = arith.constant dense<0.000000e+00> : vector<8x512xf32>
    %314 = tpu.matmul %311, %313, %cst_136 {dimension_numbers = #tpu.dot_dimension_numbers<[1], [0], [0], [1], [0, 0, 1, 1], [], []>} : vector<8x128xbf16>, vector<128x512xbf16>, vector<8x512xf32> -> vector<8x512xf32>
    %c1_137 = arith.constant 1 : index
    %c0_138 = arith.constant 0 : index
    %c0_139 = arith.constant 0 : index
    %315 = vector.load %arg13[%c1_137, %c0_138, %c0_139] : memref<2x1x512xf32, #tpu.memory_space<vmem>>, vector<1x1x512xf32>
    %316 = vector.shape_cast %315 : vector<1x1x512xf32> to vector<1x512xf32>
    %317 = vector.broadcast %316 : vector<1x512xf32> to vector<8x512xf32>
    %318 = arith.addf %314, %317 : vector<8x512xf32>
    %319 = arith.mulf %318, %318 : vector<8x512xf32>
    %320 = arith.mulf %318, %319 : vector<8x512xf32>
    %cst_140 = arith.constant 4.471500e-02 : f32
    %321 = vector.broadcast %cst_140 : f32 to vector<8x512xf32>
    %322 = arith.mulf %321, %320 : vector<8x512xf32>
    %323 = arith.addf %318, %322 : vector<8x512xf32>
    %cst_141 = arith.constant 0.797884583 : f32
    %324 = vector.broadcast %cst_141 : f32 to vector<8x512xf32>
    %325 = arith.mulf %324, %323 : vector<8x512xf32>
    %326 = math.tanh %325 : vector<8x512xf32>
    %cst_142 = arith.constant 1.000000e+00 : f32
    %327 = vector.broadcast %cst_142 : f32 to vector<8x512xf32>
    %328 = arith.addf %327, %326 : vector<8x512xf32>
    %cst_143 = arith.constant 5.000000e-01 : f32
    %329 = vector.broadcast %cst_143 : f32 to vector<8x512xf32>
    %330 = arith.mulf %329, %328 : vector<8x512xf32>
    %331 = arith.mulf %318, %330 : vector<8x512xf32>
    %332 = arith.truncf %331 : vector<8x512xf32> to vector<8x512xbf16>
    %c1_144 = arith.constant 1 : index
    %c0_145 = arith.constant 0 : index
    %c0_146 = arith.constant 0 : index
    %333 = vector.load %arg14[%c1_144, %c0_145, %c0_146] : memref<2x512x128xbf16, #tpu.memory_space<vmem>>, vector<1x512x128xbf16>
    %334 = vector.shape_cast %333 : vector<1x512x128xbf16> to vector<512x128xbf16>
    %cst_147 = arith.constant dense<0.000000e+00> : vector<8x128xf32>
    %335 = tpu.matmul %332, %334, %cst_147 {dimension_numbers = #tpu.dot_dimension_numbers<[1], [0], [0], [1], [0, 0, 1, 1], [], []>} : vector<8x512xbf16>, vector<512x128xbf16>, vector<8x128xf32> -> vector<8x128xf32>
    %336 = arith.addf %284, %335 : vector<8x128xf32>
    %c1_148 = arith.constant 1 : index
    %c0_149 = arith.constant 0 : index
    %c0_150 = arith.constant 0 : index
    %337 = vector.load %arg15[%c1_148, %c0_149, %c0_150] : memref<2x1x128xf32, #tpu.memory_space<vmem>>, vector<1x1x128xf32>
    %338 = vector.shape_cast %337 : vector<1x1x128xf32> to vector<1x128xf32>
    %339 = vector.broadcast %338 : vector<1x128xf32> to vector<8x128xf32>
    %340 = arith.addf %336, %339 : vector<8x128xf32>
    %c0_151 = arith.constant 0 : index
    %c0_152 = arith.constant 0 : index
    %341 = vector.load %arg16[%c0_151, %c0_152] : memref<128x1xf32, #tpu.memory_space<vmem>>, vector<128x1xf32>
    %cst_153 = arith.constant dense<0.000000e+00> : vector<8x1xf32>
    %342 = tpu.matmul %340, %341, %cst_153 {dimension_numbers = #tpu.dot_dimension_numbers<[1], [0], [0], [1], [0, 0, 1, 1], [], []>} : vector<8x128xf32>, vector<128x1xf32>, vector<8x1xf32> -> vector<8x1xf32>
    %c0_154 = arith.constant 0 : index
    %c0_155 = arith.constant 0 : index
    %343 = vector.load %arg17[%c0_154, %c0_155] : memref<1x1xf32, #tpu.memory_space<vmem>>, vector<1x1xf32>
    %344 = vector.broadcast %343 : vector<1x1xf32> to vector<8x1xf32>
    %345 = arith.addf %342, %344 : vector<8x1xf32>
    %346 = tpu.iota {dimensions = array<i32: 0>} : vector<8x1xi32>
    %347 = arith.index_cast %arg0 : i32 to index
    %348 = memref.load %arg1[%347] : memref<2xi32, #tpu.memory_space<smem>>
    %349 = vector.broadcast %348 : i32 to vector<8x1xi32>
    %350 = arith.cmpi slt, %346, %349 : vector<8x1xi32>
    %cst_156 = arith.constant -1.000000e+04 : f32
    %351 = vector.broadcast %cst_156 : f32 to vector<8x1xf32>
    %352 = arith.select %350, %345, %351 : vector<8x1xi1>, vector<8x1xf32>
    %cst_157 = arith.constant dense<0xFF800000> : vector<1xf32>
    %353 = vector.multi_reduction <maximumf>, %352, %cst_157 [0] : vector<8x1xf32> to vector<1xf32>
    %354 = vector.shape_cast %353 : vector<1xf32> to vector<1x1xf32>
    %355 = vector.broadcast %354 : vector<1x1xf32> to vector<8x1xf32>
    %356 = arith.subf %352, %355 : vector<8x1xf32>
    %357 = math.exp %356 : vector<8x1xf32>
    %cst_158 = arith.constant dense<0.000000e+00> : vector<1xf32>
    %358 = vector.multi_reduction <add>, %357, %cst_158 [0] : vector<8x1xf32> to vector<1xf32>
    %359 = vector.shape_cast %358 : vector<1xf32> to vector<1x1xf32>
    %360 = tpu.reciprocal %359 {approx = true} : vector<1x1xf32> -> vector<1x1xf32>
    %361 = vector.broadcast %360 : vector<1x1xf32> to vector<8x1xf32>
    %362 = arith.mulf %357, %361 : vector<8x1xf32>
    %c0_159 = arith.constant 0 : index
    %c0_160 = arith.constant 0 : index
    %c0_161 = arith.constant 0 : index
    %363 = vector.load %arg18[%c0_159, %c0_160, %c0_161] : memref<1x8x384xf32, #tpu.memory_space<vmem>>, vector<1x8x384xf32>
    %364 = vector.shape_cast %363 : vector<1x8x384xf32> to vector<8x384xf32>
    %365 = vector.broadcast %362 : vector<8x1xf32> to vector<8x384xf32>
    %366 = arith.mulf %365, %364 : vector<8x384xf32>
    %cst_162 = arith.constant dense<0.000000e+00> : vector<384xf32>
    %367 = vector.multi_reduction <add>, %366, %cst_162 [0] : vector<8x384xf32> to vector<384xf32>
    %368 = vector.shape_cast %367 : vector<384xf32> to vector<1x384xf32>
    %c0_163 = arith.constant 0 : index
    %c0_164 = arith.constant 0 : index
    %c0_165 = arith.constant 0 : index
    %369 = vector.load %arg20[%c0_163, %c0_164, %c0_165] : memref<1x1x384xf32, #tpu.memory_space<vmem>>, vector<1x1x384xf32>
    %370 = vector.shape_cast %369 : vector<1x1x384xf32> to vector<1x384xf32>
    %371 = vector.shape_cast %368 : vector<1x384xf32> to vector<1x1x384xf32>
    tpu.vector_store %arg20[%c0_163, %c0_164, %c0_165], %371 {strides = array<i32>} : memref<1x1x384xf32, #tpu.memory_space<vmem>>, vector<1x1x384xf32>,
    %c0_166 = arith.constant 0 : index
    %c0_167 = arith.constant 0 : index
    %c0_168 = arith.constant 0 : index
    %372 = vector.load %arg19[%c0_166, %c0_167, %c0_168] : memref<1x8x4608xf32, #tpu.memory_space<vmem>>, vector<1x8x4608xf32>
    %373 = vector.shape_cast %372 : vector<1x8x4608xf32> to vector<8x4608xf32>
    %374 = vector.broadcast %362 : vector<8x1xf32> to vector<8x4608xf32>
    %375 = arith.mulf %374, %373 : vector<8x4608xf32>
    %cst_169 = arith.constant dense<0.000000e+00> : vector<4608xf32>
    %376 = vector.multi_reduction <add>, %375, %cst_169 [0] : vector<8x4608xf32> to vector<4608xf32>
    %377 = vector.shape_cast %376 : vector<4608xf32> to vector<1x4608xf32>
    %c0_170 = arith.constant 0 : index
    %c0_171 = arith.constant 0 : index
    %c0_172 = arith.constant 0 : index
    %378 = vector.load %arg21[%c0_170, %c0_171, %c0_172] : memref<1x1x4608xf32, #tpu.memory_space<vmem>>, vector<1x1x4608xf32>
    %379 = vector.shape_cast %378 : vector<1x1x4608xf32> to vector<1x4608xf32>
    %380 = vector.shape_cast %377 : vector<1x4608xf32> to vector<1x1x4608xf32>
    tpu.vector_store %arg21[%c0_170, %c0_171, %c0_172], %380 {strides = array<i32>} : memref<1x1x4608xf32, #tpu.memory_space<vmem>>, vector<1x1x4608xf32>,
    return
  }
  func.func @transform_0(%arg0: i32, %arg1: memref<2xi32, #tpu.memory_space<smem>>) -> (i32, i32, i32) {
    %c0_i32 = arith.constant 0 : i32
    %c0_i32_0 = arith.constant 0 : i32
    %c0_i32_1 = arith.constant 0 : i32
    return %arg0, %c0_i32, %c0_i32_0 : i32, i32, i32
  }
  func.func @transform_1(%arg0: i32, %arg1: memref<2xi32, #tpu.memory_space<smem>>) -> (i32, i32, i32) {
    %c0_i32 = arith.constant 0 : i32
    %c0_i32_0 = arith.constant 0 : i32
    %c0_i32_1 = arith.constant 0 : i32
    %c0_i32_2 = arith.constant 0 : i32
    return %c0_i32, %c0_i32_0, %c0_i32_1 : i32, i32, i32
  }
  func.func @transform_2(%arg0: i32, %arg1: memref<2xi32, #tpu.memory_space<smem>>) -> (i32, i32, i32) {
    %c0_i32 = arith.constant 0 : i32
    %c0_i32_0 = arith.constant 0 : i32
    %c0_i32_1 = arith.constant 0 : i32
    %c0_i32_2 = arith.constant 0 : i32
    return %c0_i32, %c0_i32_0, %c0_i32_1 : i32, i32, i32
  }
  func.func @transform_3(%arg0: i32, %arg1: memref<2xi32, #tpu.memory_space<smem>>) -> (i32, i32, i32) {
    %c0_i32 = arith.constant 0 : i32
    %c0_i32_0 = arith.constant 0 : i32
    %c0_i32_1 = arith.constant 0 : i32
    %c0_i32_2 = arith.constant 0 : i32
    return %c0_i32, %c0_i32_0, %c0_i32_1 : i32, i32, i32
  }
  func.func @transform_4(%arg0: i32, %arg1: memref<2xi32, #tpu.memory_space<smem>>) -> (i32, i32, i32) {
    %c0_i32 = arith.constant 0 : i32
    %c0_i32_0 = arith.constant 0 : i32
    %c0_i32_1 = arith.constant 0 : i32
    %c0_i32_2 = arith.constant 0 : i32
    return %c0_i32, %c0_i32_0, %c0_i32_1 : i32, i32, i32
  }
  func.func @transform_5(%arg0: i32, %arg1: memref<2xi32, #tpu.memory_space<smem>>) -> (i32, i32, i32) {
    %c0_i32 = arith.constant 0 : i32
    %c0_i32_0 = arith.constant 0 : i32
    %c0_i32_1 = arith.constant 0 : i32
    %c0_i32_2 = arith.constant 0 : i32
    return %c0_i32, %c0_i32_0, %c0_i32_1 : i32, i32, i32
  }
  func.func @transform_6(%arg0: i32, %arg1: memref<2xi32, #tpu.memory_space<smem>>) -> (i32, i32, i32) {
    %c0_i32 = arith.constant 0 : i32
    %c0_i32_0 = arith.constant 0 : i32
    %c0_i32_1 = arith.constant 0 : i32
    %c0_i32_2 = arith.constant 0 : i32
    return %c0_i32, %c0_i32_0, %c0_i32_1 : i32, i32, i32
  }
  func.func @transform_7(%arg0: i32, %arg1: memref<2xi32, #tpu.memory_space<smem>>) -> (i32, i32, i32) {
    %c0_i32 = arith.constant 0 : i32
    %c0_i32_0 = arith.constant 0 : i32
    %c0_i32_1 = arith.constant 0 : i32
    %c0_i32_2 = arith.constant 0 : i32
    return %c0_i32, %c0_i32_0, %c0_i32_1 : i32, i32, i32
  }
  func.func @transform_8(%arg0: i32, %arg1: memref<2xi32, #tpu.memory_space<smem>>) -> (i32, i32, i32) {
    %c0_i32 = arith.constant 0 : i32
    %c0_i32_0 = arith.constant 0 : i32
    %c0_i32_1 = arith.constant 0 : i32
    %c0_i32_2 = arith.constant 0 : i32
    return %c0_i32, %c0_i32_0, %c0_i32_1 : i32, i32, i32
  }
  func.func @transform_9(%arg0: i32, %arg1: memref<2xi32, #tpu.memory_space<smem>>) -> (i32, i32, i32) {
    %c0_i32 = arith.constant 0 : i32
    %c0_i32_0 = arith.constant 0 : i32
    %c0_i32_1 = arith.constant 0 : i32
    %c0_i32_2 = arith.constant 0 : i32
    return %c0_i32, %c0_i32_0, %c0_i32_1 : i32, i32, i32
  }
  func.func @transform_10(%arg0: i32, %arg1: memref<2xi32, #tpu.memory_space<smem>>) -> (i32, i32, i32) {
    %c0_i32 = arith.constant 0 : i32
    %c0_i32_0 = arith.constant 0 : i32
    %c0_i32_1 = arith.constant 0 : i32
    %c0_i32_2 = arith.constant 0 : i32
    return %c0_i32, %c0_i32_0, %c0_i32_1 : i32, i32, i32
  }
  func.func @transform_11(%arg0: i32, %arg1: memref<2xi32, #tpu.memory_space<smem>>) -> (i32, i32, i32) {
    %c0_i32 = arith.constant 0 : i32
    %c0_i32_0 = arith.constant 0 : i32
    %c0_i32_1 = arith.constant 0 : i32
    %c0_i32_2 = arith.constant 0 : i32
    return %c0_i32, %c0_i32_0, %c0_i32_1 : i32, i32, i32
  }
  func.func @transform_12(%arg0: i32, %arg1: memref<2xi32, #tpu.memory_space<smem>>) -> (i32, i32, i32) {
    %c0_i32 = arith.constant 0 : i32
    %c0_i32_0 = arith.constant 0 : i32
    %c0_i32_1 = arith.constant 0 : i32
    %c0_i32_2 = arith.constant 0 : i32
    return %c0_i32, %c0_i32_0, %c0_i32_1 : i32, i32, i32
  }
  func.func @transform_13(%arg0: i32, %arg1: memref<2xi32, #tpu.memory_space<smem>>) -> (i32, i32, i32) {
    %c0_i32 = arith.constant 0 : i32
    %c0_i32_0 = arith.constant 0 : i32
    %c0_i32_1 = arith.constant 0 : i32
    %c0_i32_2 = arith.constant 0 : i32
    return %c0_i32, %c0_i32_0, %c0_i32_1 : i32, i32, i32
  }
  func.func @transform_14(%arg0: i32, %arg1: memref<2xi32, #tpu.memory_space<smem>>) -> (i32, i32) {
    %c0_i32 = arith.constant 0 : i32
    %c0_i32_0 = arith.constant 0 : i32
    %c0_i32_1 = arith.constant 0 : i32
    return %c0_i32, %c0_i32_0 : i32, i32
  }
  func.func @transform_15(%arg0: i32, %arg1: memref<2xi32, #tpu.memory_space<smem>>) -> (i32, i32) {
    %c0_i32 = arith.constant 0 : i32
    %c0_i32_0 = arith.constant 0 : i32
    %c0_i32_1 = arith.constant 0 : i32
    return %c0_i32, %c0_i32_0 : i32, i32
  }
  func.func @transform_16(%arg0: i32, %arg1: memref<2xi32, #tpu.memory_space<smem>>) -> (i32, i32, i32) {
    %c0_i32 = arith.constant 0 : i32
    %c0_i32_0 = arith.constant 0 : i32
    %c0_i32_1 = arith.constant 0 : i32
    return %arg0, %c0_i32, %c0_i32_0 : i32, i32, i32
  }
  func.func @transform_17(%arg0: i32, %arg1: memref<2xi32, #tpu.memory_space<smem>>) -> (i32, i32, i32) {
    %c0_i32 = arith.constant 0 : i32
    %c0_i32_0 = arith.constant 0 : i32
    %c0_i32_1 = arith.constant 0 : i32
    return %arg0, %c0_i32, %c0_i32_0 : i32, i32, i32
  }
  func.func @transform_18(%arg0: i32, %arg1: memref<2xi32, #tpu.memory_space<smem>>) -> (i32, i32, i32) {
    %c0_i32 = arith.constant 0 : i32
    %c0_i32_0 = arith.constant 0 : i32
    %c0_i32_1 = arith.constant 0 : i32
    return %arg0, %c0_i32, %c0_i32_0 : i32, i32, i32
  }
  func.func @transform_19(%arg0: i32, %arg1: memref<2xi32, #tpu.memory_space<smem>>) -> (i32, i32, i32) {
    %c0_i32 = arith.constant 0 : i32
    %c0_i32_0 = arith.constant 0 : i32
    %c0_i32_1 = arith.constant 0 : i32
    return %arg0, %c0_i32, %c0_i32_0 : i32, i32, i32
  }
}

</mosaic_0001>

<bundles_post_ra>
// kernel: tpu_custom_call.1
= control target key start
LH: loop header
LB: loop body
LE: loop exit
PB: predicated region body
PF: predicated region fallthrough
CT: control target
= control target key end

     0   :  { %s5922_s25 = smov [#allocation3]   ;;  %s6973_s0 = inlined_call_operand.vmem [shape: s32[2], index: 0, kind: input, shape index: {}]   ;;  %s6974_s1 = inlined_call_operand.hbm [shape: f32[2,8,128], index: 1, kind: input, shape index: {}]   ;;  %s6975_s2 = inlined_call_operand.hbm [shape: f32[1,8,128], index: 2, kind: input, shape index: {}]   ;;  %s6976_s3 = inlined_call_operand.hbm [shape: f32[2,1,128], index: 3, kind: input, shape index: {}]   ;;  %s6977_s4 = inlined_call_operand.hbm [shape: f32[2,1,128], index: 4, kind: input, shape index: {}]   ;;  %s6978_s5 = inlined_call_operand.hbm [shape: bf16[2,128,384], index: 5, kind: input, shape index: {}]   ;;  %s6979_s6 = inlined_call_operand.hbm [shape: f32[2,1,384], index: 6, kind: input, shape index: {}]   ;;  %s6980_s7 = inlined_call_operand.vmem [shape: bf16[2,128,128], index: 7, kind: input, shape index: {}]   ;;  %s6981_s8 = inlined_call_operand.hbm [shape: f32[2,1,128], index: 8, kind: input, shape index: {}]   ;;  %s6982_s9 = inlined_call_operand.hbm [shape: f32[2,1,128], index: 9, kind: input, shape index: {}]   ;;  %s6983_s10 = inlined_call_operand.vmem [shape: f32[2,1,128], index: 10, kind: input, shape index: {}]   ;;  %s6984_s11 = inlined_call_operand.hbm [shape: bf16[2,128,512], index: 11, kind: input, shape index: {}]   ;;  %s6985_s12 = inlined_call_operand.vmem [shape: f32[2,1,512], index: 12, kind: input, shape index: {}]   ;;  %s6986_s13 = inlined_call_operand.hbm [shape: bf16[2,512,128], index: 13, kind: input, shape index: {}]   ;;  %s6987_s14 = inlined_call_operand.vmem [shape: f32[2,1,128], index: 14, kind: input, shape index: {}]   ;;  %s6988_s15 = inlined_call_operand.vmem [shape: f32[128,1], index: 15, kind: input, shape index: {}]   ;;  %s6989_s17 = inlined_call_operand.hbm [shape: f32[2,8,384], index: 17, kind: input, shape index: {}]   ;;  %s6990_s18 = inlined_call_operand.hbm [shape: f32[2,8,4608], index: 18, kind: input, shape index: {}]   ;;  %s6991_s19 = inlined_call_operand.hbm [shape: f32[2,1,384], index: 19, kind: output, shape index: {0}]   ;;  %s6992_s20 = inlined_call_operand.hbm [shape: f32[2,1,4608], index: 20, kind: output, shape index: {1}]   ;;  %s6993_s16 = inlined_call_operand.<no memory space> [shape: f32[1,1], index: 16, kind: input, shape index: {}]  }
   0x1   :  { %7013 = sst [smem:[#allocation44_spill]] %s6973_s0  ;;  %v31_v0 = vstv %s6993_s16 }
   0x2   :  { %7014 = sst [smem:[#allocation45_spill]] %s6974_s1  ;;  %32 = vst [vmem:[#allocation4] sm:$0x1] %v31_v0 }
   0x3   :  { %7015 = sst [smem:[#allocation46_spill]] %s6975_s2 }
   0x4   :  { %7016 = sst [smem:[#allocation47_spill]] %s6976_s3 }
   0x5   :  { %7017 = sst [smem:[#allocation48_spill]] %s6977_s4 }
   0x6   :  { %7018 = sst [smem:[#allocation49_spill]] %s6979_s6 }
   0x7   :  { %7019 = sst [smem:[#allocation50_spill]] %s6980_s7 }
   0x8   :  { %7020 = sst [smem:[#allocation51_spill]] %s6982_s9 }
   0x9   :  { %7021 = sst [smem:[#allocation52_spill]] %s6983_s10 }
   0xa   :  { %7022 = sst [smem:[#allocation53_spill]] %s6985_s12 }
   0xb   :  { %7023 = sst [smem:[#allocation54_spill]] %s6987_s14 }
   0xc   :  { %7024 = sst [smem:[#allocation55_spill]] %s6988_s15 }
   0xd   :  { %7025 = sst [smem:[#allocation56_spill]] %s6991_s19 }
   0xe   :  { %7026 = sst [smem:[#allocation57_spill]] %s6992_s20 }
   0xf   :  { %s7027_s23 = sld [smem:[#allocation44_spill]] }
  0x15   :  { %s27_s14 = sshll.u32 %s7027_s23, 4  ;;  %s28_s14 = int_to_ptr.vmem [resolvable:$true] %s27_s14 }
  0x16   :  { %30 = dma.vmem_to_smem %s28_s14, 16, %s5922_s25, [#allocation2] }
  0x17   :  { %5868 = dma.done.wait [#allocation2], 16 }
  0x18   :  { %5869 = vsyncadd [#allocation2], 4294967280 }
  0x19   :  { %35 = sfence }
  0x1a   :  { %36 = vsyncpa [#allocation6], 0 }
  0x1b   :  { %38 = vsyncpa [#allocation6 + $0x1], 0 }
  0x1c   :  { %39 = vsyncpa [#allocation9], 0 }
  0x1d   :  { %40 = vsyncpa [#allocation12], 0 }
  0x1e   :  { %41 = vsyncpa [#allocation15], 0 }
  0x1f   :  { %42 = vsyncpa [#allocation18], 0 }
  0x20   :  { %43 = vsyncpa [#allocation21], 0 }
  0x21   :  { %44 = vsyncpa [#allocation7], 0 }
  0x22   :  { %46 = vsyncpa [#allocation7 + $0x1], 0 }
  0x23   :  { %47 = vsyncpa [#allocation26], 0 }
  0x24   :  { %49 = vsyncpa [#allocation26 + $0x1], 0  ;;  %s6057_s3 = smov 0   ;;  %s6059_s16 = smov 0  }
  0x25   :  { %s6061_s26 = smov 0   ;;  %s6063_s14 = smov 0  }
  0x26 LB: > { %7028 = sst [smem:[#allocation37_spill]] %s5908_s3  ;;  %s6078_s27 = sadd.s32 4294967295, %s5920_s14   ;;  %s5920_s14 = sphi %s6063_s14, %s7073_s14   ;;  %s5916_s26 = sphi %s6061_s26, %s7078_s26   ;;  %s5912_s16 = sphi %s6059_s16, %s7077_s16   ;;  %s5908_s3 = sphi %s6057_s3, %s7076_s3  }
  0x27   : > { %7029 = sst [smem:[#allocation38_spill]] %s5916_s26  ;;  %s4138_s28 = sadd.s32 4294967294, %s5920_s14  }
  0x28   : > { %s6082_s4 = sadd.s32 1, %s5920_s14   ;;  %s62_s29 = sadd.s32 1, %s5916_s26 }
  0x29   : > { %7030 = sst [smem:[#allocation39_spill]] %s6082_s4  ;;  %s59_s30 = ssub.s32 %s5920_s14, %s6082_s4 }
  0x2a   : > { %p69_p0 = scmp.ne.s32.totalorder %s5916_s26, %s5912_s16  ;;  %p60_p1 = scmp.eq.s32.totalorder %s59_s30, 0 }
  0x2b   : > { %p70_p2 = scmp.eq.s32.totalorder %s5920_s14, 0  ;;  %p75_p3 = scmp.ne.s32.totalorder %s5912_s16, %s5908_s3 }
  0x2c   : > { %p6996_p4 = scmp.eq.s32.totalorder %s6078_s27, 0  ;;  %p466_p7 = scmp.eq.s32.totalorder %s6078_s27, 1 }
  0x2d   : > { %s6094_s0 = scalar_select %p60_p1, %s5916_s26, %s62_s29  }
  0x2e   : > { %p6096_p5 = por %p70_p2, %p69_p0  ;;  %p6102_p6 = por %p6996_p4, %p75_p3 }
  0x2f   : > { %7031 = sst [smem:[#allocation40_spill]] %s6094_s0  ;;  %p472_p8 = scmp.eq.s32.totalorder %s4138_s28, 1 }
  0x30   : > { %s7033_s1 = scalar_select %p6102_p6, 1, 0 }
  0x31   : > { %p4139_p9 = scmp.ge.s32.totalorder %s5920_s14, 1  ;;  %p505_p10 = scmp.lt.s32.totalorder %s5920_s14, 3 }
  0x32   : > { %7034 = sst [smem:[#allocation41_spill]] %s7033_s1  ;;  %p6109_p11 = por %p466_p7, %p69_p0 }
  0x33   : > { %p6113_p12 = por %p472_p8, %p75_p3  ;;  %p6117_p13 = pnand %p4139_p9, %p505_p10 }
  0x34   : > { %s7035_s22 = scalar_select %p6109_p11, 1, 0 }
  0x35   : > { %s7037_s23 = scalar_select %p6113_p12, 1, 0 }
  0x36   : > { %7036 = sst [smem:[#allocation42_spill]] %s7035_s22  ;;  %p5280_p2 = scmp.lt.s32.totalorder %s5920_s14, 2 }
  0x37   : > { %7038 = sst [smem:[#allocation43_spill]] %s7037_s23  ;;  %p5226_p4 = pneg %p6117_p13 }
  0x38   : > { %s660_s2 = sand.u32 1, %s5920_s14   ;;  %s6127_s25 = sand.u32 1, %s5916_s26  }
  0x39   : > { %p7040_p0 = scmp.eq.s32.totalorder %s6078_s27, 0  ;;  %s4150_s29 = sshll.u32 %s6127_s25, 3 }
  0x3a   : > { %s4151_s30 = sshll.u32 %s5920_s14, 3  ;;  %s7042_s23 = sld [smem:[#allocation45_spill]] }
  0x3b   : > { %p6131_p3 = pnand %p5226_p4, %p7040_p0  ;;  %s664_s22 = scalar_lea.vmem [#allocation5], %s4150_s29 }
  0x3c   : > { %s672_s19 = sshll.u32 %s664_s22, 4  ;;  %p6144_p7 = pnand %p5280_p2, %p6096_p5  ;;  %s673_s19 = int_to_ptr.vmem [resolvable:$true] %s672_s19 }
  0x3d   : > { %s7044_s10 = sld [smem:[#allocation46_spill]]  ;;  %s5923_s4 = smov [#allocation8]  }
  0x3e   : > { %s519_s0 = sshll.u32 %s5923_s4, 4  ;;  %p5440_p5 = pneg %p6144_p7  ;;  %s520_s0 = int_to_ptr.vmem [resolvable:$true] %s519_s0 }
  0x40   : > { %s668_s3 = scalar_lea.hbm %s7042_s23, %s4151_s30  ;;  %s5443_s15 = scalar_lea.hbm %s7042_s23, 16 }
  0x41   : > { %s670_s20 = sshll.u32 %s668_s3, 4  ;;  %s6151_s3 = scalar_lea.sflag [#allocation6], %s660_s2  ;;  %s671_s20 = int_to_ptr.hbm [resolvable:$true] %s670_s20 }
  0x42   : > { %s5436_s22 = sshra.s32 %s671_s20, 4  ;;  %s5437_s22 = int_to_ptr.hbm [resolvable:$true] %s5436_s22 }
  0x43   : > { %s517_s7 = sshll.u32 %s7044_s10, 4  ;;  %s5438_s29 = scalar_lea.hbm %s5437_s22, 8  ;;  %s518_s7 = int_to_ptr.hbm [resolvable:$true] %s517_s7 }
  0x44   : > { %p5439_p4 = scmp.ne.s32.totalorder %s5437_s22, %s5438_s29  ;;  %p5444_p10 = scmp.lt.s32.totalorder %s5437_s22, %s7042_s23 }
  0x45   : > { %p5445_p2 = scmp.lt.s32.totalorder %s5443_s15, %s5438_s29 }
  0x46   : > { %p5441_p8 = pnand %p5440_p5, %p5439_p4 }
  0x47   : > { %p5446_p0 = por %p5445_p2, %p5444_p10 }
  0x48   : > { %p5442_p9 = pneg %p5441_p8 }
  0x4a   : > { %p5447_p1 = pnand %p5446_p0, %p5442_p9 }
  0x4c   : > { %5450 = shalt.err (!%p5447_p1)
}
  0x4d   : > { %5257 = dma.hbm_to_vmem [thread:$0]  (!%p6144_p7), %s671_s20, 128, %s673_s19, %s6151_s3  }
  0x4e   : > { %5229 = dma.hbm_to_vmem [thread:$0]  (!%p6131_p3), %s518_s7, 128, %s520_s0, [#allocation9]  }
  0x4f   : > { %s7045_s21 = sld [smem:[#allocation48_spill]]  ;;  %s5924_s22 = smov [#allocation11]  }
  0x50   : > { %s544_s29 = sshll.u32 %s5924_s22, 4  ;;  %s7046_s6 = sld [smem:[#allocation49_spill]]  ;;  %s545_s29 = int_to_ptr.vmem [resolvable:$true] %s544_s29 }
  0x51   : > { %s5925_s19 = smov 16   ;;  %s5926_s20 = smov 1  }
  0x52   : > { %s5927_s7 = smov [#allocation14]   ;;  %s7047_s9 = sld [smem:[#allocation51_spill]] }
  0x53   : > { %s572_s0 = sshll.u32 %s5927_s7, 4  ;;  %s5928_s22 = smov 48   ;;  %s573_s0 = int_to_ptr.vmem [resolvable:$true] %s572_s0 }
  0x54   : > { %s5929_s15 = smov 3   ;;  %s5930_s10 = smov [#allocation17]  }
  0x55   : > { %s542_s12 = sshll.u32 %s7045_s21, 4  ;;  %s5170_s23 = smul.u32 24, %s6127_s25  ;;  %s543_s12 = int_to_ptr.hbm [resolvable:$true] %s542_s12 }
  0x56   : > { %s570_s30 = sshll.u32 %s7046_s6, 4  ;;  %s603_s6 = sshll.u32 %s5930_s10, 4  ;;  %s571_s30 = int_to_ptr.hbm [resolvable:$true] %s570_s30  ;;  %s604_s6 = int_to_ptr.vmem [resolvable:$true] %s603_s6 }
  0x57   : > { %5235 = dma.hbm_to_vmem [thread:$0]  (!%p6131_p3), %s543_s12, 32, %s545_s29, [#allocation12], %s5925_s19, %s5925_s19, %s5926_s20  }
  0x58   : > { %s601_s21 = sshll.u32 %s7047_s9, 4  ;;  %s5171_s1 = smul.u32 24, %s5920_s14  ;;  %s602_s21 = int_to_ptr.hbm [resolvable:$true] %s601_s21 }
  0x59   : > { %5241 = dma.hbm_to_vmem [thread:$0]  (!%p6131_p3), %s571_s30, 96, %s573_s0, [#allocation15], %s5928_s22, %s5928_s22, %s5929_s15  }
  0x5a   : > { %5247 = dma.hbm_to_vmem [thread:$0]  (!%p6131_p3), %s602_s21, 32, %s604_s6, [#allocation18], %s5925_s19, %s5925_s19, %s5926_s20  }
  0x5b   : > { %s688_s7 = scalar_lea.hbm %s6989_s17, %s5171_s1  ;;  %s683_s4 = scalar_lea.vmem [#allocation22], %s5170_s23 }
  0x5c   : > { %s690_s2 = sshll.u32 %s688_s7, 4  ;;  %s692_s9 = sshll.u32 %s683_s4, 4  ;;  %s691_s2 = int_to_ptr.hbm [resolvable:$true] %s690_s2  ;;  %s693_s9 = int_to_ptr.vmem [resolvable:$true] %s692_s9 }
  0x5d   : > { %s5586_s30 = sshra.s32 %s691_s2, 4  ;;  %s5593_s6 = scalar_lea.hbm %s6989_s17, 48  ;;  %s5587_s30 = int_to_ptr.hbm [resolvable:$true] %s5586_s30 }
  0x5e   : > { %s5588_s0 = scalar_lea.hbm %s5587_s30, 24  ;;  %p5594_p9 = scmp.lt.s32.totalorder %s5587_s30, %s6989_s17 }
  0x5f   : > { %p5589_p1 = scmp.ne.s32.totalorder %s5587_s30, %s5588_s0  ;;  %p5595_p10 = scmp.lt.s32.totalorder %s5593_s6, %s5588_s0 }
  0x61   : > { %p5591_p4 = pnand %p5589_p1, %p5440_p5  ;;  %p5596_p2 = por %p5595_p10, %p5594_p9 }
  0x63   : > { %p5592_p8 = pneg %p5591_p4 }
  0x65   : > { %p5597_p0 = pnand %p5596_p2, %p5592_p8 }
  0x67   : > { %5600 = shalt.err (!%p5597_p0)
}
  0x68   : > { %5260 = dma.hbm_to_vmem [thread:$0]  (!%p6144_p7), %s691_s2, 384, %s693_s9, %s6151_s3  }
  0x69   : > { %s7048_s12 = sld [smem:[#allocation47_spill]]  ;;  %s5931_s7 = smov [#allocation10]  }
  0x6a   : > { %s530_s4 = sshll.u32 %s5931_s7, 4  ;;  %s556_s0 = sshll.u32 %s6978_s5, 4  ;;  %s531_s4 = int_to_ptr.vmem [resolvable:$true] %s530_s4  ;;  %s557_s0 = int_to_ptr.hbm [resolvable:$true] %s556_s0 }
  0x6b   : > { %s5932_s9 = smov [#allocation13]   ;;  %s5933_s15 = smov 192  }
  0x6c   : > { %s558_s2 = sshll.u32 %s5932_s9, 4  ;;  %s5934_s6 = smov 12   ;;  %s559_s2 = int_to_ptr.vmem [resolvable:$true] %s558_s2 }
  0x6d   : > { %5238 = dma.hbm_to_vmem [thread:$0]  (!%p6131_p3), %s557_s0, 6144, %s559_s2, [#allocation12], %s5933_s15, %s5933_s15, %s5934_s6  }
  0x6e   : > { %s587_s1 = sshll.u32 %s6981_s8, 4  ;;  %s5935_s23 = smov [#allocation16]   ;;  %s588_s1 = int_to_ptr.hbm [resolvable:$true] %s587_s1 }
  0x6f   : > { %s528_s29 = sshll.u32 %s7048_s12, 4  ;;  %s589_s12 = sshll.u32 %s5935_s23, 4  ;;  %s529_s29 = int_to_ptr.hbm [resolvable:$true] %s528_s29  ;;  %s590_s12 = int_to_ptr.vmem [resolvable:$true] %s589_s12 }
  0x70   : > { %5232 = dma.hbm_to_vmem [thread:$0]  (!%p6131_p3), %s529_s29, 32, %s531_s4, [#allocation9], %s5925_s19, %s5925_s19, %s5926_s20  }
  0x71   : > { %s618_s29 = sshll.u32 %s6984_s11, 4  ;;  %s5936_s4 = smov [#allocation19]   ;;  %s619_s29 = int_to_ptr.hbm [resolvable:$true] %s618_s29 }
  0x72   : > { %5244 = dma.hbm_to_vmem [thread:$0]  (!%p6131_p3), %s588_s1, 32, %s590_s12, [#allocation15], %s5925_s19, %s5925_s19, %s5926_s20  }
  0x73   : > { %s620_s30 = sshll.u32 %s5936_s4, 4  ;;  %s635_s2 = sshll.u32 %s6986_s13, 4  ;;  %s621_s30 = int_to_ptr.vmem [resolvable:$true] %s620_s30  ;;  %s636_s2 = int_to_ptr.hbm [resolvable:$true] %s635_s2 }
  0x74   : > { %s5937_s15 = smov 256   ;;  %s5938_s6 = smov [#allocation20]  }
  0x75   : > { %5250 = dma.hbm_to_vmem [thread:$0]  (!%p6131_p3), %s619_s29, 8192, %s621_s30, [#allocation18], %s5937_s15, %s5937_s15, %s5925_s19  }
  0x76   : > { %s637_s21 = sshll.u32 %s5938_s6, 4  ;;  %s5939_s10 = smov 64   ;;  %s638_s21 = int_to_ptr.vmem [resolvable:$true] %s637_s21 }
  0x77   : > { %s5940_s20 = smov 4   ;;  %s5172_s1 = smul.u32 288, %s6127_s25 }
  0x78   : > { %5253 = dma.hbm_to_vmem [thread:$0]  (!%p6131_p3), %s636_s2, 8192, %s638_s21, [#allocation21], %s5939_s10, %s5939_s10, %s5940_s20  }
  0x79   : > { %s5173_s23 = smul.u32 288, %s5920_s14  ;;  %s703_s4 = scalar_lea.vmem [#allocation23], %s5172_s1 }
  0x7a   : > { %s712_s0 = sshll.u32 %s703_s4, 4  ;;  %s5773_s30 = scalar_lea.hbm %s6990_s18, 576  ;;  %s713_s0 = int_to_ptr.vmem [resolvable:$true] %s712_s0 }
  0x7b   : > { %s708_s22 = scalar_lea.hbm %s6990_s18, %s5173_s23 }
  0x7c   : > { %s710_s9 = sshll.u32 %s708_s22, 4  ;;  %s711_s9 = int_to_ptr.hbm [resolvable:$true] %s710_s9 }
  0x7d   : > { %s5766_s19 = sshra.s32 %s711_s9, 4  ;;  %s5767_s19 = int_to_ptr.hbm [resolvable:$true] %s5766_s19 }
  0x7e   : > { %s5768_s29 = scalar_lea.hbm %s5767_s19, 288  ;;  %p5774_p3 = scmp.lt.s32.totalorder %s5767_s19, %s6990_s18 }
  0x7f   : > { %p5769_p1 = scmp.ne.s32.totalorder %s5767_s19, %s5768_s29  ;;  %p5775_p9 = scmp.lt.s32.totalorder %s5773_s30, %s5768_s29 }
  0x81   : > { %p5771_p4 = pnand %p5769_p1, %p5440_p5  ;;  %p5776_p10 = por %p5775_p9, %p5774_p3 }
  0x83   : > { %p5772_p8 = pneg %p5771_p4 }
  0x85   : > { %p5777_p2 = pnand %p5776_p10, %p5772_p8 }
  0x87   : > { %5780 = shalt.err (!%p5777_p2)
}
  0x88   : > { %5263 = dma.hbm_to_vmem [thread:$0]  (!%p6144_p7), %s711_s9, 4608, %s713_s0, %s6151_s3  }
  0x89   : > { %721 = sbr.rel (%p6117_p13) target bundleno = 4964 (0x1364), region = 92  ;;  %s723_s21 = sand.u32 (!%p6117_p13), 1, %s6078_s27  }
  0x8a   : > { %s6260_s10 = sand.u32 (!%p6117_p13), 1, %s5912_s16   ;;  %s724_s1 = scalar_lea.sflag (!%p6117_p13), [#allocation6], %s723_s21 }
  0x8b   : > { %s4155_s20 = sshll.u32 (!%p6117_p13), %s6260_s10, 3 }
  0x8c   : > { %s727_s23 = scalar_lea.vmem (!%p6117_p13), [#allocation5], %s4155_s20 }
  0x8e   : > { %5871 = dma.done.wait (%p6102_p6), %s724_s1, 128  }
  0x8f   : > { %5873 = vsyncadd (%p6102_p6), %s724_s1, 4294967168  ;;  %p7050_p7 = scmp.eq.s32.totalorder %s6078_s27, 0 }
  0x91   : > { %5875 = dma.done.wait (%p7050_p7), [#allocation9], 160   ;;  %p7051_p13 = pmov %p7050_p7 }
  0x92   : > { %p7052_p5 = pmov %p7050_p7 }
  0x93   : > { %5877 = vsyncadd (%p7051_p13), [#allocation9], 4294967136 }
  0x94   : > { %5879 = dma.done.wait (%p7052_p5), [#allocation12], 6176   ;;  %p7053_p0 = pmov %p7052_p5 }
  0x96   : > { %5881 = vsyncadd (%p7053_p0), [#allocation12], 4294961120  ;;  %p7054_p1 = pmov %p7053_p0 }
  0x97   : > { %p7055_p4 = pmov %p7053_p0 }
  0x98   : > { %5883 = dma.done.wait (%p7054_p1), [#allocation15], 128  }
  0x99   : > { %5885 = vsyncadd (%p7055_p4), [#allocation15], 4294967168  ;;  %p7056_p8 = pmov %p7053_p0 }
  0x9a   : > { %p7057_p3 = pmov %p7053_p0 }
  0x9b   : > { %5887 = dma.done.wait (%p7056_p8), [#allocation18], 8224  }
  0x9c   : > { %5889 = vsyncadd (%p7057_p3), [#allocation18], 4294959072  ;;  %p7058_p9 = pmov %p7053_p0 }
  0x9d   : > { %p7059_p10 = pmov %p7053_p0 }
  0x9e   : > { %5891 = dma.done.wait (%p7058_p9), [#allocation21], 8192  }
  0x9f   : > { %5893 = vsyncadd (%p7059_p10), [#allocation21], 4294959104  ;;  %s5174_s26 = smul.u32 24, %s6260_s10 }
  0xa1   : > { %s6288_s24 = scalar_lea.vmem [#allocation22], %s5174_s26 }
  0xa2   : > { %5895 = dma.done.wait (%p6102_p6), %s724_s1, 4992  }
  0xa3   : > { %5897 = vsyncadd (%p6102_p6), %s724_s1, 4294962304  ;;  %v863_v1 = vld [vmem:[%s727_s23] sm:$0xff]  ;;  %v864_v2 = vld [vmem:[#allocation8] sm:$0xff]  ;;  %v5941_v4 = vmov 128.0   ;;  %vm1111_vm4 = vcmask 261120   ;;  %s5942_s3 = smov 96  }
  0xa4   : > { %v6294_v3 = vadd.f32 %v864_v2, %v863_v1  ;;  %5362 = vrcp.f32 %v5941_v4  ;;  %v4251_v5 = vld [vmem:[#allocation13 + $0xa8] sm:$0xf]  ;;  %v5000_v6 = vld [vmem:[#allocation13 + $0xb0] sm:$0xf0]  ;;  %v4999_v7 = vld [vmem:[#allocation13 + $0xac] sm:$0xf] }
  0xa5   : > { %v4252_v8 = vor.u32 %v5000_v6, %v4251_v5  ;;  %v4253_v9 = vld [vmem:[#allocation13 + $0xb4] sm:$0xf0]  ;;  %v4259_v10 = vld [vmem:[#allocation13 + $0xb0] sm:$0xf]  ;;  %v5001_v11 = vld [vmem:[#allocation13 + $0xb8] sm:$0xf0] }
  0xa6   : > { %868 = vadd.xlane.f32.xlu0 %v6294_v3  ;;  %v4256_v12 = vor.u32 %v4999_v7, %v4253_v9  ;;  %v4260_v13 = vor.u32 %v5001_v11, %v4259_v10  ;;  %v4239_v24 = vld [vmem:[#allocation13 + $0x90] sm:$0xf]  ;;  %v4997_v25 = vld [vmem:[#allocation13 + $0x98] sm:$0xf0]  ;;  %v4996_v26 = vld [vmem:[#allocation13 + $0x94] sm:$0xf] }
  0xa7   : > { %1072 = vmatpush.bf16.msra.mxu0 %v4252_v8  ;;  %v4240_v27 = vor.u32 %v4997_v25, %v4239_v24  ;;  %v4241_v28 = vld [vmem:[#allocation13 + $0x9c] sm:$0xf0]  ;;  %v4247_v29 = vld [vmem:[#allocation13 + $0x98] sm:$0xf]  ;;  %v4998_v30 = vld [vmem:[#allocation13 + $0xa0] sm:$0xf0] }
  0xa8   : > { %1085 = vmatpush.bf16.msra.mxu1 %v4256_v12  ;;  %1098 = vmatpush.bf16.msra.mxu2 %v4260_v13  ;;  %v4244_v31 = vor.u32 %v4996_v26, %v4241_v28  ;;  %v4248_v32 = vor.u32 %v4998_v30, %v4247_v29  ;;  %v4227_v33 = vld [vmem:[#allocation13 + $0x78] sm:$0xf]  ;;  %v4994_v34 = vld [vmem:[#allocation13 + $0x80] sm:$0xf0]  ;;  %v4993_v35 = vld [vmem:[#allocation13 + $0x7c] sm:$0xf] }
  0xa9   : > { %v4228_v36 = vor.u32 %v4994_v34, %v4227_v33  ;;  %v4229_v37 = vld [vmem:[#allocation13 + $0x84] sm:$0xf0]  ;;  %v4235_v38 = vld [vmem:[#allocation13 + $0x80] sm:$0xf]  ;;  %v4995_v39 = vld [vmem:[#allocation13 + $0x88] sm:$0xf0] }
  0xaa   : > { %v5363_v14 = vpop.eup %5362  ;;  %v4232_v40 = vor.u32 %v4993_v35, %v4229_v37  ;;  %v4236_v41 = vor.u32 %v4995_v39, %v4235_v38  ;;  %v4215_v42 = vld [vmem:[#allocation13 + $0x60] sm:$0xf]  ;;  %v4991_v43 = vld [vmem:[#allocation13 + $0x68] sm:$0xf0]  ;;  %v4990_v44 = vld [vmem:[#allocation13 + $0x64] sm:$0xf] }
  0xab   : > { %v871_v15 = vmul.f32 128.0, %v5363_v14  ;;  %vm875_vm0 = vweird.f32 %v5363_v14  ;;  %1073 = vmatpush.bf16.msra.mxu0 %v4240_v27  ;;  %v4216_v45 = vor.u32 %v4991_v43, %v4215_v42  ;;  %v4217_v46 = vld [vmem:[#allocation13 + $0x6c] sm:$0xf0]  ;;  %v4223_v47 = vld [vmem:[#allocation13 + $0x68] sm:$0xf]  ;;  %s5943_s12 = smov 32  }
  0xac   : > { %1086 = vmatpush.bf16.msra.mxu1 %v4244_v31  ;;  %1099 = vmatpush.bf16.msra.mxu2 %v4248_v32  ;;  %v4992_v48 = vld [vmem:[#allocation13 + $0x70] sm:$0xf0]  ;;  %v4220_v49 = vor.u32 %v4990_v44, %v4217_v46  ;;  %v4203_v51 = vld [vmem:[#allocation13 + $0x48] sm:$0xf]  ;;  %v4987_v53 = vld [vmem:[#allocation13 + $0x4c] sm:$0xf] }
  0xad   : > { %v872_v16 = vsub.f32 1.0, %v871_v15  ;;  %v4224_v50 = vor.u32 %v4992_v48, %v4223_v47  ;;  %v4988_v52 = vld [vmem:[#allocation13 + $0x50] sm:$0xf0]  ;;  %v4205_v55 = vld [vmem:[#allocation13 + $0x54] sm:$0xf0]  ;;  %vm1139_vm5 = vcmask 64512  }
  0xae   : > { %v4204_v54 = vor.u32 %v4988_v52, %v4203_v51  ;;  %v4211_v56 = vld [vmem:[#allocation13 + $0x50] sm:$0xf]  ;;  %v4989_v57 = vld [vmem:[#allocation13 + $0x58] sm:$0xf0]  ;;  %v4208_v58 = vor.u32 %v4987_v53, %v4205_v55  ;;  %v4984_v62 = vld [vmem:[#allocation13 + $0x34] sm:$0xf] }
  0xaf   : > { %v873_v17 = vmul.f32 %v5363_v14, %v872_v16  ;;  %1074 = vmatpush.bf16.msra.mxu0 %v4228_v36  ;;  %v4212_v59 = vor.u32 %v4989_v57, %v4211_v56  ;;  %v4191_v60 = vld [vmem:[#allocation13 + $0x30] sm:$0xf]  ;;  %v4985_v61 = vld [vmem:[#allocation13 + $0x38] sm:$0xf0]  ;;  %v4193_v0 = vld [vmem:[#allocation13 + $0x3c] sm:$0xf0] }
  0xb0   : > { %1087 = vmatpush.bf16.msra.mxu1 %v4232_v40  ;;  %1100 = vmatpush.bf16.msra.mxu2 %v4236_v41  ;;  %v4192_v63 = vor.u32 %v4985_v61, %v4191_v60  ;;  %v4199_v1 = vld [vmem:[#allocation13 + $0x38] sm:$0xf]  ;;  %v4986_v2 = vld [vmem:[#allocation13 + $0x40] sm:$0xf0]  ;;  %v4196_v4 = vor.u32 %v4984_v62, %v4193_v0  ;;  %v4981_v8 = vld [vmem:[#allocation13 + $0x1c] sm:$0xf] }
  0xb1   : > { %v874_v18 = vadd.f32 %v5363_v14, %v873_v17  ;;  %v4200_v5 = vor.u32 %v4986_v2, %v4199_v1  ;;  %v4179_v6 = vld [vmem:[#allocation13 + $0x18] sm:$0xf]  ;;  %v4982_v7 = vld [vmem:[#allocation13 + $0x20] sm:$0xf0]  ;;  %v4181_v10 = vld [vmem:[#allocation13 + $0x24] sm:$0xf0] }
  0xb2   : > { %v4180_v9 = vor.u32 %v4982_v7, %v4179_v6  ;;  %v4187_v11 = vld [vmem:[#allocation13 + $0x20] sm:$0xf]  ;;  %v4983_v12 = vld [vmem:[#allocation13 + $0x28] sm:$0xf0]  ;;  %v4184_v13 = vor.u32 %v4981_v8, %v4181_v10  ;;  %v4978_v17 = vld [vmem:[#allocation13 + $0x4] sm:$0xf] }
  0xb3   : > { %v6297_v19 = vsel %vm875_vm0, %v5363_v14, %v874_v18  ;;  %1075 = vmatpush.bf16.msra.mxu0 %v4216_v45  ;;  %v4188_v14 = vor.u32 %v4983_v12, %v4187_v11  ;;  %v4167_v15 = vld [vmem:[#allocation13] sm:$0xf]  ;;  %v4979_v16 = vld [vmem:[#allocation13 + $0x8] sm:$0xf0]  ;;  %v5349_v35 = vld [vmem:[#allocation10] ss:$0 sm:$0xff] }
  0xb4   : > { %1088 = vmatpush.bf16.msra.mxu1 %v4220_v49  ;;  %1101 = vmatpush.bf16.msra.mxu2 %v4224_v50  ;;  %v4168_v18 = vor.u32 %v4979_v16, %v4167_v15  ;;  %v5350_v38 = vld [vmem:[#allocation11] ss:$0 sm:$0xff]  ;;  %v936_v42 = vld [vmem:[#allocation14] sm:$0x7]  ;;  %s5944_s7 = smov 64   ;;  %s7060_s0 = sld [smem:[#allocation50_spill]] }
  0xb5   : > { %v939_v43 = vperm.slane %v936_v42, 1  ;;  %v938_v44 = vperm.slane %v936_v42, 0  ;;  %v940_v48 = vperm.slane %v936_v42, 2  ;;  %vm1386_vm6 = vcmask 523264   ;;  %s7061_s9 = sld [smem:[#allocation52_spill]]  ;;  %s5175_s22 = smul.u32 288, %s6260_s10 }
  0xb6   : > { %vm1388_vm7 = vcmask 785408   ;;  %s7062_s28 = sld [smem:[#allocation53_spill]]  ;;  %s5178_s19 = smul.u32 3, %s6078_s27 }
  0xb7   : > { %1076 = vmatpush.bf16.msra.mxu0 %v4204_v54  ;;  %s7063_s2 = sld [smem:[#allocation54_spill]]  ;;  %s6551_s4 = scalar_lea.vmem [#allocation23], %s5175_s22 }
  0xb8   : > { %1089 = vmatpush.bf16.msra.mxu1 %v4208_v58  ;;  %1102 = vmatpush.bf16.msra.mxu2 %v4212_v59  ;;  %s3403_s26 = sld [smem:[#allocation3 + %s6078_s27]]  ;;  %s3875_s23 = scalar_lea.sflag [#allocation7], %s6260_s10 }
  0xb9   : > { %s7067_s30 = sld [smem:[#allocation56_spill]] }
  0xbb   : > { %1077 = vmatpush.bf16.msra.mxu0 %v4192_v63 }
  0xbc   : > { %1090 = vmatpush.bf16.msra.mxu1 %v4196_v4  ;;  %1103 = vmatpush.bf16.msra.mxu2 %v4200_v5 }
  0xbf   : > { %1078 = vmatpush.bf16.msra.mxu0 %v4180_v9  ;;  %s6677_s15 = scalar_lea.hbm %s7067_s30, %s5178_s19 }
  0xc0   : > { %1091 = vmatpush.bf16.msra.mxu1 %v4184_v13  ;;  %1104 = vmatpush.bf16.msra.mxu2 %v4188_v14  ;;  %s3894_s20 = sshll.u32 %s6677_s15, 4  ;;  %s3895_s20 = int_to_ptr.hbm [resolvable:$true] %s3894_s20 }
  0xc3   : > { %1079 = vmatpush.bf16.msra.mxu0 %v4168_v18 }
 0x119   : > { %v869_v20 = vpop.xlane.xlu0 %868 }
 0x11a   : > { %v877_v21 = vmul.f32 %v6297_v19, %v869_v20  ;;  %v4169_v20 = vld [vmem:[#allocation13 + $0xc] sm:$0xf0] }
 0x11b   : > { %v4172_v24 = vor.u32 %v4978_v17, %v4169_v20 }
 0x11c   : > { %v6301_v22 = vsub.f32 %v6294_v3, %v877_v21  ;;  %v4175_v21 = vld [vmem:[#allocation13 + $0x8] sm:$0xf] }
 0x11d   : > { %1092 = vmatpush.bf16.msra.mxu1 %v4172_v24 }
 0x11e   : > { %v879_v23 = vmul.f32 %v6301_v22, %v6301_v22 }
 0x120   : > { %880 = vadd.xlane.f32.xlu0 %v879_v23  ;;  %v4980_v23 = vld [vmem:[#allocation13 + $0x10] sm:$0xf0] }
 0x121   : > { %v4176_v25 = vor.u32 %v4980_v23, %v4175_v21 }
 0x123   : > { %1105 = vmatpush.bf16.msra.mxu2 %v4176_v25 }
 0x193   : > { %v881_v26 = vpop.xlane.xlu0 %880 }
 0x194   : > { %v882_v27 = vmul.f32 %v881_v26, %v6297_v19 }
 0x196   : > { %v883_v28 = vadd.f32 1e-05, %v882_v27 }
 0x198   : > { %5364 = vrsqrt.f32 %v883_v28  ;;  %vm890_vm2 = vweird.f32 %v883_v28 }
 0x19e   : > { %v5365_v29 = vpop.eup %5364 }
 0x19f   : > { %v885_v30 = vmul.f32 %v5365_v29, %v883_v28  ;;  %vm891_vm1 = vweird.f32 %v5365_v29 }
 0x1a0   : > { %vm892_vm3 = vmor %vm890_vm2, %vm891_vm1  ;;  %vm3407_vm2 = vcmask 7168  }
 0x1a1   : > { %v886_v31 = vmul.f32 %v5365_v29, %v885_v30 }
 0x1a3   : > { %v887_v32 = vmul.f32 0.5, %v886_v31 }
 0x1a5   : > { %v888_v33 = vsub.f32 1.5, %v887_v32 }
 0x1a7   : > { %v889_v34 = vmul.f32 %v5365_v29, %v888_v33 }
 0x1a9   : > { %v893_v36 = vsel %vm892_vm3, %v5365_v29, %v889_v34  ;;  %vm3461_vm3 = vcmask 1040384  }
 0x1aa   : > { %v894_v37 = vmul.f32 %v893_v36, %v6301_v22 }
 0x1ac   : > { %v898_v39 = vmul.f32 %v5349_v35, %v894_v37 }
 0x1ae   : > { %v902_v40 = vadd.f32 %v5350_v38, %v898_v39 }
 0x1b0   : > { %v903_v41 = vpack.c.bf16 %v902_v40, %v902_v40 }
 0x1b2   : > { %1080 = vmatmul.bf16.vlgmr.msra.gmra.mxu0 %v903_v41  ;;  %1093 = vmatmul.bf16.vlgmr.msra.gmra.mxu1 %v903_v41 }
 0x1b3   : > { %1106 = vmatmul.bf16.vlgmr.msra.gmra.mxu2 %v903_v41 }
 0x22f   : > { %v1081_v45 = vpop.f32.mrf.mxu0  ;;  %v1094_v46 = vpop.f32.mrf.mxu1 }
 0x230   : > { %v1095_v47 = vadd.f32 %v1094_v46, %v939_v43  ;;  %v1082_v22 = vadd.f32 %v1081_v45, %v938_v44 }
 0x232   : > { %1176 = vrot.lane.b32.xlu2 %v1095_v47, %s5942_s3  ;;  %4261 = vmatpush.xpose.msk.msra.mxu3 %vm1111_vm4, %v1095_v47 }
 0x235   : > { %4262 = vmatmul.msk.f32.vlgmr.msra.gmra.mxu3 %vm1111_vm4, %v1082_v22 }
 0x236   : > { %v1107_v49 = vpop.f32.mrf.mxu2 }
 0x237   : > { %v6310_v50 = vadd.f32 %v1107_v49, %v940_v48  ;;  %v1083_v51 = vpop.f32.mrf.mxu0  ;;  %v1096_v52 = vpop.f32.mrf.mxu1  ;;  %v5008_v48 = vld [vmem:[%s7060_s0 + $0x30] sm:$0xff]  ;;  %v5007_v49 = vld [vmem:[%s7060_s0 + $0x28] sm:$0xff] }
 0x238   : > { %v5006_v52 = vld [vmem:[%s7060_s0 + $0x20] sm:$0xff] }
 0x239   : > { %1169 = vmatpush.msrb.mxu3 %v6310_v50 }
 0x23a   : > { %1174 = vrot.lane.b32.xlu2 %v1082_v22, %s5942_s3 }
 0x23e   : > { %v1109_v53 = vpop.f32.mrf.mxu2 }
 0x23f   : > { %v5005_v53 = vld [vmem:[%s7060_s0 + $0x18] sm:$0xff] }
 0x242   : > { %1215 = vrot.lane.b32.xlu2 %v6310_v50, %s5942_s3 }
 0x24a   : > { %1309 = vrot.lane.b32.xlu2 %v1095_v47, %s5943_s12 }
 0x252   : > { %1307 = vrot.lane.b32.xlu2 %v1082_v22, %s5943_s12 }
 0x28c   : > { %v1177_v54 = vpop.permute.xlu2 %1176 }
 0x28d   : > { %4264 = vmatpush.xpose.msk.msra.mxu3 %vm1111_vm4, %v1177_v54  ;;  %v5004_v54 = vld [vmem:[%s7060_s0 + $0x10] sm:$0xff] }
 0x294   : > { %v1175_v55 = vpop.permute.xlu2 %1174 }
 0x29c   : > { %v1216_v56 = vpop.permute.xlu2 %1215 }
 0x2a4   : > { %v1310_v57 = vpop.permute.xlu2 %1309 }
 0x2a5   : > { %4270 = vmatpush.xpose.msk.msrb.mxu0 %vm1111_vm4, %v1310_v57 }
 0x2ac   : > { %v1308_v58 = vpop.permute.xlu2 %1307 }
 0x2ad   : > { %4271 = vmatmul.msk.f32.vlgmr.msrb.gmra.mxu0 %vm1111_vm4, %v1308_v58 }
 0x2b8   : > { %v1135_v59 = vpop.f32.mrf.mxu3 }
 0x2b9   : > { %v1138_v60 = vmul.f32 0.17677669, %v1135_v59 }
 0x2bb   : > { %v1140_v61 = vsel %vm1139_vm5, %v1138_v60, -inf }
 0x2bc   : > { %1141 = vmax.xlane.f32.xlu1 %v1140_v61 }
 0x32a   : > { %v1332_v11 = vpop.f32.mrf.mxu0 }
 0x32b   : > { %v1335_v12 = vmul.f32 0.17677669, %v1332_v11  ;;  %v4427_v11 = vld [vmem:[#allocation19 + $0xe8] sm:$0xf] }
 0x32d   : > { %v1336_v13 = vsel %vm1139_vm5, %v1335_v12, -inf }
 0x32f   : > { %v1142_v62 = vpop.xlane.xlu1 %1141 }
 0x330   : > { %v1143_v63 = vsub.f32 %v1138_v60, %v1142_v62 }
 0x332   : > { %v1144_v0 = vmul.f32 1.442695, %v1143_v63 }
 0x334   : > { %5366 = vpow2.f32 %v1144_v0  ;;  %v5351_v0 = vld [vmem:[#allocation16] ss:$0 sm:$0xff] }
 0x33a   : > { %v5367_v1 = vpop.eup %5366 }
 0x33b   : > { %v1146_v2 = vsel %vm1139_vm5, %v5367_v1, 0.0 }
 0x33c   : > { %1147 = vadd.xlane.f32.xlu1 %v1146_v2 }
 0x3af   : > { %v1148_v4 = vpop.xlane.xlu1 %1147 }
 0x3b0   : > { %5368 = vrcp.f32 %v1148_v4 }
 0x3b6   : > { %v5369_v5 = vpop.eup %5368 }
 0x3b7   : > { %v1150_v6 = vmul.f32 %v5369_v5, %v5367_v1 }
 0x3b9   : > { %4263 = vmatmul.msk.f32.vlgmr.msrb.gmra.mxu3 %vm1139_vm5, %v1150_v6  ;;  %v4419_v6 = vld [vmem:[#allocation19 + $0xe0] sm:$0xf] }
 0x3ba   : > { %1236 = vmatpush.msrb.mxu3 %v1216_v56  ;;  %v5002_v56 = vld [vmem:[%s7060_s0] sm:$0xff] }
 0x3c1   : > { %4265 = vmatmul.msk.f32.vlgmr.msra.gmra.mxu3 %vm1111_vm4, %v1175_v55  ;;  %v5003_v55 = vld [vmem:[%s7060_s0 + $0x8] sm:$0xff] }
 0x43c   : > { %v6325_v7 = vpop.f32.mrf.mxu3 }
 0x444   : > { %v1199_v8 = vpop.f32.mrf.mxu3 }
 0x445   : > { %v1202_v9 = vmul.f32 0.17677669, %v1199_v8  ;;  %v5040_v8 = vld [vmem:[#allocation19 + $0xec] sm:$0xf0] }
 0x447   : > { %v1203_v10 = vsel %vm1139_vm5, %v1202_v9, -inf }
 0x448   : > { %1204 = vmax.xlane.f32.xlu0 %v1203_v10  ;;  %v4421_v10 = vld [vmem:[#allocation19 + $0xf0] sm:$0xf0] }
 0x45c   : > { %1243 = vrot.lane.b32.xlu0 %v1095_v47, %s5944_s7 }
 0x486   : > { %1337 = vmax.xlane.f32.xlu0 %v1336_v13 }
 0x49a   : > { %1281 = vrot.lane.b32.xlu0 %v6310_v50, %s5944_s7 }
 0x4bb   : > { %v1205_v14 = vpop.xlane.xlu0 %1204 }
 0x4bc   : > { %v1206_v15 = vsub.f32 %v1202_v9, %v1205_v14  ;;  %v4420_v9 = vor.u32 %v5040_v8, %v4419_v6  ;;  %v4365_v6 = vld [vmem:[#allocation19 + $0x78] sm:$0xf0] }
 0x4be   : > { %v1207_v16 = vmul.f32 1.442695, %v1206_v15  ;;  %v5039_v15 = vld [vmem:[#allocation19 + $0xec] sm:$0xf] }
 0x4c0   : > { %5370 = vpow2.f32 %v1207_v16  ;;  %v4429_v16 = vld [vmem:[#allocation19 + $0xf8] sm:$0xf0] }
 0x4c6   : > { %v5371_v17 = vpop.eup %5370 }
 0x4c7   : > { %v1209_v18 = vsel %vm1139_vm5, %v5371_v17, 0.0 }
 0x4c8   : > { %1210 = vadd.xlane.f32.xlu1 %v1209_v18 }
 0x4ce   : > { %v1244_v20 = vpop.permute.xlu0 %1243 }
 0x4cf   : > { %4267 = vmatpush.xpose.msk.msra.mxu3 %vm1111_vm4, %v1244_v20 }
 0x4e1   : > { %1241 = vrot.lane.b32.xlu1 %v1082_v22, %s5944_s7  ;;  %v5009_v22 = vld [vmem:[%s7060_s0 + $0x38] sm:$0xff] }
 0x4e2   : > { %1455 = vmatpush.bf16.msrb.mxu2 %v5009_v22  ;;  %v5028_v22 = vld [vmem:[#allocation19 + $0x8c] sm:$0xf0] }
 0x4e6   : > { %1456 = vmatpush.bf16.msrb.mxu2 %v5008_v48  ;;  %v5026_v48 = vld [vmem:[#allocation19 + $0x84] sm:$0xf] }
 0x4ea   : > { %1457 = vmatpush.bf16.msrb.mxu2 %v5007_v49 }
 0x4ee   : > { %1458 = vmatpush.bf16.msrb.mxu2 %v5006_v52  ;;  %v5029_v52 = vld [vmem:[#allocation19 + $0x94] sm:$0xf0] }
 0x4f2   : > { %1459 = vmatpush.bf16.msrb.mxu2 %v5005_v53 }
 0x4f6   : > { %1460 = vmatpush.bf16.msrb.mxu2 %v5004_v54 }
 0x4f9   : > { %v1338_v23 = vpop.xlane.xlu0 %1337 }
 0x4fa   : > { %v1339_v29 = vsub.f32 %v1335_v12, %v1338_v23  ;;  %1461 = vmatpush.bf16.msrb.mxu2 %v5003_v55  ;;  %v5041_v12 = vld [vmem:[#allocation19 + $0xf4] sm:$0xf0]  ;;  %v4403_v23 = vld [vmem:[#allocation19 + $0xc0] sm:$0xf]  ;;  %v5027_v55 = vld [vmem:[#allocation19 + $0x8c] sm:$0xf] }
 0x4fb   : > { %v4428_v14 = vor.u32 %v5041_v12, %v4427_v11  ;;  %v4341_v12 = vld [vmem:[#allocation19 + $0x50] sm:$0xf0] }
 0x4fc   : > { %v1340_v30 = vmul.f32 1.442695, %v1339_v29  ;;  %v5037_v29 = vld [vmem:[#allocation19 + $0xd4] sm:$0xf0] }
 0x4fd   : > { %1733 = vmatpush.bf16.msrb.mxu1 %v4428_v14  ;;  %v5021_v14 = vld [vmem:[#allocation19 + $0x54] sm:$0xf0] }
 0x4fe   : > { %1462 = vmatpush.bf16.msrb.mxu2 %v5002_v56  ;;  %v4381_v56 = vld [vmem:[#allocation19 + $0x98] sm:$0xf0] }
 0x50c   : > { %v1282_v26 = vpop.permute.xlu0 %1281 }
 0x53b   : > { %v1211_v21 = vpop.xlane.xlu1 %1210 }
 0x53c   : > { %5372 = vrcp.f32 %v1211_v21 }
 0x53d   : > { %5374 = vpow2.f32 %v1340_v30 }
 0x542   : > { %v5373_v24 = vpop.eup %5372 }
 0x543   : > { %v1213_v25 = vmul.f32 %v5373_v24, %v5371_v17  ;;  %v5375_v34 = vpop.eup %5374  ;;  %v4432_v17 = vor.u32 %v5039_v15, %v4429_v16  ;;  %v5036_v24 = vld [vmem:[#allocation19 + $0xcc] sm:$0xf0] }
 0x544   : > { %v1342_v35 = vsel %vm1139_vm5, %v5375_v34, 0.0 }
 0x545   : > { %4266 = vmatmul.msk.f32.vlgmr.msrb.gmra.mxu3 %vm1139_vm5, %v1213_v25  ;;  %1746 = vmatpush.bf16.msra.mxu2 %v4432_v17  ;;  %v5034_v25 = vld [vmem:[#allocation19 + $0xc4] sm:$0xf]  ;;  %v5019_v17 = vld [vmem:[#allocation19 + $0x4c] sm:$0xf] }
 0x546   : > { %1302 = vmatpush.msrb.mxu3 %v1282_v26  ;;  %v4404_v26 = vor.u32 %v5036_v24, %v4403_v23  ;;  %v5016_v23 = vld [vmem:[#allocation19 + $0x2c] sm:$0xf0]  ;;  %v5014_v24 = vld [vmem:[#allocation19 + $0x24] sm:$0xf] }
 0x553   : > { %v1242_v27 = vpop.permute.xlu1 %1241 }
 0x554   : > { %4268 = vmatmul.msk.f32.vlgmr.msra.gmra.mxu3 %vm1111_vm4, %v1242_v27  ;;  %v4405_v27 = vld [vmem:[#allocation19 + $0xd0] sm:$0xf0] }
 0x555   : > { %v4408_v30 = vor.u32 %v5034_v25, %v4405_v27  ;;  %v4331_v27 = vld [vmem:[#allocation19 + $0x28] sm:$0xf] }
 0x5c8   : > { %v1238_v28 = vpop.f32.mrf.mxu3 }
 0x5d7   : > { %v1266_v31 = vpop.f32.mrf.mxu3 }
 0x5d8   : > { %v1269_v32 = vmul.f32 0.17677669, %v1266_v31 }
 0x5da   : > { %v1270_v33 = vsel %vm1139_vm5, %v1269_v32, -inf }
 0x5db   : > { %1271 = vmax.xlane.f32.xlu2 %v1270_v33  ;;  %v4413_v33 = vld [vmem:[#allocation19 + $0xd8] sm:$0xf0] }
 0x5e3   : > { %1343 = vadd.xlane.f32.xlu2 %v1342_v35  ;;  %v4387_v35 = vld [vmem:[#allocation19 + $0xa0] sm:$0xf] }
 0x5fb   : > { %1347 = vrot.lane.b32.xlu2 %v6310_v50, %s5943_s12 }
 0x64e   : > { %v1272_v36 = vpop.xlane.xlu2 %1271 }
 0x64f   : > { %v1273_v37 = vsub.f32 %v1269_v32, %v1272_v36  ;;  %v5035_v32 = vld [vmem:[#allocation19 + $0xcc] sm:$0xf]  ;;  %v5032_v36 = vld [vmem:[#allocation19 + $0xac] sm:$0xf0] }
 0x651   : > { %v1274_v38 = vmul.f32 1.442695, %v1273_v37  ;;  %v5030_v37 = vld [vmem:[#allocation19 + $0xa4] sm:$0xf] }
 0x653   : > { %5376 = vpow2.f32 %v1274_v38  ;;  %v4388_v38 = vor.u32 %v5032_v36, %v4387_v35  ;;  %v5012_v35 = vld [vmem:[#allocation19 + $0xc] sm:$0xf0]  ;;  %v5010_v36 = vld [vmem:[#allocation19 + $0x4] sm:$0xf] }
 0x656   : > { %v1344_v39 = vpop.xlane.xlu2 %1343 }
 0x659   : > { %v5377_v40 = vpop.eup %5376 }
 0x65a   : > { %v1276_v41 = vsel %vm1139_vm5, %v5377_v40, 0.0 }
 0x65b   : > { %1277 = vadd.xlane.f32.xlu1 %v1276_v41  ;;  %v5033_v41 = vld [vmem:[#allocation19 + $0xb4] sm:$0xf0] }
 0x65e   : > { %v1348_v42 = vpop.permute.xlu2 %1347 }
 0x65f   : > { %1368 = vmatpush.msra.mxu3 %v1348_v42 }
 0x674   : > { %1374 = vrot.lane.b32.xlu1 %v1238_v28, %s5943_s12  ;;  %v4411_v28 = vld [vmem:[#allocation19 + $0xc8] sm:$0xf] }
 0x675   : > { %v4412_v31 = vor.u32 %v5037_v29, %v4411_v28  ;;  %v5017_v28 = vld [vmem:[#allocation19 + $0x34] sm:$0xf0] }
 0x677   : > { %1734 = vmatpush.bf16.msrb.mxu1 %v4412_v31  ;;  %v5015_v31 = vld [vmem:[#allocation19 + $0x2c] sm:$0xf] }
 0x6ce   : > { %v1278_v43 = vpop.xlane.xlu1 %1277 }
 0x6cf   : > { %5378 = vrcp.f32 %v1278_v43 }
 0x6d0   : > { %5380 = vrcp.f32 %v1344_v39  ;;  %v4389_v39 = vld [vmem:[#allocation19 + $0xb0] sm:$0xf0] }
 0x6d1   : > { %v4392_v42 = vor.u32 %v5030_v37, %v4389_v39  ;;  %v4309_v37 = vld [vmem:[#allocation19 + $0x10] sm:$0xf0] }
 0x6d2   : > { %v4312_v39 = vor.u32 %v5010_v36, %v4309_v37 }
 0x6d5   : > { %v5379_v44 = vpop.eup %5378 }
 0x6d6   : > { %v1280_v45 = vmul.f32 %v5379_v44, %v5377_v40  ;;  %v5381_v46 = vpop.eup %5380  ;;  %v4395_v40 = vld [vmem:[#allocation19 + $0xa8] sm:$0xf]  ;;  %v5031_v44 = vld [vmem:[#allocation19 + $0xac] sm:$0xf] }
 0x6d7   : > { %v1346_v47 = vmul.f32 %v5381_v46, %v5375_v34  ;;  %v4416_v34 = vor.u32 %v5035_v32, %v4413_v33  ;;  %v4396_v43 = vor.u32 %v5033_v41, %v4395_v40  ;;  %v4333_v32 = vld [vmem:[#allocation19 + $0x38] sm:$0xf0]  ;;  %v4307_v33 = vld [vmem:[#allocation19] sm:$0xf]  ;;  %v4315_v40 = vld [vmem:[#allocation19 + $0x8] sm:$0xf] }
 0x6d8   : > { %4269 = vmatmul.msk.f32.vlgmr.msrb.gmra.mxu3 %vm1139_vm5, %v1280_v45  ;;  %v4397_v45 = vld [vmem:[#allocation19 + $0xb8] sm:$0xf0]  ;;  %v5013_v41 = vld [vmem:[#allocation19 + $0x14] sm:$0xf0] }
 0x6d9   : > { %1707 = vmatpush.bf16.msrb.mxu3 %v4420_v9  ;;  %1747 = vmatpush.bf16.msra.mxu2 %v4416_v34  ;;  %v4400_v46 = vor.u32 %v5031_v44, %v4397_v45  ;;  %v5020_v9 = vld [vmem:[#allocation19 + $0x4c] sm:$0xf0]  ;;  %v4336_v34 = vor.u32 %v5015_v31, %v4333_v32  ;;  %v4317_v44 = vld [vmem:[#allocation19 + $0x18] sm:$0xf0]  ;;  %v5042_v32 = vld [vmem:[#allocation20] sm:$0xff] }
 0x6da   : > { %1735 = vmatpush.bf16.msrb.mxu1 %v4396_v43  ;;  %v4316_v43 = vor.u32 %v5013_v41, %v4315_v40 }
 0x6dd   : > { %1708 = vmatpush.bf16.msrb.mxu3 %v4404_v26  ;;  %1748 = vmatpush.bf16.msra.mxu2 %v4400_v46  ;;  %v4325_v26 = vld [vmem:[#allocation19 + $0x30] sm:$0xf0] }
 0x6de   : > { %v4328_v29 = vor.u32 %v5014_v24, %v4325_v26  ;;  %v5044_v24 = vld [vmem:[#allocation20 + $0x10] sm:$0xff]  ;;  %v5050_v26 = vld [vmem:[#allocation20 + $0x40] sm:$0xff] }
 0x6e0   : > { %4272 = vmatmul.msk.f32.vlgmr.msra.gmra.mxu3 %vm1139_vm5, %v1346_v47  ;;  %v4371_v47 = vld [vmem:[#allocation19 + $0x80] sm:$0xf] }
 0x6e1   : > { %1709 = vmatpush.bf16.msrb.mxu3 %v4388_v38  ;;  %v4372_v49 = vor.u32 %v5028_v22, %v4371_v47  ;;  %v4308_v38 = vor.u32 %v5012_v35, %v4307_v33  ;;  %v5057_v47 = vld [vmem:[#allocation20 + $0x78] sm:$0xff]  ;;  %v5066_v33 = vld [vmem:[#allocation20 + $0xc0] sm:$0xff] }
 0x6e2   : > { %v5065_v22 = vld [vmem:[#allocation20 + $0xb8] sm:$0xff] }
 0x6e5   : > { %1710 = vmatpush.bf16.msrb.mxu3 %v4372_v49 }
 0x6e6   : > { %v1375_v57 = vpop.permute.xlu1 %1374 }
 0x6e7   : > { %v1385_v58 = vsel %vm1111_vm4, %v6325_v7, %v1375_v57  ;;  %v5038_v7 = vld [vmem:[#allocation19 + $0xe4] sm:$0xf]  ;;  %v4384_v57 = vor.u32 %v5027_v55, %v4381_v56  ;;  %v5352_v56 = vld [vmem:[#allocation17] ss:$0 sm:$0xff] }
 0x6e8   : > { %v4424_v13 = vor.u32 %v5038_v7, %v4421_v10  ;;  %v4339_v7 = vld [vmem:[#allocation19 + $0x40] sm:$0xf]  ;;  %v5018_v10 = vld [vmem:[#allocation19 + $0x44] sm:$0xf] }
 0x6e9   : > { %1749 = vmatpush.bf16.msra.mxu2 %v4384_v57  ;;  %v4340_v11 = vor.u32 %v5020_v9, %v4339_v7  ;;  %v4344_v15 = vor.u32 %v5018_v10, %v4341_v12  ;;  %v5054_v7 = vld [vmem:[#allocation20 + $0x60] sm:$0xff]  ;;  %v5047_v10 = vld [vmem:[#allocation20 + $0x28] sm:$0xff]  ;;  %v5053_v12 = vld [vmem:[#allocation20 + $0x58] sm:$0xff] }
 0x6ea   : > { %1720 = vmatpush.bf16.msra.mxu0 %v4424_v13  ;;  %v4347_v13 = vld [vmem:[#allocation19 + $0x48] sm:$0xf]  ;;  %v5062_v9 = vld [vmem:[#allocation20 + $0xa0] sm:$0xff] }
 0x6eb   : > { %v4348_v16 = vor.u32 %v5021_v14, %v4347_v13  ;;  %v5061_v13 = vld [vmem:[#allocation20 + $0x98] sm:$0xff]  ;;  %v5046_v14 = vld [vmem:[#allocation20 + $0x20] sm:$0xff] }
 0x6ee   : > { %1721 = vmatpush.bf16.msra.mxu0 %v4408_v30  ;;  %v4332_v30 = vor.u32 %v5017_v28, %v4331_v27  ;;  %v5058_v27 = vld [vmem:[#allocation20 + $0x80] sm:$0xff]  ;;  %v5043_v28 = vld [vmem:[#allocation20 + $0x8] sm:$0xff] }
 0x6f2   : > { %1722 = vmatpush.bf16.msra.mxu0 %v4392_v42  ;;  %v5011_v42 = vld [vmem:[#allocation19 + $0xc] sm:$0xf] }
 0x6f3   : > { %v4320_v45 = vor.u32 %v5011_v42, %v4317_v44 }
 0x75b   : > { %v1304_v50 = vpop.f32.mrf.mxu3 }
 0x75c   : > { %1378 = vrot.lane.b32.xlu0 %v1304_v50, %s5944_s7  ;;  %v4373_v50 = vld [vmem:[#allocation19 + $0x90] sm:$0xf0] }
 0x75d   : > { %v4376_v53 = vor.u32 %v5026_v48, %v4373_v50 }
 0x75f   : > { %1723 = vmatpush.bf16.msra.mxu0 %v4376_v53 }
 0x763   : > { %v1370_v51 = vpop.f32.mrf.mxu3 }
 0x764   : > { %1382 = vrot.lane.b32.xlu2 %v1370_v51, %s5942_s3  ;;  %v4379_v51 = vld [vmem:[#allocation19 + $0x88] sm:$0xf] }
 0x765   : > { %v4380_v54 = vor.u32 %v5029_v52, %v4379_v51 }
 0x767   : > { %1736 = vmatpush.bf16.msrb.mxu1 %v4380_v54 }
 0x7be   : > { %v1383_v60 = vpop.permute.xlu2 %1382 }
 0x7ce   : > { %v1379_v59 = vpop.permute.xlu0 %1378 }
 0x7cf   : > { %v1387_v61 = vsel %vm1386_vm6, %v1385_v58, %v1379_v59  ;;  %v4355_v58 = vld [vmem:[#allocation19 + $0x60] sm:$0xf]  ;;  %v5024_v59 = vld [vmem:[#allocation19 + $0x6c] sm:$0xf0] }
 0x7d0   : > { %v1389_v62 = vsel %vm1388_vm7, %v1387_v61, %v1383_v60  ;;  %v5022_v60 = vld [vmem:[#allocation19 + $0x64] sm:$0xf]  ;;  %v4356_v61 = vor.u32 %v5024_v59, %v4355_v58  ;;  %v5353_v59 = vld [vmem:[%s7061_s9] ss:$0 sm:$0xff] }
 0x7d1   : > { %v1390_v63 = vpack.c.bf16 %v1389_v62, %v1389_v62  ;;  %v4357_v62 = vld [vmem:[#allocation19 + $0x70] sm:$0xf0] }
 0x7d2   : > { %1711 = vmatpush.bf16.msrb.mxu3 %v4356_v61 }
 0x7d3   : > { %1463 = vmatmul.bf16.vlgmr.msrb.gmra.mxu2 %v1390_v63  ;;  %v4363_v63 = vld [vmem:[#allocation19 + $0x68] sm:$0xf] }
 0x7d6   : > { %1712 = vmatpush.bf16.msrb.mxu3 %v4340_v11  ;;  %v5071_v11 = vld [vmem:[#allocation20 + $0xe8] sm:$0xff] }
 0x856   : > { %v1464_v1 = vpop.f32.mrf.mxu2 }
 0x857   : > { %v1468_v2 = vadd.f32 %v1464_v1, %v6294_v3  ;;  %v4360_v1 = vor.u32 %v5022_v60, %v4357_v62 }
 0x859   : > { %v6376_v4 = vadd.f32 %v5351_v0, %v1468_v2  ;;  %v5025_v0 = vld [vmem:[#allocation19 + $0x74] sm:$0xf0]  ;;  %1724 = vmatpush.bf16.msra.mxu0 %v4360_v1 }
 0x85a   : > { %v4364_v2 = vor.u32 %v5025_v0, %v4363_v63  ;;  %v5056_v63 = vld [vmem:[#allocation20 + $0x70] sm:$0xff]  ;;  %v5049_v1 = vld [vmem:[#allocation20 + $0x38] sm:$0xff] }
 0x85b   : > { %1476 = vadd.xlane.f32.xlu0 %v6376_v4  ;;  %v5064_v0 = vld [vmem:[#allocation20 + $0xb0] sm:$0xff] }
 0x85c   : > { %1737 = vmatpush.bf16.msrb.mxu1 %v4364_v2  ;;  %v5073_v2 = vld [vmem:[#allocation20 + $0xf8] sm:$0xff] }
 0x85d   : > { %1725 = vmatpush.bf16.msra.mxu0 %v4344_v15  ;;  %v5070_v15 = vld [vmem:[#allocation20 + $0xe0] sm:$0xff] }
 0x85e   : > { %v1466_v5 = vpop.f32.mrf.mxu2 }
 0x85f   : > { %v5023_v5 = vld [vmem:[#allocation19 + $0x6c] sm:$0xf] }
 0x860   : > { %v4368_v8 = vor.u32 %v5023_v5, %v4365_v6  ;;  %1738 = vmatpush.bf16.msrb.mxu1 %v4348_v16  ;;  %v5063_v5 = vld [vmem:[#allocation20 + $0xa8] sm:$0xff]  ;;  %v5048_v6 = vld [vmem:[#allocation20 + $0x30] sm:$0xff] }
 0x861   : > { %1726 = vmatpush.bf16.msra.mxu0 %v4328_v29  ;;  %v5052_v16 = vld [vmem:[#allocation20 + $0x50] sm:$0xff]  ;;  %v5067_v29 = vld [vmem:[#allocation20 + $0xc8] sm:$0xff] }
 0x862   : > { %1750 = vmatpush.bf16.msra.mxu2 %v4368_v8  ;;  %v5072_v8 = vld [vmem:[#allocation20 + $0xf0] sm:$0xff] }
 0x864   : > { %1739 = vmatpush.bf16.msrb.mxu1 %v4332_v30  ;;  %v1537_v30 = vld [vmem:[%s7062_s28] sm:$0xf] }
 0x865   : > { %1727 = vmatpush.bf16.msra.mxu0 %v4312_v39  ;;  %v1540_v31 = vperm.slane %v1537_v30, 1  ;;  %v1539_v40 = vperm.slane %v1537_v30, 0  ;;  %v1542_v42 = vperm.slane %v1537_v30, 3 }
 0x868   : > { %1740 = vmatpush.bf16.msrb.mxu1 %v4316_v43 }
 0x869   : > { %2068 = vmatpush.bf16.msrb.mxu0 %v5057_v47 }
 0x86c   : > { %2081 = vmatpush.bf16.msra.mxu1 %v5065_v22 }
 0x86d   : > { %2069 = vmatpush.bf16.msrb.mxu0 %v5056_v63 }
 0x870   : > { %2082 = vmatpush.bf16.msra.mxu1 %v5064_v0 }
 0x874   : > { %2083 = vmatpush.bf16.msra.mxu1 %v5063_v5 }
 0x878   : > { %2084 = vmatpush.bf16.msra.mxu1 %v5062_v9 }
 0x87c   : > { %2085 = vmatpush.bf16.msra.mxu1 %v5061_v13 }
 0x8ce   : > { %v1477_v3 = vpop.xlane.xlu0 %1476 }
 0x8cf   : > { %v1478_v18 = vmul.f32 %v1477_v3, %v6297_v19  ;;  %v4349_v3 = vld [vmem:[#allocation19 + $0x58] sm:$0xf0] }
 0x8d1   : > { %v6381_v20 = vsub.f32 %v6376_v4, %v1478_v18  ;;  %v4352_v18 = vor.u32 %v5019_v17, %v4349_v3  ;;  %v5060_v17 = vld [vmem:[#allocation20 + $0x90] sm:$0xff]  ;;  %v5045_v3 = vld [vmem:[#allocation20 + $0x18] sm:$0xff] }
 0x8d2   : > { %2086 = vmatpush.bf16.msra.mxu1 %v5060_v17 }
 0x8d3   : > { %v1480_v21 = vmul.f32 %v6381_v20, %v6381_v20  ;;  %1751 = vmatpush.bf16.msra.mxu2 %v4352_v18  ;;  %v5069_v18 = vld [vmem:[#allocation20 + $0xd8] sm:$0xff] }
 0x8d5   : > { %1481 = vadd.xlane.f32.xlu1 %v1480_v21  ;;  %v4323_v21 = vld [vmem:[#allocation19 + $0x20] sm:$0xf] }
 0x8d6   : > { %v4324_v25 = vor.u32 %v5016_v23, %v4323_v21  ;;  %v5051_v21 = vld [vmem:[#allocation20 + $0x48] sm:$0xff] }
 0x8d7   : > { %1752 = vmatpush.bf16.msra.mxu2 %v4336_v34  ;;  %v5059_v23 = vld [vmem:[#allocation20 + $0x88] sm:$0xff]  ;;  %v1541_v34 = vperm.slane %v1537_v30, 2 }
 0x8d8   : > { %1713 = vmatpush.bf16.msrb.mxu3 %v4324_v25  ;;  %v5068_v25 = vld [vmem:[#allocation20 + $0xd0] sm:$0xff]  ;;  %2087 = vmatpush.bf16.msra.mxu1 %v5059_v23 }
 0x8db   : > { %1753 = vmatpush.bf16.msra.mxu2 %v4320_v45 }
 0x8dc   : > { %1714 = vmatpush.bf16.msrb.mxu3 %v4308_v38  ;;  %2088 = vmatpush.bf16.msra.mxu1 %v5058_v27 }
 0x8df   : > { %2094 = vmatpush.bf16.msrb.mxu2 %v5073_v2 }
 0x8e0   : > { %2055 = vmatpush.bf16.msra.mxu3 %v5049_v1 }
 0x8e3   : > { %2095 = vmatpush.bf16.msrb.mxu2 %v5072_v8 }
 0x8e4   : > { %2056 = vmatpush.bf16.msra.mxu3 %v5048_v6 }
 0x8e7   : > { %2096 = vmatpush.bf16.msrb.mxu2 %v5071_v11 }
 0x8e8   : > { %2057 = vmatpush.bf16.msra.mxu3 %v5047_v10 }
 0x8eb   : > { %2097 = vmatpush.bf16.msrb.mxu2 %v5070_v15 }
 0x8ec   : > { %2058 = vmatpush.bf16.msra.mxu3 %v5046_v14 }
 0x8ef   : > { %2098 = vmatpush.bf16.msrb.mxu2 %v5069_v18 }
 0x8f0   : > { %2059 = vmatpush.bf16.msra.mxu3 %v5045_v3 }
 0x8f3   : > { %2099 = vmatpush.bf16.msrb.mxu2 %v5068_v25 }
 0x8f4   : > { %2060 = vmatpush.bf16.msra.mxu3 %v5044_v24 }
 0x8f7   : > { %2100 = vmatpush.bf16.msrb.mxu2 %v5067_v29 }
 0x8f8   : > { %2061 = vmatpush.bf16.msra.mxu3 %v5043_v28 }
 0x8fb   : > { %2101 = vmatpush.bf16.msrb.mxu2 %v5066_v33 }
 0x8fc   : > { %2062 = vmatpush.bf16.msra.mxu3 %v5042_v32 }
 0x948   : > { %v1482_v46 = vpop.xlane.xlu1 %1481 }
 0x949   : > { %v1483_v48 = vmul.f32 %v1482_v46, %v6297_v19 }
 0x94b   : > { %v1484_v49 = vadd.f32 1e-05, %v1483_v48 }
 0x94d   : > { %5382 = vrsqrt.f32 %v1484_v49  ;;  %vm1491_vm9 = vweird.f32 %v1484_v49 }
 0x953   : > { %v5383_v50 = vpop.eup %5382 }
 0x954   : > { %v1486_v51 = vmul.f32 %v5383_v50, %v1484_v49  ;;  %vm1492_vm8 = vweird.f32 %v5383_v50 }
 0x955   : > { %vm1493_vm10 = vmor %vm1491_vm9, %vm1492_vm8 }
 0x956   : > { %v1487_v52 = vmul.f32 %v5383_v50, %v1486_v51 }
 0x958   : > { %v1488_v53 = vmul.f32 0.5, %v1487_v52 }
 0x95a   : > { %v1489_v54 = vsub.f32 1.5, %v1488_v53 }
 0x95c   : > { %v1490_v55 = vmul.f32 %v5383_v50, %v1489_v54 }
 0x95e   : > { %v1494_v57 = vsel %vm1493_vm10, %v5383_v50, %v1490_v55 }
 0x95f   : > { %v1495_v58 = vmul.f32 %v1494_v57, %v6381_v20  ;;  %v5055_v20 = vld [vmem:[#allocation20 + $0x68] sm:$0xff] }
 0x960   : > { %2070 = vmatpush.bf16.msrb.mxu0 %v5055_v20 }
 0x961   : > { %v1499_v60 = vmul.f32 %v5352_v56, %v1495_v58 }
 0x963   : > { %v1503_v61 = vadd.f32 %v5353_v59, %v1499_v60 }
 0x964   : > { %2071 = vmatpush.bf16.msrb.mxu0 %v5054_v7 }
 0x965   : > { %v1504_v62 = vpack.c.bf16 %v1503_v61, %v1503_v61 }
 0x967   : > { %1715 = vmatmul.bf16.vlgmr.msrb.gmra.mxu3 %v1504_v62  ;;  %1728 = vmatmul.bf16.vlgmr.msra.gmra.mxu0 %v1504_v62 }
 0x968   : > { %1741 = vmatmul.bf16.vlgmr.msrb.gmra.mxu1 %v1504_v62  ;;  %1754 = vmatmul.bf16.vlgmr.msra.gmra.mxu2 %v1504_v62 }
 0x969   : > { %2072 = vmatpush.bf16.msrb.mxu0 %v5053_v12 }
 0x96d   : > { %2073 = vmatpush.bf16.msrb.mxu0 %v5052_v16 }
 0x971   : > { %2074 = vmatpush.bf16.msrb.mxu0 %v5051_v21 }
 0x975   : > { %2075 = vmatpush.bf16.msrb.mxu0 %v5050_v26 }
 0x9e4   : > { %v1729_v35 = vpop.f32.mrf.mxu0 }
 0x9e5   : > { %v1730_v36 = vadd.f32 %v1729_v35, %v1540_v31  ;;  %v1742_v37 = vpop.f32.mrf.mxu1 }
 0x9e6   : > { %v1743_v38 = vadd.f32 %v1742_v37, %v1541_v34 }
 0x9e7   : > { %v1760_v39 = vmul.f32 %v1730_v36, %v1730_v36 }
 0x9e8   : > { %v1761_v41 = vmul.f32 %v1743_v38, %v1743_v38 }
 0x9e9   : > { %v1764_v43 = vmul.f32 %v1760_v39, %v1730_v36 }
 0x9ea   : > { %v1765_v44 = vmul.f32 %v1761_v41, %v1743_v38  ;;  %v1716_v45 = vpop.f32.mrf.mxu3  ;;  %v4647_v41 = vld [vmem:[#allocation13 + $0x168] sm:$0xf] }
 0x9eb   : > { %v1768_v46 = vmul.f32 0.044715, %v1764_v43  ;;  %v1717_v47 = vadd.f32 %v1716_v45, %v1539_v40  ;;  %v1755_v22 = vpop.f32.mrf.mxu2  ;;  %v5095_v43 = vld [vmem:[#allocation13 + $0x16c] sm:$0xf]  ;;  %v4649_v45 = vld [vmem:[#allocation13 + $0x174] sm:$0xf0] }
 0x9ec   : > { %v1769_v48 = vmul.f32 0.044715, %v1765_v44  ;;  %v1756_v49 = vadd.f32 %v1755_v22, %v1542_v42  ;;  %v1731_v50 = vpop.f32.mrf.mxu0  ;;  %v5096_v42 = vld [vmem:[#allocation13 + $0x170] sm:$0xf0]  ;;  %v4652_v22 = vor.u32 %v5095_v43, %v4649_v45  ;;  %v5079_v43 = vld [vmem:[#allocation13 + $0xe8] sm:$0xf0] }
 0x9ed   : > { %v1772_v51 = vadd.f32 %v1768_v46, %v1730_v36  ;;  %v1759_v52 = vmul.f32 %v1717_v47, %v1717_v47  ;;  %v1744_v53 = vpop.f32.mrf.mxu1  ;;  %v4648_v44 = vor.u32 %v5096_v42, %v4647_v41  ;;  %v4655_v46 = vld [vmem:[#allocation13 + $0x170] sm:$0xf]  ;;  %v4577_v41 = vld [vmem:[#allocation13 + $0xe4] sm:$0xf0]  ;;  %v4583_v42 = vld [vmem:[#allocation13 + $0xe0] sm:$0xf] }
 0x9ee   : > { %v1773_v54 = vadd.f32 %v1769_v48, %v1743_v38  ;;  %v1762_v55 = vmul.f32 %v1756_v49, %v1756_v49  ;;  %2329 = vmatpush.bf16.msra.mxu0 %v4652_v22  ;;  %v5093_v53 = vld [vmem:[#allocation13 + $0x158] sm:$0xf0]  ;;  %v4584_v45 = vor.u32 %v5079_v43, %v4583_v42  ;;  %v5074_v22 = vld [vmem:[#allocation13 + $0xc4] sm:$0xf] }
 0x9ef   : > { %v1776_v56 = vmul.f32 0.7978846, %v1772_v51  ;;  %v1763_v57 = vmul.f32 %v1759_v52, %v1717_v47  ;;  %2316 = vmatpush.bf16.msrb.mxu3 %v4648_v44  ;;  %v4635_v52 = vld [vmem:[#allocation13 + $0x150] sm:$0xf] }
 0x9f0   : > { %v1777_v58 = vmul.f32 0.7978846, %v1773_v54  ;;  %v1766_v59 = vmul.f32 %v1762_v55, %v1756_v49  ;;  %v5092_v54 = vld [vmem:[#allocation13 + $0x154] sm:$0xf]  ;;  %v4636_v55 = vor.u32 %v5093_v53, %v4635_v52 }
 0x9f1   : > { %5384 = vtanh.f32 %v1776_v56  ;;  %v1767_v60 = vmul.f32 0.044715, %v1763_v57  ;;  %v4637_v56 = vld [vmem:[#allocation13 + $0x15c] sm:$0xf0]  ;;  %v4643_v57 = vld [vmem:[#allocation13 + $0x158] sm:$0xf] }
 0x9f2   : > { %5386 = vtanh.f32 %v1777_v58  ;;  %v1770_v61 = vmul.f32 0.044715, %v1766_v59  ;;  %v1718_v62 = vpop.f32.mrf.mxu3  ;;  %v5094_v58 = vld [vmem:[#allocation13 + $0x160] sm:$0xf0]  ;;  %v4640_v59 = vor.u32 %v5092_v54, %v4637_v56 }
 0x9f3   : > { %v1771_v63 = vadd.f32 %v1767_v60, %v1717_v47  ;;  %v1757_v0 = vpop.f32.mrf.mxu2  ;;  %v4644_v60 = vor.u32 %v5094_v58, %v4643_v57  ;;  %2317 = vmatpush.bf16.msrb.mxu3 %v4636_v55  ;;  %v5090_v62 = vld [vmem:[#allocation13 + $0x140] sm:$0xf0] }
 0x9f4   : > { %v1774_v1 = vadd.f32 %v1770_v61, %v1756_v49  ;;  %2330 = vmatpush.bf16.msra.mxu0 %v4640_v59  ;;  %v4623_v61 = vld [vmem:[#allocation13 + $0x138] sm:$0xf] }
 0x9f5   : > { %v1775_v2 = vmul.f32 0.7978846, %v1771_v63  ;;  %v5089_v63 = vld [vmem:[#allocation13 + $0x13c] sm:$0xf]  ;;  %v4624_v0 = vor.u32 %v5090_v62, %v4623_v61 }
 0x9f6   : > { %v1778_v20 = vmul.f32 0.7978846, %v1774_v1  ;;  %v4625_v1 = vld [vmem:[#allocation13 + $0x144] sm:$0xf0] }
 0x9f7   : > { %v5385_v5 = vpop.eup %5384  ;;  %5388 = vtanh.f32 %v1775_v2  ;;  %v4631_v2 = vld [vmem:[#allocation13 + $0x140] sm:$0xf]  ;;  %2318 = vmatpush.bf16.msrb.mxu3 %v4624_v0 }
 0x9f8   : > { %v5387_v6 = vpop.eup %5386  ;;  %5390 = vtanh.f32 %v1778_v20  ;;  %v1784_v8 = vadd.f32 1.0, %v5385_v5  ;;  %v5091_v20 = vld [vmem:[#allocation13 + $0x148] sm:$0xf0]  ;;  %v4628_v5 = vor.u32 %v5089_v63, %v4625_v1  ;;  %v5355_v63 = vld [vmem:[#allocation10 + $0x1] ss:$0 sm:$0xff] }
 0x9f9   : > { %v1785_v7 = vadd.f32 1.0, %v5387_v6  ;;  %v4632_v6 = vor.u32 %v5091_v20, %v4631_v2  ;;  %v5356_v2 = vld [vmem:[#allocation11 + $0x1] ss:$0 sm:$0xff] }
 0x9fa   : > { %v1788_v9 = vmul.f32 0.5, %v1784_v8  ;;  %2331 = vmatpush.bf16.msra.mxu0 %v4628_v5  ;;  %v4611_v8 = vld [vmem:[#allocation13 + $0x120] sm:$0xf] }
 0x9fb   : > { %v1789_v10 = vmul.f32 0.5, %v1785_v7  ;;  %v5087_v7 = vld [vmem:[#allocation13 + $0x128] sm:$0xf0] }
 0x9fc   : > { %v1792_v11 = vmul.f32 %v1788_v9, %v1730_v36  ;;  %v5354_v36 = vld [vmem:[%s7063_s2] ss:$0 sm:$0xff]  ;;  %v5086_v9 = vld [vmem:[#allocation13 + $0x124] sm:$0xf] }
 0x9fd   : > { %v5389_v12 = vpop.eup %5388  ;;  %v1793_v13 = vmul.f32 %v1789_v10, %v1743_v38  ;;  %v4612_v10 = vor.u32 %v5087_v7, %v4611_v8  ;;  %v2180_v8 = vld [vmem:[#allocation14 + $0x3] sm:$0x7] }
 0x9fe   : > { %v5391_v14 = vpop.eup %5390  ;;  %v1796_v15 = vpack.c.bf16 %v1792_v11, %v1792_v11  ;;  %v1783_v16 = vadd.f32 1.0, %v5389_v12  ;;  %v4613_v11 = vld [vmem:[#allocation13 + $0x12c] sm:$0xf0]  ;;  %v4619_v12 = vld [vmem:[#allocation13 + $0x128] sm:$0xf]  ;;  %v2183_v7 = vperm.slane %v2180_v8, 1 }
 0x9ff   : > { %v1797_v17 = vpack.c.bf16 %v1793_v13, %v1793_v13  ;;  %v1786_v3 = vadd.f32 1.0, %v5391_v14  ;;  %v5088_v13 = vld [vmem:[#allocation13 + $0x130] sm:$0xf0]  ;;  %v4616_v14 = vor.u32 %v5086_v9, %v4613_v11  ;;  %2319 = vmatpush.bf16.msrb.mxu3 %v4612_v10  ;;  %v2184_v9 = vperm.slane %v2180_v8, 2 }
 0xa00   : > { %2076 = vmatmul.bf16.vlgmr.msrb.gmra.mxu0 %v1796_v15  ;;  %v1787_v18 = vmul.f32 0.5, %v1783_v16  ;;  %v4620_v15 = vor.u32 %v5088_v13, %v4619_v12  ;;  %v4599_v16 = vld [vmem:[#allocation13 + $0x108] sm:$0xf] }
 0xa01   : > { %2089 = vmatmul.bf16.vlgmr.msra.gmra.mxu1 %v1797_v17  ;;  %v1790_v21 = vmul.f32 0.5, %v1786_v3  ;;  %2332 = vmatpush.bf16.msra.mxu0 %v4616_v14  ;;  %v5084_v17 = vld [vmem:[#allocation13 + $0x110] sm:$0xf0]  ;;  %v5083_v3 = vld [vmem:[#allocation13 + $0x10c] sm:$0xf] }
 0xa02   : > { %v1791_v23 = vmul.f32 %v1787_v18, %v1717_v47  ;;  %v5097_v47 = vld [vmem:[#allocation13 + $0x178] sm:$0xf0]  ;;  %v4600_v18 = vor.u32 %v5084_v17, %v4599_v16 }
 0xa03   : > { %v1794_v24 = vmul.f32 %v1790_v21, %v1756_v49  ;;  %v4656_v48 = vor.u32 %v5097_v47, %v4655_v46  ;;  %v4601_v21 = vld [vmem:[#allocation13 + $0x114] sm:$0xf0]  ;;  %v4563_v46 = vld [vmem:[#allocation13 + $0xc0] sm:$0xf]  ;;  %v5075_v47 = vld [vmem:[#allocation13 + $0xc8] sm:$0xf0] }
 0xa04   : > { %v1795_v25 = vpack.c.bf16 %v1791_v23, %v1791_v23  ;;  %v4607_v23 = vld [vmem:[#allocation13 + $0x110] sm:$0xf]  ;;  %2320 = vmatpush.bf16.msrb.mxu3 %v4600_v18 }
 0xa05   : > { %v1798_v26 = vpack.c.bf16 %v1794_v24, %v1794_v24  ;;  %2342 = vmatpush.bf16.msrb.mxu1 %v4656_v48  ;;  %v5085_v24 = vld [vmem:[#allocation13 + $0x118] sm:$0xf0]  ;;  %v4564_v48 = vor.u32 %v5075_v47, %v4563_v46 }
 0xa06   : > { %2063 = vmatmul.bf16.vlgmr.msra.gmra.mxu3 %v1795_v25  ;;  %v4604_v25 = vor.u32 %v5083_v3, %v4601_v21 }
 0xa07   : > { %2102 = vmatmul.bf16.vlgmr.msrb.gmra.mxu2 %v1798_v26  ;;  %v4608_v26 = vor.u32 %v5085_v24, %v4607_v23 }
 0xa08   : > { %2333 = vmatpush.bf16.msra.mxu0 %v4604_v25 }
 0xa09   : > { %2343 = vmatpush.bf16.msrb.mxu1 %v4644_v60 }
 0xa0d   : > { %2344 = vmatpush.bf16.msrb.mxu1 %v4632_v6 }
 0xa11   : > { %2345 = vmatpush.bf16.msrb.mxu1 %v4620_v15 }
 0xa15   : > { %2346 = vmatpush.bf16.msrb.mxu1 %v4608_v26 }
 0xa7d   : > { %v2077_v27 = vpop.f32.mrf.mxu0 }
 0xa7e   : > { %v2090_v28 = vpop.f32.mrf.mxu1 }
 0xa85   : > { %v2079_v29 = vpop.f32.mrf.mxu0 }
 0xa86   : > { %v2092_v30 = vpop.f32.mrf.mxu1  ;;  %v5080_v29 = vld [vmem:[#allocation13 + $0xf4] sm:$0xf] }
 0xa89   : > { %v2064_v31 = vpop.f32.mrf.mxu3 }
 0xa8a   : > { %v2078_v32 = vadd.f32 %v2077_v27, %v2064_v31  ;;  %v2103_v33 = vpop.f32.mrf.mxu2  ;;  %v4587_v27 = vld [vmem:[#allocation13 + $0xf0] sm:$0xf]  ;;  %v4589_v31 = vld [vmem:[#allocation13 + $0xfc] sm:$0xf0] }
 0xa8c   : > { %v2091_v34 = vadd.f32 %v2090_v28, %v2078_v32  ;;  %v5081_v28 = vld [vmem:[#allocation13 + $0xf8] sm:$0xf0]  ;;  %v4595_v32 = vld [vmem:[#allocation13 + $0xf8] sm:$0xf] }
 0xa8d   : > { %v4588_v30 = vor.u32 %v5081_v28, %v4587_v27 }
 0xa8e   : > { %v2104_v35 = vadd.f32 %v2103_v33, %v2091_v34  ;;  %v5082_v33 = vld [vmem:[#allocation13 + $0x100] sm:$0xf0]  ;;  %v4592_v34 = vor.u32 %v5080_v29, %v4589_v31 }
 0xa8f   : > { %2321 = vmatpush.bf16.msrb.mxu3 %v4588_v30 }
 0xa90   : > { %v2107_v37 = vadd.f32 %v2104_v35, %v6376_v4  ;;  %v4596_v35 = vor.u32 %v5082_v33, %v4595_v32  ;;  %2334 = vmatpush.bf16.msra.mxu0 %v4592_v34 }
 0xa91   : > { %v2066_v38 = vpop.f32.mrf.mxu3 }
 0xa92   : > { %v2105_v39 = vpop.f32.mrf.mxu2  ;;  %v6397_v40 = vadd.f32 %v5354_v36, %v2107_v37  ;;  %2347 = vmatpush.bf16.msrb.mxu1 %v4596_v35  ;;  %v4575_v36 = vld [vmem:[#allocation13 + $0xd8] sm:$0xf]  ;;  %v5078_v37 = vld [vmem:[#allocation13 + $0xe0] sm:$0xf0]  ;;  %v5077_v38 = vld [vmem:[#allocation13 + $0xdc] sm:$0xf] }
 0xa93   : > { %v4576_v39 = vor.u32 %v5078_v37, %v4575_v36  ;;  %v4580_v44 = vor.u32 %v5077_v38, %v4577_v41 }
 0xa94   : > { %2117 = vadd.xlane.f32.xlu2 %v6397_v40 }
 0xa95   : > { %2322 = vmatpush.bf16.msrb.mxu3 %v4576_v39  ;;  %2335 = vmatpush.bf16.msra.mxu0 %v4580_v44 }
 0xa96   : > { %2348 = vmatpush.bf16.msrb.mxu1 %v4584_v45 }
 0xa99   : > { %2323 = vmatpush.bf16.msrb.mxu3 %v4564_v48 }
 0xb07   : > { %v2118_v49 = vpop.xlane.xlu2 %2117 }
 0xb08   : > { %v2119_v4 = vmul.f32 %v2118_v49, %v6297_v19  ;;  %v4565_v49 = vld [vmem:[#allocation13 + $0xcc] sm:$0xf0] }
 0xb09   : > { %v4568_v52 = vor.u32 %v5074_v22, %v4565_v49 }
 0xb0a   : > { %v6402_v50 = vsub.f32 %v6397_v40, %v2119_v4  ;;  %v4571_v4 = vld [vmem:[#allocation13 + $0xc8] sm:$0xf] }
 0xb0b   : > { %2336 = vmatpush.bf16.msra.mxu0 %v4568_v52 }
 0xb0c   : > { %v2121_v51 = vmul.f32 %v6402_v50, %v6402_v50 }
 0xb0e   : > { %2122 = vadd.xlane.f32.xlu0 %v2121_v51  ;;  %v5076_v51 = vld [vmem:[#allocation13 + $0xd0] sm:$0xf0] }
 0xb0f   : > { %v4572_v53 = vor.u32 %v5076_v51, %v4571_v4 }
 0xb11   : > { %2349 = vmatpush.bf16.msrb.mxu1 %v4572_v53 }
 0xb81   : > { %v2123_v54 = vpop.xlane.xlu0 %2122 }
 0xb82   : > { %v2124_v55 = vmul.f32 %v2123_v54, %v6297_v19 }
 0xb84   : > { %v2125_v56 = vadd.f32 1e-05, %v2124_v55 }
 0xb86   : > { %5392 = vrsqrt.f32 %v2125_v56  ;;  %vm2132_vm12 = vweird.f32 %v2125_v56 }
 0xb8c   : > { %v5393_v57 = vpop.eup %5392 }
 0xb8d   : > { %v2127_v58 = vmul.f32 %v5393_v57, %v2125_v56  ;;  %vm2133_vm11 = vweird.f32 %v5393_v57 }
 0xb8e   : > { %vm2134_vm13 = vmor %vm2132_vm12, %vm2133_vm11 }
 0xb8f   : > { %v2128_v59 = vmul.f32 %v5393_v57, %v2127_v58 }
 0xb91   : > { %v2129_v60 = vmul.f32 0.5, %v2128_v59 }
 0xb93   : > { %v2130_v61 = vsub.f32 1.5, %v2129_v60 }
 0xb95   : > { %v2131_v62 = vmul.f32 %v5393_v57, %v2130_v61 }
 0xb97   : > { %v2135_v0 = vsel %vm2134_vm13, %v5393_v57, %v2131_v62 }
 0xb98   : > { %v2136_v1 = vmul.f32 %v2135_v0, %v6402_v50  ;;  %v2182_v50 = vperm.slane %v2180_v8, 0 }
 0xb9a   : > { %v2140_v20 = vmul.f32 %v5355_v63, %v2136_v1 }
 0xb9c   : > { %v2144_v5 = vadd.f32 %v5356_v2, %v2140_v20 }
 0xb9e   : > { %v2145_v6 = vpack.c.bf16 %v2144_v5, %v2144_v5 }
 0xba0   : > { %2324 = vmatmul.bf16.vlgmr.msrb.gmra.mxu3 %v2145_v6  ;;  %2337 = vmatmul.bf16.vlgmr.msra.gmra.mxu0 %v2145_v6 }
 0xba1   : > { %2350 = vmatmul.bf16.vlgmr.msrb.gmra.mxu1 %v2145_v6 }
 0xc1d   : > { %v2338_v10 = vpop.f32.mrf.mxu0 }
 0xc1e   : > { %v2339_v11 = vadd.f32 %v2338_v10, %v2183_v7  ;;  %v2351_v12 = vpop.f32.mrf.mxu1 }
 0xc1f   : > { %v6408_v13 = vadd.f32 %v2351_v12, %v2184_v9 }
 0xc20   : > { %2485 = vrot.lane.b32.xlu0 %v2339_v11, %s5944_s7  ;;  %2418 = vrot.lane.b32.xlu1 %v2339_v11, %s5942_s3 }
 0xc21   : > { %2411 = vmatpush.msra.mxu2 %v6408_v13  ;;  %4657 = vmatpush.xpose.msk.msrb.mxu0 %vm1111_vm4, %v2339_v11 }
 0xc23   : > { %v2325_v14 = vpop.f32.mrf.mxu3 }
 0xc24   : > { %v2326_v15 = vadd.f32 %v2325_v14, %v2182_v50  ;;  %v5105_v14 = vld [vmem:[%s7060_s0 + $0x78] sm:$0xff] }
 0xc25   : > { %v2340_v16 = vpop.f32.mrf.mxu0 }
 0xc26   : > { %v2353_v17 = vpop.f32.mrf.mxu1  ;;  %2416 = vrot.lane.b32.xlu2 %v2326_v15, %s5942_s3  ;;  %4658 = vmatmul.msk.f32.vlgmr.msrb.gmra.mxu0 %vm1111_vm4, %v2326_v15  ;;  %v5103_v16 = vld [vmem:[%s7060_s0 + $0x68] sm:$0xff] }
 0xc27   : > { %v5102_v17 = vld [vmem:[%s7060_s0 + $0x60] sm:$0xff] }
 0xc28   : > { %2551 = vrot.lane.b32.xlu1 %v2339_v11, %s5943_s12  ;;  %2483 = vrot.lane.b32.xlu0 %v2326_v15, %s5944_s7 }
 0xc2b   : > { %v2327_v3 = vpop.f32.mrf.mxu3 }
 0xc2c   : > { %v5101_v3 = vld [vmem:[%s7060_s0 + $0x58] sm:$0xff] }
 0xc2e   : > { %2549 = vrot.lane.b32.xlu2 %v2326_v15, %s5943_s12  ;;  %v5104_v15 = vld [vmem:[%s7060_s0 + $0x70] sm:$0xff] }
 0xc80   : > { %v2417_v23 = vpop.permute.xlu2 %2416 }
 0xc88   : > { %v2550_v26 = vpop.permute.xlu2 %2549 }
 0xc92   : > { %v2486_v18 = vpop.permute.xlu0 %2485  ;;  %v2419_v21 = vpop.permute.xlu1 %2418 }
 0xc93   : > { %4660 = vmatpush.xpose.msk.msra.mxu3 %vm1111_vm4, %v2419_v21  ;;  %4663 = vmatpush.xpose.msk.msra.mxu1 %vm1111_vm4, %v2486_v18  ;;  %v5100_v18 = vld [vmem:[%s7060_s0 + $0x50] sm:$0xff]  ;;  %v5099_v21 = vld [vmem:[%s7060_s0 + $0x48] sm:$0xff] }
 0xc96   : > { %4661 = vmatmul.msk.f32.vlgmr.msra.gmra.mxu3 %vm1111_vm4, %v2417_v23  ;;  %v5098_v23 = vld [vmem:[%s7060_s0 + $0x40] sm:$0xff] }
 0xc97   : > { %2696 = vmatpush.bf16.msrb.mxu1 %v5105_v14 }
 0xc9a   : > { %v2552_v24 = vpop.permute.xlu1 %2551  ;;  %v2484_v25 = vpop.permute.xlu0 %2483 }
 0xc9b   : > { %4664 = vmatmul.msk.f32.vlgmr.msra.gmra.mxu1 %vm1111_vm4, %v2484_v25  ;;  %4666 = vmatpush.xpose.msk.msrb.mxu3 %vm1111_vm4, %v2552_v24 }
 0xc9c   : > { %2697 = vmatpush.bf16.msrb.mxu1 %v5104_v15  ;;  %v4787_v15 = vld [vmem:[#allocation19 + $0x190] sm:$0xf0] }
 0xc9e   : > { %4667 = vmatmul.msk.f32.vlgmr.msrb.gmra.mxu3 %vm1111_vm4, %v2550_v26 }
 0xca0   : > { %2698 = vmatpush.bf16.msrb.mxu1 %v5103_v16  ;;  %v4793_v16 = vld [vmem:[#allocation19 + $0x188] sm:$0xf] }
 0xca3   : > { %v2378_v27 = vpop.f32.mrf.mxu0 }
 0xca4   : > { %v2381_v28 = vmul.f32 0.17677669, %v2378_v27  ;;  %2699 = vmatpush.bf16.msrb.mxu1 %v5102_v17  ;;  %v5125_v17 = vld [vmem:[#allocation19 + $0x194] sm:$0xf0] }
 0xca6   : > { %v2382_v29 = vsel %vm1139_vm5, %v2381_v28, -inf }
 0xca7   : > { %2383 = vmax.xlane.f32.xlu1 %v2382_v29 }
 0xca8   : > { %2700 = vmatpush.bf16.msrb.mxu1 %v5101_v3 }
 0xcac   : > { %2701 = vmatpush.bf16.msrb.mxu1 %v5100_v18  ;;  %v4794_v18 = vor.u32 %v5125_v17, %v4793_v16 }
 0xcb0   : > { %2702 = vmatpush.bf16.msrb.mxu1 %v5099_v21  ;;  %v5123_v21 = vld [vmem:[#allocation19 + $0x18c] sm:$0xf] }
 0xcb4   : > { %2703 = vmatpush.bf16.msrb.mxu1 %v5098_v23  ;;  %v4795_v23 = vld [vmem:[#allocation19 + $0x198] sm:$0xf0] }
 0xd18   : > { %v2508_v30 = vpop.f32.mrf.mxu1 }
 0xd19   : > { %v2511_v31 = vmul.f32 0.17677669, %v2508_v30  ;;  %v2441_v32 = vpop.f32.mrf.mxu3 }
 0xd1a   : > { %v2444_v33 = vmul.f32 0.17677669, %v2441_v32  ;;  %v2384_v34 = vpop.xlane.xlu1 %2383 }
 0xd1b   : > { %v2385_v35 = vsub.f32 %v2381_v28, %v2384_v34  ;;  %v2512_v36 = vsel %vm1139_vm5, %v2511_v31, -inf }
 0xd1c   : > { %2513 = vmax.xlane.f32.xlu2 %v2512_v36  ;;  %v2445_v37 = vsel %vm1139_vm5, %v2444_v33, -inf  ;;  %v4833_v36 = vld [vmem:[#allocation19 + $0x1e0] sm:$0xf] }
 0xd1d   : > { %v2386_v38 = vmul.f32 1.442695, %v2385_v35  ;;  %2446 = vmax.xlane.f32.xlu0 %v2445_v37  ;;  %v5136_v37 = vld [vmem:[#allocation19 + $0x1ec] sm:$0xf0] }
 0xd1f   : > { %5394 = vpow2.f32 %v2386_v38  ;;  %v5134_v38 = vld [vmem:[#allocation19 + $0x1e4] sm:$0xf] }
 0xd21   : > { %v2574_v39 = vpop.f32.mrf.mxu3 }
 0xd22   : > { %v2577_v41 = vmul.f32 0.17677669, %v2574_v39  ;;  %v4834_v39 = vor.u32 %v5136_v37, %v4833_v36  ;;  %v4779_v36 = vld [vmem:[#allocation19 + $0x178] sm:$0xf0] }
 0xd24   : > { %v2578_v42 = vsel %vm1139_vm5, %v2577_v41, -inf }
 0xd25   : > { %v5395_v43 = vpop.eup %5394  ;;  %2579 = vmax.xlane.f32.xlu1 %v2578_v42  ;;  %v4841_v42 = vld [vmem:[#allocation19 + $0x1e8] sm:$0xf] }
 0xd26   : > { %v2388_v44 = vsel %vm1139_vm5, %v5395_v43, 0.0 }
 0xd27   : > { %2389 = vadd.xlane.f32.xlu0 %v2388_v44 }
 0xd8f   : > { %v2514_v45 = vpop.xlane.xlu2 %2513 }
 0xd90   : > { %v2515_v46 = vsub.f32 %v2511_v31, %v2514_v45  ;;  %v2447_v47 = vpop.xlane.xlu0 %2446  ;;  %v5357_v31 = vld [vmem:[#allocation16 + $0x1] ss:$0 sm:$0xff] }
 0xd91   : > { %v2448_v22 = vsub.f32 %v2444_v33, %v2447_v47  ;;  %v4843_v47 = vld [vmem:[#allocation19 + $0x1f8] sm:$0xf0] }
 0xd92   : > { %v2516_v48 = vmul.f32 1.442695, %v2515_v46  ;;  %v5135_v46 = vld [vmem:[#allocation19 + $0x1ec] sm:$0xf] }
 0xd93   : > { %v2449_v49 = vmul.f32 1.442695, %v2448_v22  ;;  %v4846_v22 = vor.u32 %v5135_v46, %v4843_v47 }
 0xd94   : > { %5396 = vpow2.f32 %v2516_v48 }
 0xd95   : > { %5398 = vpow2.f32 %v2449_v49  ;;  %2992 = vmatpush.bf16.msra.mxu1 %v4846_v22  ;;  %v5115_v22 = vld [vmem:[#allocation19 + $0x14c] sm:$0xf] }
 0xd98   : > { %v2580_v4 = vpop.xlane.xlu1 %2579 }
 0xd99   : > { %v2581_v51 = vsub.f32 %v2577_v41, %v2580_v4  ;;  %v4835_v41 = vld [vmem:[#allocation19 + $0x1f0] sm:$0xf0] }
 0xd9a   : > { %v5397_v52 = vpop.eup %5396  ;;  %v2390_v53 = vpop.xlane.xlu0 %2389  ;;  %v4838_v44 = vor.u32 %v5134_v38, %v4835_v41  ;;  %v4753_v38 = vld [vmem:[#allocation19 + $0x140] sm:$0xf]  ;;  %v5114_v41 = vld [vmem:[#allocation19 + $0x144] sm:$0xf] }
 0xd9b   : > { %v5399_v54 = vpop.eup %5398  ;;  %v2582_v55 = vmul.f32 1.442695, %v2581_v51  ;;  %5400 = vrcp.f32 %v2390_v53  ;;  %v2518_v56 = vsel %vm1139_vm5, %v5397_v52, 0.0  ;;  %v4817_v51 = vld [vmem:[#allocation19 + $0x1c0] sm:$0xf] }
 0xd9c   : > { %2519 = vadd.xlane.f32.xlu1 %v2518_v56  ;;  %v2451_v57 = vsel %vm1139_vm5, %v5399_v54, 0.0  ;;  %2966 = vmatpush.bf16.msra.mxu3 %v4838_v44  ;;  %v5130_v53 = vld [vmem:[#allocation19 + $0x1c4] sm:$0xf]  ;;  %v4825_v56 = vld [vmem:[#allocation19 + $0x1c8] sm:$0xf] }
 0xd9d   : > { %5402 = vpow2.f32 %v2582_v55  ;;  %2452 = vadd.xlane.f32.xlu2 %v2451_v57  ;;  %v4819_v55 = vld [vmem:[#allocation19 + $0x1d0] sm:$0xf0]  ;;  %v5133_v57 = vld [vmem:[#allocation19 + $0x1d4] sm:$0xf0]  ;;  %v4761_v44 = vld [vmem:[#allocation19 + $0x148] sm:$0xf] }
 0xda1   : > { %v5401_v58 = vpop.eup %5400 }
 0xda2   : > { %v2392_v59 = vmul.f32 %v5401_v58, %v5395_v43  ;;  %v5137_v43 = vld [vmem:[#allocation19 + $0x1f4] sm:$0xf0]  ;;  %v4822_v58 = vor.u32 %v5130_v53, %v4819_v55  ;;  %v4745_v55 = vld [vmem:[#allocation19 + $0x128] sm:$0xf] }
 0xda3   : > { %v5403_v60 = vpop.eup %5402  ;;  %v4842_v45 = vor.u32 %v5137_v43, %v4841_v42  ;;  %v4755_v43 = vld [vmem:[#allocation19 + $0x150] sm:$0xf0] }
 0xda4   : > { %4659 = vmatmul.msk.f32.vlgmr.msra.gmra.mxu2 %vm1139_vm5, %v2392_v59  ;;  %v2584_v61 = vsel %vm1139_vm5, %v5403_v60, 0.0  ;;  %v4826_v59 = vor.u32 %v5133_v57, %v4825_v56  ;;  %2967 = vmatpush.bf16.msra.mxu3 %v4822_v58  ;;  %v4758_v46 = vor.u32 %v5114_v41, %v4755_v43  ;;  %v5113_v56 = vld [vmem:[#allocation19 + $0x134] sm:$0xf0]  ;;  %v5151_v41 = vld [vmem:[#allocation20 + $0x168] sm:$0xff] }
 0xda5   : > { %2585 = vadd.xlane.f32.xlu0 %v2584_v61  ;;  %v4827_v61 = vld [vmem:[#allocation19 + $0x1d8] sm:$0xf0]  ;;  %v4746_v58 = vor.u32 %v5113_v56, %v4745_v55  ;;  %v5139_v55 = vld [vmem:[#allocation20 + $0x108] sm:$0xff] }
 0xda6   : > { %v5165_v43 = vld [vmem:[#allocation20 + $0x1d8] sm:$0xff]  ;;  %v5147_v56 = vld [vmem:[#allocation20 + $0x148] sm:$0xff] }
 0xdb5   : > { %2457 = vrot.lane.b32.xlu2 %v6408_v13, %s5942_s3  ;;  %2523 = vrot.lane.b32.xlu1 %v6408_v13, %s5944_s7 }
 0xdb9   : > { %2589 = vrot.lane.b32.xlu0 %v6408_v13, %s5943_s12 }
 0xe0f   : > { %v2520_v2 = vpop.xlane.xlu1 %2519 }
 0xe10   : > { %v2453_v62 = vpop.xlane.xlu2 %2452 }
 0xe11   : > { %5404 = vrcp.f32 %v2453_v62 }
 0xe12   : > { %5406 = vrcp.f32 %v2520_v2 }
 0xe17   : > { %v5405_v63 = vpop.eup %5404 }
 0xe18   : > { %v2455_v0 = vmul.f32 %v5405_v63, %v5399_v54  ;;  %v2458_v1 = vpop.permute.xlu2 %2457  ;;  %v2586_v20 = vpop.xlane.xlu0 %2585  ;;  %v4801_v63 = vld [vmem:[#allocation19 + $0x1a0] sm:$0xf] }
 0xe19   : > { %2478 = vmatpush.msra.mxu0 %v2458_v1  ;;  %5408 = vrcp.f32 %v2586_v20  ;;  %v5407_v5 = vpop.eup %5406  ;;  %v5126_v1 = vld [vmem:[#allocation19 + $0x1a4] sm:$0xf]  ;;  %v4803_v20 = vld [vmem:[#allocation19 + $0x1b0] sm:$0xf0] }
 0xe1a   : > { %4662 = vmatmul.msk.f32.vlgmr.msra.gmra.mxu0 %vm1139_vm5, %v2455_v0  ;;  %v2522_v6 = vmul.f32 %v5407_v5, %v5397_v52  ;;  %v5132_v52 = vld [vmem:[#allocation19 + $0x1cc] sm:$0xf0]  ;;  %v4809_v5 = vld [vmem:[#allocation19 + $0x1a8] sm:$0xf] }
 0xe1b   : > { %v4818_v54 = vor.u32 %v5132_v52, %v4817_v51  ;;  %v5128_v0 = vld [vmem:[#allocation19 + $0x1ac] sm:$0xf0]  ;;  %v5110_v52 = vld [vmem:[#allocation19 + $0x124] sm:$0xf] }
 0xe1c   : > { %v4802_v2 = vor.u32 %v5128_v0, %v4801_v63  ;;  %v5112_v51 = vld [vmem:[#allocation19 + $0x12c] sm:$0xf0]  ;;  %v5106_v0 = vld [vmem:[#allocation19 + $0x104] sm:$0xf] }
 0xe1d   : > { %v5108_v63 = vld [vmem:[#allocation19 + $0x10c] sm:$0xf0] }
 0xe1f   : > { %v5409_v7 = vpop.eup %5408 }
 0xe20   : > { %v2588_v9 = vmul.f32 %v5409_v7, %v5403_v60  ;;  %v5131_v60 = vld [vmem:[#allocation19 + $0x1cc] sm:$0xf] }
 0xe21   : > { %v4830_v62 = vor.u32 %v5131_v60, %v4827_v61  ;;  %v4747_v60 = vld [vmem:[#allocation19 + $0x138] sm:$0xf0]  ;;  %v4721_v61 = vld [vmem:[#allocation19 + $0x100] sm:$0xf] }
 0xe23   : > { %2993 = vmatpush.bf16.msra.mxu1 %v4830_v62 }
 0xe27   : > { %v2524_v8 = vpop.permute.xlu1 %2523  ;;  %v2413_v12 = vpop.f32.mrf.mxu2 }
 0xe28   : > { %2544 = vmatpush.msrb.mxu2 %v2524_v8  ;;  %v4806_v8 = vor.u32 %v5126_v1, %v4803_v20  ;;  %v4723_v1 = vld [vmem:[#allocation19 + $0x110] sm:$0xf0] }
 0xe29   : > { %4665 = vmatmul.msk.f32.vlgmr.msrb.gmra.mxu2 %vm1139_vm5, %v2522_v6  ;;  %v5129_v6 = vld [vmem:[#allocation19 + $0x1b4] sm:$0xf0]  ;;  %v4726_v20 = vor.u32 %v5106_v0, %v4723_v1 }
 0xe2a   : > { %2953 = vmatpush.bf16.msra.mxu2 %v4834_v39  ;;  %v4810_v7 = vor.u32 %v5129_v6, %v4809_v5  ;;  %2968 = vmatpush.bf16.msra.mxu3 %v4806_v8  ;;  %v5116_v39 = vld [vmem:[#allocation19 + $0x14c] sm:$0xf0]  ;;  %v4729_v5 = vld [vmem:[#allocation19 + $0x108] sm:$0xf]  ;;  %v5109_v6 = vld [vmem:[#allocation19 + $0x114] sm:$0xf0] }
 0xe2b   : > { %v2590_v10 = vpop.permute.xlu0 %2589  ;;  %v4754_v42 = vor.u32 %v5116_v39, %v4753_v38  ;;  %v5107_v8 = vld [vmem:[#allocation19 + $0x10c] sm:$0xf]  ;;  %v5166_v38 = vld [vmem:[#allocation20 + $0x1e0] sm:$0xff] }
 0xe2c   : > { %2610 = vmatpush.msrb.mxu0 %v2590_v10  ;;  %v4811_v10 = vld [vmem:[#allocation19 + $0x1b8] sm:$0xf0]  ;;  %v5143_v39 = vld [vmem:[#allocation20 + $0x128] sm:$0xff] }
 0xe2d   : > { %4668 = vmatmul.msk.f32.vlgmr.msrb.gmra.mxu0 %vm1139_vm5, %v2588_v9  ;;  %v5127_v9 = vld [vmem:[#allocation19 + $0x1ac] sm:$0xf] }
 0xe2e   : > { %2979 = vmatpush.bf16.msra.mxu0 %v4842_v45  ;;  %2954 = vmatpush.bf16.msra.mxu2 %v4818_v54  ;;  %v5117_v45 = vld [vmem:[#allocation19 + $0x154] sm:$0xf0]  ;;  %v4739_v54 = vld [vmem:[#allocation19 + $0x130] sm:$0xf0] }
 0xe2f   : > { %v4762_v47 = vor.u32 %v5117_v45, %v4761_v44  ;;  %v4742_v57 = vor.u32 %v5110_v52, %v4739_v54  ;;  %v5142_v44 = vld [vmem:[#allocation20 + $0x120] sm:$0xff]  ;;  %v5148_v52 = vld [vmem:[#allocation20 + $0x150] sm:$0xff] }
 0xe30   : > { %v5150_v45 = vld [vmem:[#allocation20 + $0x160] sm:$0xff] }
 0xe31   : > { %v5162_v54 = vld [vmem:[#allocation20 + $0x1c0] sm:$0xff] }
 0xe32   : > { %2980 = vmatpush.bf16.msra.mxu0 %v4826_v59  ;;  %2955 = vmatpush.bf16.msra.mxu2 %v4802_v2  ;;  %v5111_v59 = vld [vmem:[#allocation19 + $0x12c] sm:$0xf]  ;;  %v4722_v2 = vor.u32 %v5108_v63, %v4721_v61  ;;  %v5146_v61 = vld [vmem:[#allocation20 + $0x140] sm:$0xff] }
 0xe33   : > { %v4750_v62 = vor.u32 %v5111_v59, %v4747_v60  ;;  %v5138_v60 = vld [vmem:[#allocation20 + $0x100] sm:$0xff] }
 0xe36   : > { %2981 = vmatpush.bf16.msra.mxu0 %v4810_v7  ;;  %v4730_v7 = vor.u32 %v5109_v6, %v4729_v5 }
 0xe3a   : > { %2982 = vmatpush.bf16.msra.mxu0 %v4794_v18 }
 0xe97   : > { %v2480_v11 = vpop.f32.mrf.mxu0 }
 0xe98   : > { %2616 = vrot.lane.b32.xlu2 %v2480_v11, %s5943_s12  ;;  %v4814_v11 = vor.u32 %v5127_v9, %v4811_v10  ;;  %v4731_v9 = vld [vmem:[#allocation19 + $0x118] sm:$0xf0]  ;;  %s7064_s12 = sld [smem:[#allocation55_spill]] }
 0xe99   : > { %v4734_v10 = vor.u32 %v5107_v8, %v4731_v9 }
 0xe9a   : > { %2994 = vmatpush.bf16.msra.mxu1 %v4814_v11 }
 0xe9e   : > { %v3376_v5 = vld [vmem:[%s7064_s12 + $0x78] sm:$0xff]  ;;  %v3375_v6 = vld [vmem:[%s7064_s12 + $0x70] sm:$0xff]  ;;  %v3374_v9 = vld [vmem:[%s7064_s12 + $0x68] sm:$0xff] }
 0xeaa   : > { %v2612_v13 = vpop.f32.mrf.mxu0 }
 0xeab   : > { %2624 = vrot.lane.b32.xlu1 %v2612_v13, %s5942_s3  ;;  %v5124_v13 = vld [vmem:[#allocation19 + $0x18c] sm:$0xf0]  ;;  %s5810_s3 = sshra.s32 %s3895_s20, 4  ;;  %s5811_s3 = int_to_ptr.hbm [resolvable:$true] %s5810_s3 }
 0xeac   : > { %v2546_v50 = vpop.f32.mrf.mxu2  ;;  %p5817_p13 = scmp.lt.s32.totalorder %s5811_s3, %s7067_s30 }
 0xead   : > { %2620 = vrot.lane.b32.xlu0 %v2546_v50, %s5944_s7  ;;  %v5122_v50 = vld [vmem:[#allocation19 + $0x184] sm:$0xf]  ;;  %s5812_s7 = scalar_lea.hbm %s5811_s3, 3 }
 0xeae   : > { %v4790_v3 = vor.u32 %v5122_v50, %v4787_v15  ;;  %p5813_p6 = scmp.ne.s32.totalorder %s5811_s3, %s5812_s7 }
 0xeb0   : > { %2969 = vmatpush.bf16.msra.mxu3 %v4790_v3  ;;  %p5814_p2 = pnand %p5813_p6, %p6109_p11 }
 0xeb2   : > { %p5815_p7 = pneg %p5814_p2 }
 0xef2   : > { %v2617_v24 = vpop.permute.xlu2 %2616 }
 0xef3   : > { %v2627_v25 = vsel %vm1111_vm4, %v2413_v12, %v2617_v24  ;;  %v4785_v12 = vld [vmem:[#allocation19 + $0x180] sm:$0xf]  ;;  %v4798_v24 = vor.u32 %v5123_v21, %v4795_v23  ;;  %v5358_v23 = vld [vmem:[#allocation17 + $0x1] ss:$0 sm:$0xff]  ;;  %vm3463_vm4 = vcmask 1041408  }
 0xef4   : > { %v4786_v14 = vor.u32 %v5124_v13, %v4785_v12  ;;  %v5161_v12 = vld [vmem:[#allocation20 + $0x1b8] sm:$0xff] }
 0xef5   : > { %2995 = vmatpush.bf16.msra.mxu1 %v4798_v24  ;;  %v5169_v13 = vld [vmem:[#allocation20 + $0x1f8] sm:$0xff] }
 0xef6   : > { %2956 = vmatpush.bf16.msra.mxu2 %v4786_v14 }
 0xf1d   : > { %v2625_v27 = vpop.permute.xlu1 %2624 }
 0xf1f   : > { %v2621_v26 = vpop.permute.xlu0 %2620 }
 0xf20   : > { %v2628_v28 = vsel %vm1386_vm6, %v2627_v25, %v2621_v26  ;;  %v4769_v25 = vld [vmem:[#allocation19 + $0x160] sm:$0xf]  ;;  %v5120_v26 = vld [vmem:[#allocation19 + $0x16c] sm:$0xf0] }
 0xf21   : > { %v2629_v29 = vsel %vm1388_vm7, %v2628_v28, %v2625_v27  ;;  %v5118_v27 = vld [vmem:[#allocation19 + $0x164] sm:$0xf]  ;;  %v4770_v28 = vor.u32 %v5120_v26, %v4769_v25 }
 0xf22   : > { %v2630_v30 = vpack.c.bf16 %v2629_v29, %v2629_v29  ;;  %v4771_v29 = vld [vmem:[#allocation19 + $0x170] sm:$0xf0] }
 0xf23   : > { %2957 = vmatpush.bf16.msra.mxu2 %v4770_v28 }
 0xf24   : > { %2704 = vmatmul.bf16.vlgmr.msrb.gmra.mxu1 %v2630_v30  ;;  %v4777_v30 = vld [vmem:[#allocation19 + $0x168] sm:$0xf] }
 0xf27   : > { %2958 = vmatpush.bf16.msra.mxu2 %v4754_v42  ;;  %v5157_v42 = vld [vmem:[#allocation20 + $0x198] sm:$0xff] }
 0xfa1   : > { %v2705_v32 = vpop.f32.mrf.mxu1 }
 0xfa2   : > { %v2709_v33 = vadd.f32 %v2705_v32, %v6397_v40  ;;  %v4774_v32 = vor.u32 %v5118_v27, %v4771_v29  ;;  %v5160_v29 = vld [vmem:[#allocation20 + $0x1b0] sm:$0xff] }
 0xfa4   : > { %v6474_v34 = vadd.f32 %v5357_v31, %v2709_v33  ;;  %v5121_v31 = vld [vmem:[#allocation19 + $0x174] sm:$0xf0]  ;;  %2970 = vmatpush.bf16.msra.mxu3 %v4774_v32 }
 0xfa5   : > { %v4778_v33 = vor.u32 %v5121_v31, %v4777_v30  ;;  %v5168_v30 = vld [vmem:[#allocation20 + $0x1f0] sm:$0xff]  ;;  %v5145_v31 = vld [vmem:[#allocation20 + $0x138] sm:$0xff] }
 0xfa6   : > { %2720 = vadd.xlane.f32.xlu2 %v6474_v34  ;;  %v5153_v32 = vld [vmem:[#allocation20 + $0x178] sm:$0xff] }
 0xfa7   : > { %2983 = vmatpush.bf16.msra.mxu0 %v4778_v33  ;;  %v5167_v33 = vld [vmem:[#allocation20 + $0x1e8] sm:$0xff] }
 0xfa8   : > { %2971 = vmatpush.bf16.msra.mxu3 %v4758_v46  ;;  %v5156_v46 = vld [vmem:[#allocation20 + $0x190] sm:$0xff] }
 0xfa9   : > { %v2707_v35 = vpop.f32.mrf.mxu1 }
 0xfaa   : > { %v5119_v35 = vld [vmem:[#allocation19 + $0x16c] sm:$0xf] }
 0xfab   : > { %v4782_v37 = vor.u32 %v5119_v35, %v4779_v36  ;;  %2984 = vmatpush.bf16.msra.mxu0 %v4762_v47  ;;  %v5144_v35 = vld [vmem:[#allocation20 + $0x130] sm:$0xff] }
 0xfac   : > { %2972 = vmatpush.bf16.msra.mxu3 %v4742_v57  ;;  %v5152_v36 = vld [vmem:[#allocation20 + $0x170] sm:$0xff]  ;;  %v4718_v57 = vld [vmem:[%s7062_s28 + $0x4] sm:$0xf] }
 0xfad   : > { %2996 = vmatpush.bf16.msra.mxu1 %v4782_v37  ;;  %v5158_v37 = vld [vmem:[#allocation20 + $0x1a0] sm:$0xff]  ;;  %v5164_v47 = vld [vmem:[#allocation20 + $0x1d0] sm:$0xff]  ;;  %v2788_v59 = vperm.slane %v4718_v57, 3 }
 0xfaf   : > { %2985 = vmatpush.bf16.msra.mxu0 %v4746_v58  ;;  %v2787_v58 = vperm.slane %v4718_v57, 2 }
 0xfb0   : > { %2973 = vmatpush.bf16.msra.mxu3 %v4726_v20  ;;  %v2786_v20 = vperm.slane %v4718_v57, 1 }
 0xfb3   : > { %2986 = vmatpush.bf16.msra.mxu0 %v4730_v7 }
 0xfb4   : > { %3315 = vmatpush.bf16.msrb.mxu3 %v5153_v32 }
 0xfb7   : > { %3328 = vmatpush.bf16.msrb.mxu0 %v5161_v12 }
 0xfb8   : > { %3316 = vmatpush.bf16.msrb.mxu3 %v5152_v36 }
 0xfbb   : > { %3329 = vmatpush.bf16.msrb.mxu0 %v5160_v29 }
 0xfbc   : > { %3317 = vmatpush.bf16.msrb.mxu3 %v5151_v41 }
 0xfc0   : > { %3318 = vmatpush.bf16.msrb.mxu3 %v5150_v45 }
0x1019   : > { %v2721_v40 = vpop.xlane.xlu2 %2720 }
0x101a   : > { %v2722_v48 = vmul.f32 %v2721_v40, %v6297_v19  ;;  %v4763_v40 = vld [vmem:[#allocation19 + $0x158] sm:$0xf0] }
0x101c   : > { %v6479_v49 = vsub.f32 %v6474_v34, %v2722_v48  ;;  %v4766_v48 = vor.u32 %v5115_v22, %v4763_v40  ;;  %v5141_v22 = vld [vmem:[#allocation20 + $0x118] sm:$0xff] }
0x101d   : > { %v5149_v40 = vld [vmem:[#allocation20 + $0x158] sm:$0xff] }
0x101e   : > { %v2724_v4 = vmul.f32 %v6479_v49, %v6479_v49  ;;  %2997 = vmatpush.bf16.msra.mxu1 %v4766_v48  ;;  %v5155_v48 = vld [vmem:[#allocation20 + $0x188] sm:$0xff]  ;;  %3319 = vmatpush.bf16.msrb.mxu3 %v5149_v40 }
0x1020   : > { %2725 = vadd.xlane.f32.xlu0 %v2724_v4  ;;  %v4737_v4 = vld [vmem:[#allocation19 + $0x120] sm:$0xf] }
0x1021   : > { %v4738_v53 = vor.u32 %v5112_v51, %v4737_v4  ;;  %v5163_v4 = vld [vmem:[#allocation20 + $0x1c8] sm:$0xff]  ;;  %v5140_v51 = vld [vmem:[#allocation20 + $0x110] sm:$0xff] }
0x1022   : > { %2998 = vmatpush.bf16.msra.mxu1 %v4750_v62  ;;  %3320 = vmatpush.bf16.msrb.mxu3 %v5148_v52 }
0x1023   : > { %2959 = vmatpush.bf16.msra.mxu2 %v4738_v53  ;;  %v5154_v53 = vld [vmem:[#allocation20 + $0x180] sm:$0xff] }
0x1026   : > { %2999 = vmatpush.bf16.msra.mxu1 %v4734_v10  ;;  %3321 = vmatpush.bf16.msrb.mxu3 %v5147_v56 }
0x1027   : > { %2960 = vmatpush.bf16.msra.mxu2 %v4722_v2  ;;  %v2785_v2 = vperm.slane %v4718_v57, 0  ;;  %v3372_v57 = vld [vmem:[%s7064_s12 + $0x58] sm:$0xff] }
0x102a   : > { %3341 = vmatpush.bf16.msrb.mxu1 %v5169_v13  ;;  %3322 = vmatpush.bf16.msrb.mxu3 %v5146_v61  ;;  %v3368_v61 = vld [vmem:[%s7064_s12 + $0x38] sm:$0xff] }
0x102b   : > { %3302 = vmatpush.bf16.msrb.mxu2 %v5145_v31 }
0x102e   : > { %3342 = vmatpush.bf16.msrb.mxu1 %v5168_v30 }
0x102f   : > { %3303 = vmatpush.bf16.msrb.mxu2 %v5144_v35 }
0x1032   : > { %3343 = vmatpush.bf16.msrb.mxu1 %v5167_v33 }
0x1033   : > { %3304 = vmatpush.bf16.msrb.mxu2 %v5143_v39 }
0x1036   : > { %3344 = vmatpush.bf16.msrb.mxu1 %v5166_v38 }
0x1037   : > { %3305 = vmatpush.bf16.msrb.mxu2 %v5142_v44 }
0x103a   : > { %3345 = vmatpush.bf16.msrb.mxu1 %v5165_v43 }
0x103b   : > { %3306 = vmatpush.bf16.msrb.mxu2 %v5141_v22 }
0x103e   : > { %3346 = vmatpush.bf16.msrb.mxu1 %v5164_v47 }
0x103f   : > { %3307 = vmatpush.bf16.msrb.mxu2 %v5140_v51 }
0x1042   : > { %3347 = vmatpush.bf16.msrb.mxu1 %v5163_v4 }
0x1043   : > { %3308 = vmatpush.bf16.msrb.mxu2 %v5139_v55 }
0x1046   : > { %3348 = vmatpush.bf16.msrb.mxu1 %v5162_v54 }
0x1047   : > { %3309 = vmatpush.bf16.msrb.mxu2 %v5138_v60  ;;  %v3369_v60 = vld [vmem:[%s7064_s12 + $0x40] sm:$0xff] }
0x1093   : > { %v2726_v11 = vpop.xlane.xlu0 %2725 }
0x1094   : > { %v2727_v50 = vmul.f32 %v2726_v11, %v6297_v19  ;;  %v5359_v19 = vld [vmem:[%s7061_s9 + $0x1] ss:$0 sm:$0xff] }
0x1096   : > { %v2728_v14 = vadd.f32 1e-05, %v2727_v50 }
0x1098   : > { %5410 = vrsqrt.f32 %v2728_v14  ;;  %vm2735_vm15 = vweird.f32 %v2728_v14 }
0x109e   : > { %v5411_v15 = vpop.eup %5410 }
0x109f   : > { %v2730_v16 = vmul.f32 %v5411_v15, %v2728_v14  ;;  %vm2736_vm14 = vweird.f32 %v5411_v15 }
0x10a0   : > { %vm2737_vm0 = vmor %vm2735_vm15, %vm2736_vm14 }
0x10a1   : > { %v2731_v17 = vmul.f32 %v5411_v15, %v2730_v16 }
0x10a3   : > { %v2732_v3 = vmul.f32 0.5, %v2731_v17 }
0x10a5   : > { %v2733_v18 = vsub.f32 1.5, %v2732_v3 }
0x10a7   : > { %v2734_v21 = vmul.f32 %v5411_v15, %v2733_v18 }
0x10a9   : > { %v2738_v24 = vsel %vm2737_vm0, %v5411_v15, %v2734_v21  ;;  %v3373_v15 = vld [vmem:[%s7064_s12 + $0x60] sm:$0xff] }
0x10aa   : > { %v2739_v25 = vmul.f32 %v2738_v24, %v6479_v49  ;;  %v5159_v49 = vld [vmem:[#allocation20 + $0x1a8] sm:$0xff] }
0x10ab   : > { %3330 = vmatpush.bf16.msrb.mxu0 %v5159_v49 }
0x10ac   : > { %v2743_v26 = vmul.f32 %v5358_v23, %v2739_v25 }
0x10ae   : > { %v2747_v27 = vadd.f32 %v5359_v19, %v2743_v26 }
0x10af   : > { %3331 = vmatpush.bf16.msrb.mxu0 %v5158_v37 }
0x10b0   : > { %v2748_v28 = vpack.c.bf16 %v2747_v27, %v2747_v27 }
0x10b2   : > { %2961 = vmatmul.bf16.vlgmr.msra.gmra.mxu2 %v2748_v28  ;;  %2974 = vmatmul.bf16.vlgmr.msra.gmra.mxu3 %v2748_v28 }
0x10b3   : > { %2987 = vmatmul.bf16.vlgmr.msra.gmra.mxu0 %v2748_v28  ;;  %3000 = vmatmul.bf16.vlgmr.msra.gmra.mxu1 %v2748_v28 }
0x10b4   : > { %3332 = vmatpush.bf16.msrb.mxu0 %v5157_v42  ;;  %3381 = vmatpush.msra.mxu2 %v3376_v5  ;;  %v3361_v5 = vld [vmem:[%s7064_s12] sm:$0xff] }
0x10b6   : > { %3382 = vmatpush.msra.mxu2 %v3375_v6 }
0x10b8   : > { %3333 = vmatpush.bf16.msrb.mxu0 %v5156_v46  ;;  %3383 = vmatpush.msra.mxu2 %v3374_v9 }
0x10ba   : > { %3384 = vmatpush.msra.mxu2 %v3373_v15 }
0x10bc   : > { %3334 = vmatpush.bf16.msrb.mxu0 %v5155_v48  ;;  %3385 = vmatpush.msra.mxu2 %v3372_v57 }
0x10c0   : > { %3335 = vmatpush.bf16.msrb.mxu0 %v5154_v53 }
0x1130   : > { %v2988_v62 = vpop.f32.mrf.mxu0  ;;  %v3001_v63 = vpop.f32.mrf.mxu1 }
0x1131   : > { %v2989_v0 = vadd.f32 %v2988_v62, %v2787_v58  ;;  %v3002_v1 = vadd.f32 %v3001_v63, %v2788_v59  ;;  %v3371_v58 = vld [vmem:[%s7064_s12 + $0x50] sm:$0xff]  ;;  %v3370_v59 = vld [vmem:[%s7064_s12 + $0x48] sm:$0xff] }
0x1132   : > { %3386 = vmatpush.msra.mxu2 %v3371_v58  ;;  %v3367_v62 = vld [vmem:[%s7064_s12 + $0x30] sm:$0xff]  ;;  %v3366_v63 = vld [vmem:[%s7064_s12 + $0x28] sm:$0xff] }
0x1133   : > { %v3007_v8 = vmul.f32 %v2989_v0, %v2989_v0  ;;  %v3008_v7 = vmul.f32 %v3002_v1, %v3002_v1 }
0x1134   : > { %3387 = vmatpush.msra.mxu2 %v3370_v59 }
0x1135   : > { %v3011_v10 = vmul.f32 %v3007_v8, %v2989_v0  ;;  %v3012_v11 = vmul.f32 %v3008_v7, %v3002_v1  ;;  %v2962_v12 = vpop.f32.mrf.mxu2  ;;  %v2975_v13 = vpop.f32.mrf.mxu3 }
0x1136   : > { %v2963_v50 = vadd.f32 %v2962_v12, %v2785_v2  ;;  %v2976_v14 = vadd.f32 %v2975_v13, %v2786_v20  ;;  %3388 = vmatpush.msra.mxu2 %v3369_v60  ;;  %v3363_v2 = vld [vmem:[%s7064_s12 + $0x10] sm:$0xff]  ;;  %v3362_v20 = vld [vmem:[%s7064_s12 + $0x8] sm:$0xff] }
0x1137   : > { %v3015_v16 = vmul.f32 0.044715, %v3011_v10  ;;  %v3016_v17 = vmul.f32 0.044715, %v3012_v11  ;;  %v3478_v60 = vld [vmem:[%s6551_s4 + $0x38] sm:$0xff] }
0x1138   : > { %v3005_v3 = vmul.f32 %v2963_v50, %v2963_v50  ;;  %v3006_v18 = vmul.f32 %v2976_v14, %v2976_v14  ;;  %v2990_v21 = vpop.f32.mrf.mxu0  ;;  %v3003_v23 = vpop.f32.mrf.mxu1  ;;  %3389 = vmatpush.msra.mxu2 %v3368_v61  ;;  %v3479_v61 = vld [vmem:[%s6551_s4 + $0x40] sm:$0xff] }
0x1139   : > { %v3019_v24 = vadd.f32 %v3015_v16, %v2989_v0  ;;  %v3020_v25 = vadd.f32 %v3016_v17, %v3002_v1  ;;  %v5361_v23 = vld [vmem:[#allocation4] ss:$0 sm:$0xff] }
0x113a   : > { %v3009_v19 = vmul.f32 %v3005_v3, %v2963_v50  ;;  %v3010_v26 = vmul.f32 %v3006_v18, %v2976_v14  ;;  %3390 = vmatpush.msra.mxu2 %v3367_v62  ;;  %v3401_v18 = vlaneseq  ;;  %v3480_v62 = vld [vmem:[%s6551_s4 + $0x48] sm:$0xff] }
0x113b   : > { %v3023_v27 = vmul.f32 0.7978846, %v3019_v24  ;;  %v3024_v28 = vmul.f32 0.7978846, %v3020_v25  ;;  %v3404_v24 = vstv %s3403_s26 }
0x113c   : > { %v3013_v29 = vmul.f32 0.044715, %v3009_v19  ;;  %v3014_v30 = vmul.f32 0.044715, %v3010_v26  ;;  %3391 = vmatpush.msra.mxu2 %v3366_v63  ;;  %v3402_v21 = vshrl.u32 %v3401_v18, 7  ;;  %vm6634_vm5 = vcmp.lt.s32.totalorder %v3401_v18, 384 }
0x113d   : > { %5412 = vtanh.f32 %v3023_v27  ;;  %v2964_v31 = vpop.f32.mrf.mxu2  ;;  %v2977_v32 = vpop.f32.mrf.mxu3 }
0x113e   : > { %5414 = vtanh.f32 %v3024_v28  ;;  %v3017_v49 = vadd.f32 %v3013_v29, %v2963_v50  ;;  %v3018_v33 = vadd.f32 %v3014_v30, %v2976_v14  ;;  %vm3405_vm1 = vcmp.lt.s32.totalorder %v3402_v21, %v3404_v24 }
0x1140   : > { %v3021_v35 = vmul.f32 0.7978846, %v3017_v49  ;;  %v3022_v36 = vmul.f32 0.7978846, %v3018_v33 }
0x1142   : > { %5416 = vtanh.f32 %v3021_v35 }
0x1143   : > { %v5413_v37 = vpop.eup %5412  ;;  %5418 = vtanh.f32 %v3022_v36 }
0x1144   : > { %v5415_v38 = vpop.eup %5414  ;;  %v3031_v39 = vadd.f32 1.0, %v5413_v37 }
0x1145   : > { %v3032_v41 = vadd.f32 1.0, %v5415_v38 }
0x1146   : > { %v3035_v42 = vmul.f32 0.5, %v3031_v39 }
0x1147   : > { %v3036_v43 = vmul.f32 0.5, %v3032_v41 }
0x1148   : > { %v5417_v44 = vpop.eup %5416  ;;  %v3039_v45 = vmul.f32 %v3035_v42, %v2989_v0  ;;  %v3365_v0 = vld [vmem:[%s7064_s12 + $0x20] sm:$0xff] }
0x1149   : > { %v5419_v46 = vpop.eup %5418  ;;  %v3040_v47 = vmul.f32 %v3036_v43, %v3002_v1  ;;  %v3029_v22 = vadd.f32 1.0, %v5417_v44  ;;  %3392 = vmatpush.msra.mxu2 %v3365_v0  ;;  %v3364_v1 = vld [vmem:[%s7064_s12 + $0x18] sm:$0xff]  ;;  %v3481_v0 = vld [vmem:[%s6551_s4 + $0x50] sm:$0xff] }
0x114a   : > { %v3043_v40 = vpack.c.bf16 %v3039_v45, %v3039_v45  ;;  %v3030_v48 = vadd.f32 1.0, %v5419_v46 }
0x114b   : > { %v3044_v4 = vpack.c.bf16 %v3040_v47, %v3040_v47  ;;  %v3033_v51 = vmul.f32 0.5, %v3029_v22  ;;  %3393 = vmatpush.msra.mxu2 %v3364_v1  ;;  %v3427_v47 = vld [vmem:[%s6288_s24] sm:$0xff]  ;;  %v3428_v22 = vld [vmem:[%s6288_s24 + $0x8] sm:$0xff] }
0x114c   : > { %3336 = vmatmul.bf16.vlgmr.msrb.gmra.mxu0 %v3043_v40  ;;  %v3034_v52 = vmul.f32 0.5, %v3030_v48  ;;  %v3429_v40 = vld [vmem:[%s6288_s24 + $0x10] sm:$0xff]  ;;  %s5176_s24 = smul.u32 3, %s6260_s10 }
0x114d   : > { %3349 = vmatmul.bf16.vlgmr.msrb.gmra.mxu1 %v3044_v4  ;;  %v3037_v53 = vmul.f32 %v3033_v51, %v2963_v50  ;;  %3394 = vmatpush.msra.mxu2 %v3363_v2  ;;  %v3471_v48 = vld [vmem:[%s6551_s4] sm:$0xff]  ;;  %v3472_v4 = vld [vmem:[%s6551_s4 + $0x8] sm:$0xff]  ;;  %v3473_v51 = vld [vmem:[%s6551_s4 + $0x10] sm:$0xff] }
0x114e   : > { %v3038_v54 = vmul.f32 %v3034_v52, %v2976_v14  ;;  %v5360_v14 = vld [vmem:[%s7063_s2 + $0x1] ss:$0 sm:$0xff]  ;;  %v3474_v52 = vld [vmem:[%s6551_s4 + $0x18] sm:$0xff]  ;;  %s855_s6 = scalar_lea.vmem [#allocation24], %s5176_s24 }
0x114f   : > { %v3041_v55 = vpack.c.bf16 %v3037_v53, %v3037_v53  ;;  %3395 = vmatpush.msra.mxu2 %v3362_v20  ;;  %v3475_v53 = vld [vmem:[%s6551_s4 + $0x20] sm:$0xff]  ;;  %v3482_v1 = vld [vmem:[%s6551_s4 + $0x58] sm:$0xff]  ;;  %s3892_s21 = sshll.u32 %s855_s6, 4  ;;  %s3893_s21 = int_to_ptr.vmem [resolvable:$true] %s3892_s21 }
0x1150   : > { %v3042_v56 = vpack.c.bf16 %v3038_v54, %v3038_v54 }
0x1151   : > { %3310 = vmatmul.bf16.vlgmr.msrb.gmra.mxu2 %v3041_v55  ;;  %v3476_v55 = vld [vmem:[%s6551_s4 + $0x28] sm:$0xff] }
0x1152   : > { %3323 = vmatmul.bf16.vlgmr.msrb.gmra.mxu3 %v3042_v56  ;;  %3396 = vmatpush.msra.mxu2 %v3361_v5  ;;  %v3477_v56 = vld [vmem:[%s6551_s4 + $0x30] sm:$0xff] }
0x11c9   : > { %v3337_v6 = vpop.f32.mrf.mxu0 }
0x11ca   : > { %v3350_v8 = vpop.f32.mrf.mxu1 }
0x11d1   : > { %v3339_v7 = vpop.f32.mrf.mxu0 }
0x11d2   : > { %v3352_v9 = vpop.f32.mrf.mxu1 }
0x11d4   : > { %v3311_v10 = vpop.f32.mrf.mxu2 }
0x11d5   : > { %v3324_v11 = vpop.f32.mrf.mxu3 }
0x11d6   : > { %v3325_v12 = vadd.f32 %v3324_v11, %v3311_v10  ;;  %v3483_v10 = vld [vmem:[%s6551_s4 + $0x60] sm:$0xff]  ;;  %v3484_v11 = vld [vmem:[%s6551_s4 + $0x68] sm:$0xff] }
0x11d8   : > { %v3338_v13 = vadd.f32 %v3337_v6, %v3325_v12  ;;  %v3485_v12 = vld [vmem:[%s6551_s4 + $0x70] sm:$0xff] }
0x11da   : > { %v3351_v50 = vadd.f32 %v3350_v8, %v3338_v13 }
0x11dc   : > { %v3354_v15 = vadd.f32 %v3351_v50, %v6474_v34  ;;  %v3313_v16 = vpop.f32.mrf.mxu2  ;;  %v5945_v34 = vmov 0   ;;  %v3486_v50 = vld [vmem:[%s6551_s4 + $0x78] sm:$0xff] }
0x11dd   : > { %v3326_v17 = vpop.f32.mrf.mxu3  ;;  %5347 = vset.pattern.permute.xlu1 %v5945_v34  ;;  %5348 = vset.pattern.permute.xlu0 %v5945_v34 }
0x11de   : > { %v3360_v3 = vadd.f32 %v5360_v14, %v3354_v15  ;;  %v3487_v14 = vld [vmem:[%s6551_s4 + $0x80] sm:$0xff] }
0x11e0   : > { %3397 = vmatmul.f32.vlgmr.msra.gmra.mxu2 %v3360_v3 }
0x1263   : > { %v3398_v25 = vpop.f32.mrf.mxu2 }
0x1264   : > { %v3399_v19 = vadd.f32 %v5361_v23, %v3398_v25  ;;  %v3488_v25 = vld [vmem:[%s6551_s4 + $0x88] sm:$0xff] }
0x1266   : > { %v3406_v26 = vsel %vm3405_vm1, %v3399_v19, -10000.0  ;;  %v3489_v19 = vld [vmem:[%s6551_s4 + $0x90] sm:$0xff] }
0x1267   : > { %v3408_v27 = vsel %vm3407_vm2, %v3406_v26, -inf }
0x1268   : > { %v3409_v28 = vrot.slane %v3408_v27, 4 }
0x126a   : > { %v3410_v29 = vmax.f32 %v3408_v27, %v3409_v28  ;;  %v3491_v28 = vld [vmem:[%s6551_s4 + $0xa0] sm:$0xff] }
0x126c   : > { %v3411_v30 = vrot.slane %v3410_v29, 2 }
0x126e   : > { %v3412_v31 = vmax.f32 %v3410_v29, %v3411_v30  ;;  %v3492_v29 = vld [vmem:[%s6551_s4 + $0xa8] sm:$0xff] }
0x1270   : > { %v3413_v32 = vrot.slane %v3412_v31, 1 }
0x1272   : > { %v3414_v49 = vmax.f32 %v3412_v31, %v3413_v32 }
0x1274   : > { %v3415_v33 = vsub.f32 %v3406_v26, %v3414_v49  ;;  %v3490_v26 = vld [vmem:[%s6551_s4 + $0x98] sm:$0xff] }
0x1276   : > { %v3416_v35 = vmul.f32 1.442695, %v3415_v33 }
0x1278   : > { %5420 = vpow2.f32 %v3416_v35 }
0x127e   : > { %v5421_v36 = vpop.eup %5420 }
0x127f   : > { %v3418_v37 = vsel %vm3407_vm2, %v5421_v36, 0.0 }
0x1280   : > { %v3419_v38 = vrot.slane %v3418_v37, 4 }
0x1282   : > { %v3420_v39 = vadd.f32 %v3419_v38, %v3418_v37  ;;  %v3494_v37 = vld [vmem:[%s6551_s4 + $0xb8] sm:$0xff]  ;;  %v3495_v38 = vld [vmem:[%s6551_s4 + $0xc0] sm:$0xff] }
0x1284   : > { %v3421_v41 = vrot.slane %v3420_v39, 2 }
0x1286   : > { %v3422_v42 = vadd.f32 %v3421_v41, %v3420_v39 }
0x1288   : > { %v3423_v43 = vrot.slane %v3422_v42, 1 }
0x128a   : > { %v3424_v44 = vadd.f32 %v3423_v43, %v3422_v42  ;;  %v3496_v42 = vld [vmem:[%s6551_s4 + $0xc8] sm:$0xff]  ;;  %v3497_v43 = vld [vmem:[%s6551_s4 + $0xd0] sm:$0xff] }
0x128c   : > { %5422 = vrcp.f32 %v3424_v44 }
0x1292   : > { %v5423_v45 = vpop.eup %5422 }
0x1293   : > { %v3426_v46 = vmul.f32 %v5423_v45, %v5421_v36  ;;  %v3493_v36 = vld [vmem:[%s6551_s4 + $0xb0] sm:$0xff] }
0x1295   : > { %3432 = vperm.xlu1 %5347, %v3426_v46  }
0x1307   : > { %v6558_v54 = vpop.permute.xlu1 %3432 }
0x1308   : > { %v3435_v57 = vmul.f32 %v6558_v54, %v3427_v47  ;;  %v3436_v58 = vmul.f32 %v6558_v54, %v3428_v22  ;;  %v3437_v59 = vmul.f32 %v6558_v54, %v3429_v40  ;;  %v6569_v63 = vmul.f32 %v3471_v48, %v6558_v54 }
0x1309   : > { %v6574_v2 = vmul.f32 %v3472_v4, %v6558_v54  ;;  %v6577_v20 = vmul.f32 %v3473_v51, %v6558_v54  ;;  %v6580_v5 = vmul.f32 %v3474_v52, %v6558_v54  ;;  %v6583_v6 = vmul.f32 %v3475_v53, %v6558_v54  ;;  %v3498_v4 = vld [vmem:[%s6551_s4 + $0xd8] sm:$0xff]  ;;  %v3499_v51 = vld [vmem:[%s6551_s4 + $0xe0] sm:$0xff]  ;;  %v3500_v52 = vld [vmem:[%s6551_s4 + $0xe8] sm:$0xff] }
0x130a   : > { %v3438_v8 = vrot.slane %v3435_v57, 4  ;;  %v3444_v7 = vrot.slane %v3436_v58, 4  ;;  %v3450_v9 = vrot.slane %v3437_v59, 4  ;;  %v6589_v13 = vmul.f32 %v3476_v55, %v6558_v54  ;;  %v3501_v55 = vld [vmem:[%s6551_s4 + $0xf0] sm:$0xff] }
0x130b   : > { %v6594_v15 = vmul.f32 %v3477_v56, %v6558_v54  ;;  %v6597_v16 = vmul.f32 %v3478_v60, %v6558_v54  ;;  %v6600_v17 = vmul.f32 %v3479_v61, %v6558_v54  ;;  %v6603_v3 = vmul.f32 %v3480_v62, %v6558_v54  ;;  %v3502_v56 = vld [vmem:[%s6551_s4 + $0xf8] sm:$0xff] }
0x130c   : > { %v3439_v21 = vadd.f32 %v3438_v8, %v3435_v57  ;;  %v3445_v23 = vadd.f32 %v3444_v7, %v3436_v58  ;;  %v3451_v24 = vadd.f32 %v3450_v9, %v3437_v59  ;;  %v6610_v27 = vmul.f32 %v3481_v0, %v6558_v54  ;;  %v3504_v8 = vld [vmem:[%s6551_s4 + $0x108] sm:$0xff]  ;;  %v3505_v7 = vld [vmem:[%s6551_s4 + $0x110] sm:$0xff] }
0x130d   : > { %v6616_v34 = vmul.f32 %v3482_v1, %v6558_v54  ;;  %v6619_v30 = vmul.f32 %v3483_v10, %v6558_v54  ;;  %v6622_v31 = vmul.f32 %v3484_v11, %v6558_v54  ;;  %v6625_v32 = vmul.f32 %v3485_v12, %v6558_v54  ;;  %v3503_v1 = vld [vmem:[%s6551_s4 + $0x100] sm:$0xff]  ;;  %v3506_v10 = vld [vmem:[%s6551_s4 + $0x118] sm:$0xff]  ;;  %s5816_s4 = scalar_lea.hbm %s7067_s30, 6 }
0x130e   : > { %v3440_v49 = vrot.slane %v3439_v21, 2  ;;  %v3446_v33 = vrot.slane %v3445_v23, 2  ;;  %v3452_v35 = vrot.slane %v3451_v24, 2  ;;  %v6631_v39 = vmul.f32 %v3486_v50, %v6558_v54  ;;  %p5818_p5 = scmp.lt.s32.totalorder %s5816_s4, %s5812_s7 }
0x130f   : > { %v6641_v44 = vmul.f32 %v3487_v14, %v6558_v54  ;;  %v6644_v45 = vmul.f32 %v3488_v25, %v6558_v54  ;;  %v6647_v46 = vmul.f32 %v3489_v19, %v6558_v54  ;;  %v6650_v47 = vmul.f32 %v3490_v26, %v6558_v54 }
0x1310   : > { %v3441_v22 = vadd.f32 %v3440_v49, %v3439_v21  ;;  %v3447_v40 = vadd.f32 %v3446_v33, %v3445_v23  ;;  %v3453_v48 = vadd.f32 %v3452_v35, %v3451_v24  ;;  %v6656_v53 = vmul.f32 %v3491_v28, %v6558_v54  ;;  %p5819_p0 = por %p5818_p5, %p5817_p13 }
0x1311   : > { %v6661_v57 = vmul.f32 %v3492_v29, %v6558_v54  ;;  %v6664_v58 = vmul.f32 %v3493_v36, %v6558_v54  ;;  %v6667_v59 = vmul.f32 %v3494_v37, %v6558_v54  ;;  %v6670_v60 = vmul.f32 %v3495_v38, %v6558_v54 }
0x1312   : > { %v3442_v61 = vrot.slane %v3441_v22, 1  ;;  %v3448_v62 = vrot.slane %v3447_v40, 1  ;;  %v3454_v0 = vrot.slane %v3453_v48, 1  ;;  %v6683_v9 = vmul.f32 %v3496_v42, %v6558_v54  ;;  %p5820_p1 = pnand %p5819_p0, %p5815_p7 }
0x1313   : > { %v6687_v11 = vmul.f32 %v3497_v43, %v6558_v54  ;;  %v6690_v12 = vmul.f32 %v3498_v4, %v6558_v54  ;;  %v6693_v50 = vmul.f32 %v3499_v51, %v6558_v54  ;;  %v6696_v14 = vmul.f32 %v3500_v52, %v6558_v54 }
0x1314   : > { %v3443_v21 = vadd.f32 %v3442_v61, %v3441_v22  ;;  %v3449_v23 = vadd.f32 %v3448_v62, %v3447_v40  ;;  %v3455_v24 = vadd.f32 %v3454_v0, %v3453_v48  ;;  %v6699_v25 = vmul.f32 %v3501_v55, %v6558_v54 }
0x1315   : > { %v6705_v19 = vmul.f32 %v3502_v56, %v6558_v54  ;;  %v6708_v26 = vmul.f32 %v3503_v1, %v6558_v54  ;;  %v6711_v28 = vmul.f32 %v3504_v8, %v6558_v54  ;;  %v6714_v29 = vmul.f32 %v3505_v7, %v6558_v54 }
0x1316   : > { %v3459_v49 = vrot.slane %v3449_v23, 7  ;;  %v3460_v33 = vrot.slane %v3455_v24, 6  ;;  %v6717_v35 = vmul.f32 %v3506_v10, %v6558_v54  ;;  %v3543_v36 = vrot.slane %v6569_v63, 4 }
0x1317   : > { %v3549_v37 = vrot.slane %v6574_v2, 4  ;;  %v3555_v38 = vrot.slane %v6577_v20, 4  ;;  %v3561_v42 = vrot.slane %v6580_v5, 4  ;;  %v3567_v43 = vrot.slane %v6583_v6, 4 }
0x1318   : > { %v3462_v22 = vsel %vm3461_vm3, %v3443_v21, %v3459_v49  ;;  %v3544_v40 = vadd.f32 %v3543_v36, %v6569_v63  ;;  %v3573_v54 = vrot.slane %v6589_v13, 4  ;;  %v3579_v48 = vrot.slane %v6594_v15, 4 }
0x1319   : > { %v3464_v4 = vsel %vm3463_vm4, %v3462_v22, %v3460_v33  ;;  %v3550_v51 = vadd.f32 %v3549_v37, %v6574_v2  ;;  %v3556_v52 = vadd.f32 %v3555_v38, %v6577_v20  ;;  %v3562_v55 = vadd.f32 %v3561_v42, %v6580_v5 }
0x131a   : > { %3470 = vst.msk [vmem:[%s855_s6] sm:$0x7] %vm6634_vm5, %v3464_v4  ;;  %v3545_v56 = vrot.slane %v3544_v40, 2  ;;  %v3568_v61 = vadd.f32 %v3567_v43, %v6583_v6  ;;  %v3574_v63 = vadd.f32 %v3573_v54, %v6589_v13  ;;  %v3580_v62 = vadd.f32 %v3579_v48, %v6594_v15 }
0x131b   : > { %5823 = shalt.err (!%p5820_p1)
}
0x131c   : > { %5222 = dma.vmem_to_hbm [thread:$0]  (%p6109_p11), %s3893_s21, 48, %s3895_s20, %s3875_s23   ;;  %v3551_v2 = vrot.slane %v3550_v51, 2  ;;  %v3557_v20 = vrot.slane %v3556_v52, 2  ;;  %v3563_v5 = vrot.slane %v3562_v55, 2  ;;  %v3585_v6 = vrot.slane %v6597_v16, 4 }
0x131d   : > { %v3546_v13 = vadd.f32 %v3545_v56, %v3544_v40  ;;  %v3569_v15 = vrot.slane %v3568_v61, 2  ;;  %v3575_v41 = vrot.slane %v3574_v63, 2  ;;  %v3581_v0 = vrot.slane %v3580_v62, 2  ;;  %s5177_s29 = smul.u32 36, %s6260_s10  ;;  %s7069_s6 = sld [smem:[#allocation57_spill]] }
0x131e   : > { %v3552_v1 = vadd.f32 %v3551_v2, %v3550_v51  ;;  %v3558_v8 = vadd.f32 %v3557_v20, %v3556_v52  ;;  %v3564_v7 = vadd.f32 %v3563_v5, %v3562_v55  ;;  %v3586_v10 = vadd.f32 %v3585_v6, %v6597_v16  ;;  %s5179_s25 = smul.u32 36, %s6078_s27  ;;  %s3880_s7 = scalar_lea.sflag [#allocation26], %s6260_s10 }
0x131f   : > { %v3547_v21 = vrot.slane %v3546_v13, 1  ;;  %v3570_v23 = vadd.f32 %v3569_v15, %v3568_v61  ;;  %v3576_v24 = vadd.f32 %v3575_v41, %v3574_v63  ;;  %v3582_v49 = vadd.f32 %v3581_v0, %v3580_v62  ;;  %s862_s20 = scalar_lea.vmem [#allocation25], %s5177_s29 }
0x1320   : > { %v3553_v33 = vrot.slane %v3552_v1, 1  ;;  %v3559_v36 = vrot.slane %v3558_v8, 1  ;;  %v3565_v37 = vrot.slane %v3564_v7, 1  ;;  %v3587_v38 = vrot.slane %v3586_v10, 2  ;;  %s3906_s23 = sshll.u32 %s862_s20, 4  ;;  %s3907_s23 = int_to_ptr.vmem [resolvable:$true] %s3906_s23 }
0x1321   : > { %v6750_v42 = vadd.f32 %v3547_v21, %v3546_v13  ;;  %v3571_v43 = vrot.slane %v3570_v23, 1  ;;  %v3577_v22 = vrot.slane %v3576_v24, 1  ;;  %v3583_v40 = vrot.slane %v3582_v49, 1 }
0x1322   : > { %v6752_v54 = vadd.f32 %v3553_v33, %v3552_v1  ;;  %v6754_v48 = vadd.f32 %v3559_v36, %v3558_v8  ;;  %v6756_v4 = vadd.f32 %v3565_v37, %v3564_v7  ;;  %v3588_v16 = vadd.f32 %v3587_v38, %v3586_v10 }
0x1323   : > { %v6758_v51 = vadd.f32 %v3571_v43, %v3570_v23  ;;  %v6760_v52 = vadd.f32 %v3577_v22, %v3576_v24  ;;  %v6762_v55 = vadd.f32 %v3583_v40, %v3582_v49  ;;  %v3591_v56 = vrot.slane %v6600_v17, 4  ;;  %s6916_s21 = scalar_lea.hbm %s7069_s6, %s5179_s25  ;;  %s5844_s19 = scalar_lea.hbm %s7069_s6, 72 }
0x1324   : > { %v3589_v61 = vrot.slane %v3588_v16, 1  ;;  %v3597_v63 = vrot.slane %v6603_v3, 4  ;;  %v3603_v62 = vrot.slane %v6610_v27, 4  ;;  %v3609_v2 = vrot.slane %v6616_v34, 4  ;;  %s3908_s3 = sshll.u32 %s6916_s21, 4  ;;  %s3909_s3 = int_to_ptr.hbm [resolvable:$true] %s3908_s3 }
0x1325   : > { %v3592_v20 = vadd.f32 %v3591_v56, %v6600_v17  ;;  %v3615_v5 = vrot.slane %v6619_v30, 4  ;;  %v3621_v6 = vrot.slane %v6622_v31, 4  ;;  %v3627_v13 = vrot.slane %v6625_v32, 4  ;;  %s5838_s26 = sshra.s32 %s3909_s3, 4  ;;  %s5839_s26 = int_to_ptr.hbm [resolvable:$true] %s5838_s26 }
0x1326   : > { %v6772_v15 = vadd.f32 %v3589_v61, %v3588_v16  ;;  %v3598_v41 = vadd.f32 %v3597_v63, %v6603_v3  ;;  %v3604_v0 = vadd.f32 %v3603_v62, %v6610_v27  ;;  %v3610_v1 = vadd.f32 %v3609_v2, %v6616_v34  ;;  %s5840_s22 = scalar_lea.hbm %s5839_s26, 36  ;;  %p5845_p9 = scmp.lt.s32.totalorder %s5839_s26, %s7069_s6 }
0x1327   : > { %v3593_v8 = vrot.slane %v3592_v20, 2  ;;  %v3616_v7 = vadd.f32 %v3615_v5, %v6619_v30  ;;  %v3622_v10 = vadd.f32 %v3621_v6, %v6622_v31  ;;  %v3628_v17 = vadd.f32 %v3627_v13, %v6625_v32  ;;  %p5841_p4 = scmp.ne.s32.totalorder %s5839_s26, %s5840_s22  ;;  %p5846_p10 = scmp.lt.s32.totalorder %s5844_s19, %s5840_s22 }
0x1328   : > { %v3599_v21 = vrot.slane %v3598_v41, 2  ;;  %v3605_v23 = vrot.slane %v3604_v0, 2  ;;  %v3611_v24 = vrot.slane %v3610_v1, 2  ;;  %v3633_v49 = vrot.slane %v6631_v39, 4 }
0x1329   : > { %v3594_v33 = vadd.f32 %v3593_v8, %v3592_v20  ;;  %v3617_v36 = vrot.slane %v3616_v7, 2  ;;  %v3623_v37 = vrot.slane %v3622_v10, 2  ;;  %v3629_v3 = vrot.slane %v3628_v17, 2  ;;  %p5842_p8 = pnand %p5841_p4, %p6109_p11  ;;  %p5847_p6 = por %p5846_p10, %p5845_p9 }
0x132a   : > { %v3600_v38 = vadd.f32 %v3599_v21, %v3598_v41  ;;  %v3606_v27 = vadd.f32 %v3605_v23, %v3604_v0  ;;  %v3612_v43 = vadd.f32 %v3611_v24, %v3610_v1  ;;  %v3634_v34 = vadd.f32 %v3633_v49, %v6631_v39 }
0x132b   : > { %v3595_v22 = vrot.slane %v3594_v33, 1  ;;  %v3618_v30 = vadd.f32 %v3617_v36, %v3616_v7  ;;  %v3624_v40 = vadd.f32 %v3623_v37, %v3622_v10  ;;  %v3630_v31 = vadd.f32 %v3629_v3, %v3628_v17  ;;  %p5843_p3 = pneg %p5842_p8 }
0x132c   : > { %v3601_v16 = vrot.slane %v3600_v38, 1  ;;  %v3607_v32 = vrot.slane %v3606_v27, 1  ;;  %v3613_v56 = vrot.slane %v3612_v43, 1  ;;  %v3635_v61 = vrot.slane %v3634_v34, 2 }
0x132d   : > { %v6782_v63 = vadd.f32 %v3595_v22, %v3594_v33  ;;  %v3619_v62 = vrot.slane %v3618_v30, 1  ;;  %v3625_v2 = vrot.slane %v3624_v40, 1  ;;  %v3631_v20 = vrot.slane %v3630_v31, 1  ;;  %p5848_p2 = pnand %p5847_p6, %p5843_p3 }
0x132e   : > { %v6784_v5 = vadd.f32 %v3601_v16, %v3600_v38  ;;  %v6786_v6 = vadd.f32 %v3607_v32, %v3606_v27  ;;  %v6788_v13 = vadd.f32 %v3613_v56, %v3612_v43  ;;  %v3636_v39 = vadd.f32 %v3635_v61, %v3634_v34 }
0x132f   : > { %v6790_v41 = vadd.f32 %v3619_v62, %v3618_v30  ;;  %v6792_v0 = vadd.f32 %v3625_v2, %v3624_v40  ;;  %v6794_v1 = vadd.f32 %v3631_v20, %v3630_v31  ;;  %v3639_v8 = vrot.slane %v6641_v44, 4 }
0x1330   : > { %v3637_v7 = vrot.slane %v3636_v39, 1  ;;  %v3645_v10 = vrot.slane %v6644_v45, 4  ;;  %v3651_v17 = vrot.slane %v6647_v46, 4  ;;  %v3657_v21 = vrot.slane %v6650_v47, 4 }
0x1331   : > { %v3640_v23 = vadd.f32 %v3639_v8, %v6641_v44  ;;  %v3663_v24 = vrot.slane %v6656_v53, 4  ;;  %v3669_v49 = vrot.slane %v6661_v57, 4  ;;  %v3675_v33 = vrot.slane %v6664_v58, 4 }
0x1332   : > { %v6804_v36 = vadd.f32 %v3637_v7, %v3636_v39  ;;  %v3646_v37 = vadd.f32 %v3645_v10, %v6644_v45  ;;  %v3652_v3 = vadd.f32 %v3651_v17, %v6647_v46  ;;  %v3658_v38 = vadd.f32 %v3657_v21, %v6650_v47 }
0x1333   : > { %v3641_v27 = vrot.slane %v3640_v23, 2  ;;  %v3664_v43 = vadd.f32 %v3663_v24, %v6656_v53  ;;  %v3670_v34 = vadd.f32 %v3669_v49, %v6661_v57  ;;  %v3676_v44 = vadd.f32 %v3675_v33, %v6664_v58 }
0x1334   : > { %v3647_v22 = vrot.slane %v3646_v37, 2  ;;  %v3653_v30 = vrot.slane %v3652_v3, 2  ;;  %v3659_v40 = vrot.slane %v3658_v38, 2  ;;  %v3681_v31 = vrot.slane %v6667_v59, 4 }
0x1335   : > { %v3642_v16 = vadd.f32 %v3641_v27, %v3640_v23  ;;  %v3665_v32 = vrot.slane %v3664_v43, 2  ;;  %v3671_v56 = vrot.slane %v3670_v34, 2  ;;  %v3677_v45 = vrot.slane %v3676_v44, 2 }
0x1336   : > { %v3648_v61 = vadd.f32 %v3647_v22, %v3646_v37  ;;  %v3654_v46 = vadd.f32 %v3653_v30, %v3652_v3  ;;  %v3660_v62 = vadd.f32 %v3659_v40, %v3658_v38  ;;  %v3682_v47 = vadd.f32 %v3681_v31, %v6667_v59 }
0x1337   : > { %v3643_v2 = vrot.slane %v3642_v16, 1  ;;  %v3666_v53 = vadd.f32 %v3665_v32, %v3664_v43  ;;  %v3672_v20 = vadd.f32 %v3671_v56, %v3670_v34  ;;  %v3678_v57 = vadd.f32 %v3677_v45, %v3676_v44 }
0x1338   : > { %v3649_v39 = vrot.slane %v3648_v61, 1  ;;  %v3655_v58 = vrot.slane %v3654_v46, 1  ;;  %v3661_v8 = vrot.slane %v3660_v62, 1  ;;  %v3683_v7 = vrot.slane %v3682_v47, 2 }
0x1339   : > { %v6814_v10 = vadd.f32 %v3643_v2, %v3642_v16  ;;  %v3667_v17 = vrot.slane %v3666_v53, 1  ;;  %v3673_v21 = vrot.slane %v3672_v20, 1  ;;  %v3679_v23 = vrot.slane %v3678_v57, 1 }
0x133a   : > { %v6816_v24 = vadd.f32 %v3649_v39, %v3648_v61  ;;  %v6818_v49 = vadd.f32 %v3655_v58, %v3654_v46  ;;  %v6820_v33 = vadd.f32 %v3661_v8, %v3660_v62  ;;  %v3684_v59 = vadd.f32 %v3683_v7, %v3682_v47 }
0x133b   : > { %v6822_v37 = vadd.f32 %v3667_v17, %v3666_v53  ;;  %v6824_v3 = vadd.f32 %v3673_v21, %v3672_v20  ;;  %v6826_v38 = vadd.f32 %v3679_v23, %v3678_v57  ;;  %v3687_v27 = vrot.slane %v6670_v60, 4 }
0x133c   : > { %v3685_v43 = vrot.slane %v3684_v59, 1  ;;  %v3693_v34 = vrot.slane %v6683_v9, 4  ;;  %v3699_v44 = vrot.slane %v6687_v11, 4  ;;  %v3705_v22 = vrot.slane %v6690_v12, 4 }
0x133d   : > { %v3688_v30 = vadd.f32 %v3687_v27, %v6670_v60  ;;  %v3711_v40 = vrot.slane %v6693_v50, 4  ;;  %v3717_v31 = vrot.slane %v6696_v14, 4  ;;  %v3723_v16 = vrot.slane %v6699_v25, 4 }
0x133e   : > { %v6836_v32 = vadd.f32 %v3685_v43, %v3684_v59  ;;  %v3694_v56 = vadd.f32 %v3693_v34, %v6683_v9  ;;  %v3700_v45 = vadd.f32 %v3699_v44, %v6687_v11  ;;  %v3706_v61 = vadd.f32 %v3705_v22, %v6690_v12 }
0x133f   : > { %v3689_v46 = vrot.slane %v3688_v30, 2  ;;  %v3712_v62 = vadd.f32 %v3711_v40, %v6693_v50  ;;  %v3718_v47 = vadd.f32 %v3717_v31, %v6696_v14  ;;  %v3724_v60 = vadd.f32 %v3723_v16, %v6699_v25 }
0x1340   : > { %v3695_v2 = vrot.slane %v3694_v56, 2  ;;  %v3701_v53 = vrot.slane %v3700_v45, 2  ;;  %v3707_v20 = vrot.slane %v3706_v61, 2  ;;  %v3729_v57 = vrot.slane %v6705_v19, 4 }
0x1341   : > { %v3690_v39 = vadd.f32 %v3689_v46, %v3688_v30  ;;  %v3713_v58 = vrot.slane %v3712_v62, 2  ;;  %v3719_v8 = vrot.slane %v3718_v47, 2  ;;  %v3725_v9 = vrot.slane %v3724_v60, 2 }
0x1342   : > { %v3696_v7 = vadd.f32 %v3695_v2, %v3694_v56  ;;  %v3702_v11 = vadd.f32 %v3701_v53, %v3700_v45  ;;  %v3708_v17 = vadd.f32 %v3707_v20, %v3706_v61  ;;  %v3730_v12 = vadd.f32 %v3729_v57, %v6705_v19 }
0x1343   : > { %v3691_v21 = vrot.slane %v3690_v39, 1  ;;  %v3714_v50 = vadd.f32 %v3713_v58, %v3712_v62  ;;  %v3720_v23 = vadd.f32 %v3719_v8, %v3718_v47  ;;  %v3726_v14 = vadd.f32 %v3725_v9, %v3724_v60 }
0x1344   : > { %v3697_v59 = vrot.slane %v3696_v7, 1  ;;  %v3703_v25 = vrot.slane %v3702_v11, 1  ;;  %v3709_v27 = vrot.slane %v3708_v17, 1  ;;  %v3731_v43 = vrot.slane %v3730_v12, 2 }
0x1345   : > { %v6846_v34 = vadd.f32 %v3691_v21, %v3690_v39  ;;  %v3715_v44 = vrot.slane %v3714_v50, 1  ;;  %v3721_v22 = vrot.slane %v3720_v23, 1  ;;  %v3727_v30 = vrot.slane %v3726_v14, 1 }
0x1346   : > { %v6848_v40 = vadd.f32 %v3697_v59, %v3696_v7  ;;  %v6850_v31 = vadd.f32 %v3703_v25, %v3702_v11  ;;  %v6852_v16 = vadd.f32 %v3709_v27, %v3708_v17  ;;  %v3732_v19 = vadd.f32 %v3731_v43, %v3730_v12 }
0x1347   : > { %v6854_v56 = vadd.f32 %v3715_v44, %v3714_v50  ;;  %v6856_v45 = vadd.f32 %v3721_v22, %v3720_v23  ;;  %v6858_v61 = vadd.f32 %v3727_v30, %v3726_v14  ;;  %v3735_v46 = vrot.slane %v6708_v26, 4 }
0x1348   : > { %v3733_v62 = vrot.slane %v3732_v19, 1  ;;  %v3741_v47 = vrot.slane %v6711_v28, 4  ;;  %v3747_v60 = vrot.slane %v6714_v29, 4  ;;  %v3753_v2 = vrot.slane %v6717_v35, 4 }
0x1349   : > { %v3736_v53 = vadd.f32 %v3735_v46, %v6708_v26  ;;  %v3795_v20 = vrot.slane %v6752_v54, 7  ;;  %v3796_v57 = vrot.slane %v6754_v48, 6  ;;  %v3797_v39 = vrot.slane %v6756_v4, 5 }
0x134a   : > { %v6868_v58 = vadd.f32 %v3733_v62, %v3732_v19  ;;  %v3742_v8 = vadd.f32 %v3741_v47, %v6711_v28  ;;  %v3748_v9 = vadd.f32 %v3747_v60, %v6714_v29  ;;  %v3754_v7 = vadd.f32 %v3753_v2, %v6717_v35 }
0x134b   : > { %v3737_v11 = vrot.slane %v3736_v53, 2  ;;  %v3798_v17 = vrot.slane %v6758_v51, 4  ;;  %v3799_v12 = vrot.slane %v6760_v52, 3  ;;  %v3800_v26 = vrot.slane %v6762_v55, 2 }
0x134c   : > { %v3743_v54 = vrot.slane %v3742_v8, 2  ;;  %v3749_v21 = vrot.slane %v3748_v9, 2  ;;  %v3755_v48 = vrot.slane %v3754_v7, 2  ;;  %v3801_v4 = vrot.slane %v6772_v15, 1 }
0x134d   : > { %v3738_v50 = vadd.f32 %v3737_v11, %v3736_v53  ;;  %v3802_v23 = vrot.slane %v6784_v5, 7  ;;  %v3803_v28 = vrot.slane %v6786_v6, 6  ;;  %v3804_v29 = vrot.slane %v6788_v13, 5 }
0x134e   : > { %v3744_v35 = vadd.f32 %v3743_v54, %v3742_v8  ;;  %v3750_v14 = vadd.f32 %v3749_v21, %v3748_v9  ;;  %v3756_v59 = vadd.f32 %v3755_v48, %v3754_v7  ;;  %v3805_v51 = vrot.slane %v6790_v41, 4 }
0x134f   : > { %v3739_v52 = vrot.slane %v3738_v50, 1  ;;  %v3806_v55 = vrot.slane %v6792_v0, 3  ;;  %v3807_v25 = vrot.slane %v6794_v1, 2  ;;  %v3808_v15 = vrot.slane %v6804_v36, 1 }
0x1350   : > { %v3745_v27 = vrot.slane %v3744_v35, 1  ;;  %v3751_v43 = vrot.slane %v3750_v14, 1  ;;  %v3757_v5 = vrot.slane %v3756_v59, 1  ;;  %v3809_v6 = vrot.slane %v6816_v24, 7 }
0x1351   : > { %v3740_v44 = vadd.f32 %v3739_v52, %v3738_v50  ;;  %v3810_v13 = vrot.slane %v6818_v49, 6  ;;  %v3811_v22 = vrot.slane %v6820_v33, 5  ;;  %v3812_v41 = vrot.slane %v6822_v37, 4 }
0x1352   : > { %v3746_v30 = vadd.f32 %v3745_v27, %v3744_v35  ;;  %v3752_v19 = vadd.f32 %v3751_v43, %v3750_v14  ;;  %v3758_v0 = vadd.f32 %v3757_v5, %v3756_v59  ;;  %v3813_v1 = vrot.slane %v6824_v3, 3 }
0x1353   : > { %v3814_v36 = vrot.slane %v6826_v38, 2  ;;  %v3815_v46 = vrot.slane %v6836_v32, 1  ;;  %v3816_v24 = vrot.slane %v6848_v40, 7  ;;  %v3817_v62 = vrot.slane %v6850_v31, 6 }
0x1354   : > { %v3818_v49 = vrot.slane %v6852_v16, 5  ;;  %v3819_v33 = vrot.slane %v6854_v56, 4  ;;  %v3820_v37 = vrot.slane %v6856_v45, 3  ;;  %v3821_v47 = vrot.slane %v6858_v61, 2 }
0x1355   : > { %v3822_v60 = vrot.slane %v6868_v58, 1  ;;  %v3823_v3 = vrot.slane %v3746_v30, 7  ;;  %v3824_v2 = vrot.slane %v3752_v19, 6  ;;  %v3825_v53 = vrot.slane %v3758_v0, 5 }
0x1356   : > { %v3826_v38 = vsel %vm3461_vm3, %v6750_v42, %v3795_v20  ;;  %vm3827_vm6 = vcmask 1042434   ;;  %vm3830_vm7 = vcmask 1044484   ;;  %vm3832_vm8 = vcmask 1046534  }
0x1357   : > { %v3828_v32 = vsel %vm3827_vm6, %v3796_v57, %v3797_v39  ;;  %v3831_v40 = vsel %vm3830_vm7, %v3798_v17, %v3799_v12  ;;  %v3833_v31 = vsel %vm3832_vm8, %v3800_v26, %v3801_v4  ;;  %vm3834_vm9 = vcmask 1045508  }
0x1358   : > { %v3829_v16 = vsel %vm3463_vm4, %v3826_v38, %v3828_v32  ;;  %v3835_v56 = vsel %vm3834_vm9, %v3831_v40, %v3833_v31  ;;  %vm3836_vm10 = vcmask 1043456   ;;  %v3838_v45 = vsel %vm3461_vm3, %v6782_v63, %v3802_v23 }
0x1359   : > { %v3837_v42 = vsel %vm3836_vm10, %v3829_v16, %v3835_v56  ;;  %v3839_v61 = vsel %vm3827_vm6, %v3803_v28, %v3804_v29  ;;  %v3841_v20 = vsel %vm3830_vm7, %v3805_v51, %v3806_v55  ;;  %v3842_v57 = vsel %vm3832_vm8, %v3807_v25, %v3808_v15 }
0x135a   : > { %v3840_v39 = vsel %vm3463_vm4, %v3838_v45, %v3839_v61  ;;  %v3843_v58 = vsel %vm3834_vm9, %v3841_v20, %v3842_v57  ;;  %v3845_v63 = vsel %vm3461_vm3, %v6814_v10, %v3809_v6  ;;  %v3846_v8 = vsel %vm3827_vm6, %v3810_v13, %v3811_v22  ;;  %3867 = vst [vmem:[%s862_s20] sm:$0xff] %v3837_v42 }
0x135b   : > { %v3844_v9 = vsel %vm3836_vm10, %v3840_v39, %v3843_v58  ;;  %v3847_v7 = vsel %vm3463_vm4, %v3845_v63, %v3846_v8  ;;  %v3848_v11 = vsel %vm3830_vm7, %v3812_v41, %v3813_v1  ;;  %v3849_v17 = vsel %vm3832_vm8, %v3814_v36, %v3815_v46 }
0x135c   : > { %v3850_v12 = vsel %vm3834_vm9, %v3848_v11, %v3849_v17  ;;  %v3852_v26 = vsel %vm3461_vm3, %v6846_v34, %v3816_v24  ;;  %v3853_v10 = vsel %vm3827_vm6, %v3817_v62, %v3818_v49  ;;  %v3855_v54 = vsel %vm3830_vm7, %v3819_v33, %v3820_v37  ;;  %3868 = vst [vmem:[%s862_s20 + $0x8] sm:$0xff] %v3844_v9 }
0x135d   : > { %v3851_v21 = vsel %vm3836_vm10, %v3847_v7, %v3850_v12  ;;  %v3854_v48 = vsel %vm3463_vm4, %v3852_v26, %v3853_v10  ;;  %v3856_v4 = vsel %vm3832_vm8, %v3821_v47, %v3822_v60  ;;  %v3859_v50 = vsel %vm3461_vm3, %v3740_v44, %v3823_v3 }
0x135e   : > { %vm3871_vm11 = vcmp.lt.s32.totalorder %v3401_v18, 512  ;;  %v3857_v34 = vsel %vm3834_vm9, %v3855_v54, %v3856_v4  ;;  %v3860_v23 = vsel %vm3827_vm6, %v3824_v2, %v3825_v53  ;;  %3869 = vst [vmem:[%s862_s20 + $0x10] sm:$0xff] %v3851_v21 }
0x135f   : > { %v3858_v28 = vsel %vm3836_vm10, %v3854_v48, %v3857_v34  ;;  %v3861_v29 = vsel %vm3463_vm4, %v3859_v50, %v3860_v23 }
0x1360   : > { %3870 = vst [vmem:[%s862_s20 + $0x18] sm:$0xff] %v3858_v28 }
0x1361   : > { %3873 = vst.msk [vmem:[%s862_s20 + $0x20] sm:$0xf] %vm3871_vm11, %v3861_v29 }
0x1362   : > { %5851 = shalt.err (!%p5848_p2)
}
0x1363   : > { %5223 = dma.vmem_to_hbm [thread:$0]  (%p6109_p11), %s3907_s23, 576, %s3909_s3, %s3880_s7  }
0x1364 PF: > { %s7070_s10 = sld [smem:[#allocation37_spill]]  ;;  %p7072_p7 = scmp.ge.s32.totalorder %s5920_s14, 2 }
0x1366   : > { %p5265_p13 = pnand %p7072_p7, %p6113_p12 }
0x1368   : > { %p5266_p5 = pneg %p5265_p13 }
0x136a   : > { %s3920_s15 = sand.u32 1, %s7070_s10  }
0x136b   : > { %s3921_s21 = scalar_lea.sflag [#allocation7], %s3920_s15 }
0x136c   : > { %5899 = dma.done.wait (%p5266_p5), %s3921_s21, 48  }
0x136d   : > { %5901 = vsyncadd (%p5266_p5), %s3921_s21, 4294967248  ;;  %s3931_s20 = scalar_lea.sflag [#allocation26], %s3920_s15 }
0x136e   : > { %5903 = dma.done.wait (%p5266_p5), %s3931_s20, 576  }
0x136f   : > { %5905 = vsyncadd (%p5266_p5), %s3931_s20, 4294966720  ;;  %s7073_s14 = sld [smem:[#allocation39_spill]]  ;;  %s7076_s3 = smov %s5912_s16 }
0x1370   : > { %s7074_s26 = sld [smem:[#allocation38_spill]] }
0x1371   : > { %s7075_s1 = sld [smem:[#allocation40_spill]] }
0x1375   : > { %p52_p11 = scmp.ge.s32.totalorder %s7073_s14, 4  }
0x1376   : > { %s7077_s16 = smov %s7074_s26 }
0x1377   : > { %s7078_s26 = smov %s7075_s1  ;;  %54 = sbr.rel (!%p52_p11) target bundleno = 38 (0x26), region = 224 }
0x137c   :  { %3937 = vsyncpa [#allocation6], 1 }
0x137d   :  { %3939 = vsyncpa [#allocation6 + $0x1], 1 }
0x137e   :  { %3940 = vsyncpa [#allocation9], 1 }
0x137f   :  { %3941 = vsyncpa [#allocation12], 1 }
0x1380   :  { %3942 = vsyncpa [#allocation15], 1 }
0x1381   :  { %3943 = vsyncpa [#allocation18], 1 }
0x1382   :  { %3944 = vsyncpa [#allocation21], 1 }
0x1383   :  { %3945 = vsyncpa [#allocation7], 1 }
0x1384   :  { %3947 = vsyncpa [#allocation7 + $0x1], 1 }
0x1385   :  { %3948 = vsyncpa [#allocation26], 1 }
0x1386   :  { %3950 = vsyncpa [#allocation26 + $0x1], 1 }

</bundles_post_ra>
